<compile_context>
chip_gen: v6e
topology: v6e:2x2x1
jax: 0.10.0
libtpu: 0.0.40
codegen_flags: <defaults>
</compile_context>

<pallas_src>
import functools

import jax
import jax.numpy as jnp
from jax.experimental import pallas as pl
from jax.experimental.pallas import tpu as pltpu


# ------------------------------ tiling helpers ------------------------------


def _pick_tile(dim, target, align):
    """Largest tile <= target that divides dim and is a multiple of align.

    Falls back to the full dimension when dim is small or not align-divisible
    (full-extent blocks are always legal)."""
    if dim <= target:
        return dim
    if dim % align != 0:
        return dim
    t = (min(target, dim) // align) * align
    while t >= align:
        if dim % t == 0:
            return t
        t -= align
    return dim


# ------------------------------ Pallas kernels ------------------------------


def _linear_kernel(*refs, activation, has_residual):
    if has_residual:
        x_ref, w_ref, b_ref, r_ref, o_ref, acc_ref = refs
    else:
        x_ref, w_ref, b_ref, o_ref, acc_ref = refs
        r_ref = None
    k = pl.program_id(2)

    @pl.when(k == 0)
    def _():
        acc_ref[...] = jnp.zeros_like(acc_ref)

    acc_ref[...] += jnp.dot(
        x_ref[...].astype(jnp.bfloat16),
        w_ref[...].astype(jnp.bfloat16),
        preferred_element_type=jnp.float32,
    )

    @pl.when(k == pl.num_programs(2) - 1)
    def _():
        y = acc_ref[...] + b_ref[...]
        if activation == "gelu":
            # TODO(synk): torch nn.GELU defaults to the exact erf form; tanh
            # approximation used here (small numeric difference).
            y = jax.nn.gelu(y, approximate=True)
        if has_residual:
            y = y + r_ref[...]
        o_ref[...] = y.astype(o_ref.dtype)


def linear(x, w, b, activation="none", residual=None):
    """x:(M,K) @ w:(K,N) + b -> (M,N); optional fused gelu and fused residual add."""
    M, K = x.shape
    N = w.shape[1]
    tm = _pick_tile(M, 512, 8)
    tn = _pick_tile(N, 512, 128)
    tk = _pick_tile(K, 512, 128)
    grid = (M // tm, N // tn, K // tk)
    b2 = b.reshape(1, N).astype(jnp.float32)

    in_specs = [
        pl.BlockSpec((tm, tk), lambda i, j, k: (i, k)),
        pl.BlockSpec((tk, tn), lambda i, j, k: (k, j)),
        pl.BlockSpec((1, tn), lambda i, j, k: (0, j)),
    ]
    args = [x, w, b2]
    if residual is not None:
        in_specs.append(pl.BlockSpec((tm, tn), lambda i, j, k: (i, j)))
        args.append(residual)

    return pl.pallas_call(
        functools.partial(_linear_kernel, activation=activation,
                          has_residual=residual is not None),
        out_shape=jax.ShapeDtypeStruct((M, N), jnp.float32),
        grid=grid,
        in_specs=in_specs,
        out_specs=pl.BlockSpec((tm, tn), lambda i, j, k: (i, j)),
        scratch_shapes=[pltpu.VMEM((tm, tn), jnp.float32)],
        compiler_params=pltpu.CompilerParams(
            dimension_semantics=("parallel", "parallel", "arbitrary")),
    )(*args)


def _layernorm_kernel(x_ref, g_ref, b_ref, o_ref, *, eps):
    x = x_ref[...]
    mean = jnp.mean(x, axis=-1, keepdims=True)
    var = jnp.mean((x - mean) ** 2, axis=-1, keepdims=True)
    o_ref[...] = (x - mean) * jax.lax.rsqrt(var + eps) * g_ref[...] + b_ref[...]


def layer_norm(x, gamma, beta, eps=1e-5):
    """x: (B, L, D) -> LayerNorm over last dim (biased variance, like torch)."""
    B, L, D = x.shape
    M = B * L
    x2 = x.reshape(M, D)
    tm = _pick_tile(M, 1024, 8)
    out = pl.pallas_call(
        functools.partial(_layernorm_kernel, eps=eps),
        out_shape=jax.ShapeDtypeStruct((M, D), jnp.float32),
        grid=(M // tm,),
        in_specs=[
            pl.BlockSpec((tm, D), lambda i: (i, 0)),
            pl.BlockSpec((1, D), lambda i: (0, 0)),
            pl.BlockSpec((1, D), lambda i: (0, 0)),
        ],
        out_specs=pl.BlockSpec((tm, D), lambda i: (i, 0)),
        compiler_params=pltpu.CompilerParams(dimension_semantics=("parallel",)),
    )(x2, gamma.reshape(1, D), beta.reshape(1, D))
    return out.reshape(B, L, D)


def _performer_heads(q, k, v, n_heads, eps):
    """Performer relu-kernel linear attention, heads folded in the lane dim.

    q: (Lq, D), k/v: (Lk, D) with D = n_heads * Dh. Returns (Lq, D).
    TODO(synk): reference PerformerAttention may apply a random-feature
    projection / 1/sqrt(sqrt(Dh)) normalizer before the relu kernel fn; plain
    relu feature map used here.
    """
    L, D = q.shape
    Dh = D // n_heads
    outs = []
    for h in range(n_heads):
        sl = slice(h * Dh, (h + 1) * Dh)
        qh = jnp.maximum(q[:, sl], 0.0)          # (Lq, Dh) f32
        kh = jnp.maximum(k[:, sl], 0.0)          # (Lk, Dh) f32
        vh = v[:, sl]                            # (Lk, Dh) f32
        # kv = k^T v without an explicit transpose: contract over the token dim.
        kv = jax.lax.dot_general(
            kh.astype(jnp.bfloat16), vh.astype(jnp.bfloat16),
            dimension_numbers=(((0,), (0,)), ((), ())),
            preferred_element_type=jnp.float32)                  # (Dh, Dh)
        num = jnp.dot(qh.astype(jnp.bfloat16), kv.astype(jnp.bfloat16),
                      preferred_element_type=jnp.float32)        # (Lq, Dh)
        z = jnp.sum(kh, axis=0, keepdims=True)                   # (1, Dh)
        den = jnp.sum(qh * z, axis=-1, keepdims=True)            # (Lq, 1) VPU/XLU
        outs.append(num / (den + eps))
    return jnp.concatenate(outs, axis=-1)


def _performer_self_kernel(qkv_ref, o_ref, *, n_heads, d_model, eps):
    qkv = qkv_ref[0]                                             # (L, 3D)
    q = qkv[:, :d_model]
    k = qkv[:, d_model:2 * d_model]
    v = qkv[:, 2 * d_model:]
    o_ref[0] = _performer_heads(q, k, v, n_heads, eps)


def _performer_cross_kernel(q_ref, kv_ref, o_ref, *, n_heads, d_model, eps):
    q = q_ref[0]                                                 # (Lq, D)
    kv = kv_ref[0]                                               # (Lk, 2D)
    k = kv[:, :d_model]
    v = kv[:, d_model:]
    o_ref[0] = _performer_heads(q, k, v, n_heads, eps)


def performer_self_attention(qkv, n_heads):
    """qkv: (B, L, 3D) fused projection -> (B, L, D)."""
    B, L, D3 = qkv.shape
    D = D3 // 3
    return pl.pallas_call(
        functools.partial(_performer_self_kernel, n_heads=n_heads,
                          d_model=D, eps=1e-6),
        out_shape=jax.ShapeDtypeStruct((B, L, D), jnp.float32),
        grid=(B,),
        in_specs=[pl.BlockSpec((1, L, D3), lambda b: (b, 0, 0))],
        out_specs=pl.BlockSpec((1, L, D), lambda b: (b, 0, 0)),
        compiler_params=pltpu.CompilerParams(dimension_semantics=("parallel",)),
    )(qkv)


def performer_cross_attention(q, kv, n_heads):
    """q: (B, Lq, D); kv: (B, Lk, 2D) fused projection -> (B, Lq, D)."""
    B, Lq, D = q.shape
    Lk = kv.shape[1]
    return pl.pallas_call(
        functools.partial(_performer_cross_kernel, n_heads=n_heads,
                          d_model=D, eps=1e-6),
        out_shape=jax.ShapeDtypeStruct((B, Lq, D), jnp.float32),
        grid=(B,),
        in_specs=[
            pl.BlockSpec((1, Lq, D), lambda b: (b, 0, 0)),
            pl.BlockSpec((1, Lk, 2 * D), lambda b: (b, 0, 0)),
        ],
        out_specs=pl.BlockSpec((1, Lq, D), lambda b: (b, 0, 0)),
        compiler_params=pltpu.CompilerParams(dimension_semantics=("parallel",)),
    )(q, kv)


def _embed_kernel(inp_ref, w_ref, b_ref, given_ref, space_ref, o_ref):
    # value/time linear + 'given' embedding + variable (space) embedding, fused.
    y = jnp.dot(inp_ref[0].astype(jnp.bfloat16), w_ref[...].astype(jnp.bfloat16),
                preferred_element_type=jnp.float32)
    o_ref[0] = y + b_ref[...] + given_ref[...] + space_ref[...]


# ---------------------------- model (glue in JAX) ----------------------------


def attention_layer_self(p, x, n_heads):
    B, L, D = x.shape
    x2 = x.reshape(B * L, D)
    qkv = linear(x2, p["w_qkv"], p["b_qkv"]).reshape(B, L, 3 * D)
    o = performer_self_attention(qkv, n_heads)
    # output projection with fused residual add (post-norm residual)
    o = linear(o.reshape(B * L, D), p["w_o"], p["b_o"], residual=x2)
    return o.reshape(B, L, D)


def attention_layer_cross(p, x_q, x_kv, n_heads):
    B, Lq, D = x_q.shape
    Lk = x_kv.shape[1]
    xq2 = x_q.reshape(B * Lq, D)
    q = linear(xq2, p["w_qkv"][:, :D], p["b_qkv"][:D]).reshape(B, Lq, D)
    kv = linear(x_kv.reshape(B * Lk, D),
                p["w_qkv"][:, D:], p["b_qkv"][D:]).reshape(B, Lk, 2 * D)
    o = performer_cross_attention(q, kv, n_heads)
    o = linear(o.reshape(B * Lq, D), p["w_o"], p["b_o"], residual=xq2)
    return o.reshape(B, Lq, D)


def ffn_with_residual(p, x):
    B, L, D = x.shape
    x2 = x.reshape(B * L, D)
    h = linear(x2, p["ff1_w"], p["ff1_b"], activation="gelu")
    h = linear(h, p["ff2_w"], p["ff2_b"], residual=x2)
    return h.reshape(B, L, D)


def encoder_layer(p, x, n_heads):
    h = attention_layer_self(p["attn"], x, n_heads)          # includes +x residual
    x = layer_norm(h, p["ln1_g"], p["ln1_b"])
    f = ffn_with_residual(p, x)                               # includes +x residual
    x = layer_norm(f, p["ln2_g"], p["ln2_b"])
    return x


def decoder_layer(p, x, cross, n_heads):
    h = attention_layer_self(p["self_attn"], x, n_heads)
    x = layer_norm(h, p["ln1_g"], p["ln1_b"])
    c = attention_layer_cross(p["cross_attn"], x, cross, n_heads)
    x = layer_norm(c, p["ln2_g"], p["ln2_b"])
    f = ffn_with_residual(p, x)
    x = layer_norm(f, p["ln3_g"], p["ln3_b"])
    return x


def spatio_temporal_embed(p, y, x_mark, is_encoder, d_y, d_model):
    """Flatten (B, L, d_y) values into L*d_y tokens (variable-major) and embed.

    The value/time linear, 'given' embedding and variable embedding are fused
    into a single Pallas kernel gridded over the batch."""
    B, L, _ = y.shape
    Lt = L * d_y
    y_tok = jnp.concatenate(jnp.split(y, d_y, axis=-1), axis=1)      # (B, Lt, 1)
    x_tok = jnp.tile(x_mark, (1, d_y, 1))                            # (B, Lt, d_x)
    inp = jnp.concatenate([y_tok, x_tok], axis=-1)                   # (B, Lt, 1+d_x)
    Kin = inp.shape[-1]

    given_idx = 1 if is_encoder else 0
    given = p["given_emb"][given_idx].reshape(1, d_model)
    var_idx = jnp.repeat(jnp.arange(d_y, dtype=jnp.int32), L)        # (Lt,)
    space = p["var_emb"][var_idx]                                    # (Lt, d_model)

    emb = pl.pallas_call(
        _embed_kernel,
        out_shape=jax.ShapeDtypeStruct((B, Lt, d_model), jnp.float32),
        grid=(B,),
        in_specs=[
            pl.BlockSpec((1, Lt, Kin), lambda b: (b, 0, 0)),
            pl.BlockSpec((Kin, d_model), lambda b: (0, 0)),
            pl.BlockSpec((1, d_model), lambda b: (0, 0)),
            pl.BlockSpec((1, d_model), lambda b: (0, 0)),
            pl.BlockSpec((Lt, d_model), lambda b: (0, 0)),
        ],
        out_specs=pl.BlockSpec((1, Lt, d_model), lambda b: (b, 0, 0)),
        compiler_params=pltpu.CompilerParams(dimension_semantics=("parallel",)),
    )(inp, p["vt_w"], p["vt_b"].reshape(1, d_model), given, space)

    var_idx_b = jnp.broadcast_to(var_idx[None], (B, Lt))
    return emb, var_idx_b


def spacetimeformer_forward(params, x_enc, x_mark_enc, x_dec, x_mark_dec,
                            d_y, d_model, n_heads):
    # ----- encoder -----
    enc_x, enc_var_idx = spatio_temporal_embed(
        params["emb"], x_enc, x_mark_enc, True, d_y, d_model)   # emb dropout = identity
    for lp in params["enc_layers"]:
        enc_x = encoder_layer(lp, enc_x, n_heads)
    attns = None                                                # output_attention=False

    # ----- decoder -----
    dec_x, dec_var_idx = spatio_temporal_embed(
        params["emb"], x_dec, x_mark_dec, False, d_y, d_model)
    for lp in params["dec_layers"]:
        dec_x = decoder_layer(lp, dec_x, enc_x, n_heads)

    # ----- forecaster (out_dim = d_y for 'spatio-temporal-event') -----
    Bd, Ld, D = dec_x.shape
    forecast_out = linear(dec_x.reshape(Bd * Ld, D),
                          params["fc_w"], params["fc_b"]).reshape(Bd, Ld, d_y)

    # 'spatio-temporal-event' distribution stats (computed, not returned, as in torch)
    vals = forecast_out[..., :4]                                # val_0..val_3
    means = jnp.mean(jnp.mean(vals, axis=1), axis=-1, keepdims=True)
    log_stds = jnp.mean(jnp.std(vals, axis=1, ddof=1), axis=-1, keepdims=True)
    stds = 0.001 + (1.0 - 0.001) * jnp.log(1.0 + jnp.exp(log_stds))
    _ = (means, stds)   # Normal(means, stds) is constructed but never returned in torch

    # TODO(synk): self.classifier is undefined in the provided __init__; skip branch.
    classifier_out, var_idxs = None, None
    return forecast_out, (classifier_out, var_idxs), attns


# ------------------------------- init helpers --------------------------------


def _init_linear(key, fan_in, fan_out, w_dtype=jnp.bfloat16):
    k1, k2 = jax.random.split(key)
    bound = 1.0 / jnp.sqrt(fan_in)
    w = jax.random.uniform(k1, (fan_in, fan_out), jnp.float32, -bound, bound)
    b = jax.random.uniform(k2, (fan_out,), jnp.float32, -bound, bound)
    return w.astype(w_dtype), b


def _init_attn(key, d_model):
    kq, kk, kv, ko = jax.random.split(key, 4)
    wq, bq = _init_linear(kq, d_model, d_model)
    wk, bk = _init_linear(kk, d_model, d_model)
    wv, bv = _init_linear(kv, d_model, d_model)
    wo, bo = _init_linear(ko, d_model, d_model)
    return {
        "w_qkv": jnp.concatenate([wq, wk, wv], axis=1),    # (D, 3D) bf16
        "b_qkv": jnp.concatenate([bq, bk, bv], axis=0),    # (3D,)  f32
        "w_o": wo, "b_o": bo,
    }


def _init_enc_layer(key, d_model, d_ff):
    ks = jax.random.split(key, 3)
    ff1_w, ff1_b = _init_linear(ks[1], d_model, d_ff)
    ff2_w, ff2_b = _init_linear(ks[2], d_ff, d_model)
    return {
        "attn": _init_attn(ks[0], d_model),
        "ln1_g": jnp.ones((d_model,), jnp.float32), "ln1_b": jnp.zeros((d_model,), jnp.float32),
        "ln2_g": jnp.ones((d_model,), jnp.float32), "ln2_b": jnp.zeros((d_model,), jnp.float32),
        "ff1_w": ff1_w, "ff1_b": ff1_b, "ff2_w": ff2_w, "ff2_b": ff2_b,
    }


def _init_dec_layer(key, d_model, d_ff):
    ks = jax.random.split(key, 4)
    ff1_w, ff1_b = _init_linear(ks[2], d_model, d_ff)
    ff2_w, ff2_b = _init_linear(ks[3], d_ff, d_model)
    return {
        "self_attn": _init_attn(ks[0], d_model),
        "cross_attn": _init_attn(ks[1], d_model),
        "ln1_g": jnp.ones((d_model,), jnp.float32), "ln1_b": jnp.zeros((d_model,), jnp.float32),
        "ln2_g": jnp.ones((d_model,), jnp.float32), "ln2_b": jnp.zeros((d_model,), jnp.float32),
        "ln3_g": jnp.ones((d_model,), jnp.float32), "ln3_b": jnp.zeros((d_model,), jnp.float32),
        "ff1_w": ff1_w, "ff1_b": ff1_b, "ff2_w": ff2_w, "ff2_b": ff2_b,
    }


def init_params(key, d_y, d_x, d_model, d_ff, e_layers, d_layers):
    ks = jax.random.split(key, 6 + e_layers + d_layers)
    vt_w, vt_b = _init_linear(ks[0], 1 + d_x, d_model)
    fc_w, fc_b = _init_linear(ks[1], d_model, d_y)
    emb = {
        "vt_w": vt_w, "vt_b": vt_b,
        "given_emb": 0.02 * jax.random.normal(ks[2], (2, d_model), jnp.float32),
        "var_emb": 0.02 * jax.random.normal(ks[3], (d_y, d_model), jnp.float32),
    }
    enc_layers = [_init_enc_layer(ks[6 + i], d_model, d_ff) for i in range(e_layers)]
    dec_layers = [_init_dec_layer(ks[6 + e_layers + i], d_model, d_ff)
                  for i in range(d_layers)]
    return {"emb": emb, "enc_layers": enc_layers, "dec_layers": dec_layers,
            "fc_w": fc_w, "fc_b": fc_b}


# ----------------------------------- main ------------------------------------

if __name__ == "__main__":
    # small config consistent with the module (d_y=7 required by the 7-way split)
    d_y, d_x = 7, 4
    d_model, n_heads, d_ff = 32, 2, 32
    e_layers, d_layers = 2, 2
    B, L_enc, L_dec = 2, 8, 8

    key = jax.random.PRNGKey(0)
    k_in, k_par = jax.random.split(key)
    k1, k2, k3, k4 = jax.random.split(k_in, 4)
    x_enc = jax.random.normal(k1, (B, L_enc, d_y), jnp.float32)
    x_mark_enc = jax.random.normal(k2, (B, L_enc, d_x), jnp.float32)
    x_dec = jax.random.normal(k3, (B, L_dec, d_y), jnp.float32)
    x_mark_dec = jax.random.normal(k4, (B, L_dec, d_x), jnp.float32)

    params = init_params(k_par, d_y, d_x, d_model, d_ff, e_layers, d_layers)

    fwd = jax.jit(functools.partial(
        spacetimeformer_forward, d_y=d_y, d_model=d_model, n_heads=n_heads))
    forecast_out, (cls_out, var_idxs), attns = fwd(
        params, x_enc, x_mark_enc, x_dec, x_mark_dec)
    forecast_out = jax.block_until_ready(forecast_out)

    assert forecast_out.shape == (B, L_dec * d_y, d_y)
    assert forecast_out.dtype == jnp.float32
    assert bool(jnp.all(jnp.isfinite(forecast_out)))
    print("KERNEL_OK")
</pallas_src>

<mosaic_0001>
module attributes {stable_mosaic.version = 11 : i64} {
  func.func @_linear_kernel(%arg0: i32, %arg1: i32, %arg2: i32, %arg3: memref<112x32xf32, #tpu.memory_space<vmem>>, %arg4: memref<32x96xbf16, #tpu.memory_space<vmem>>, %arg5: memref<1x96xf32, #tpu.memory_space<vmem>>, %arg6: memref<112x96xf32, #tpu.memory_space<vmem>>, %arg7: memref<112x96xf32, #tpu.memory_space<vmem>>) attributes {dimension_semantics = [#tpu.dimension_semantics<parallel>, #tpu.dimension_semantics<parallel>, #tpu.dimension_semantics<arbitrary>], iteration_bounds = array<i64: 1, 1, 1>, scalar_prefetch = 0 : i64, scratch_operands = 1 : i64, tpu.core_type = #tpu.core_type<tc>, window_params = [{transform_indices = @transform_0, window_bounds = array<i64: 112, 32>}, {transform_indices = @transform_1, window_bounds = array<i64: 32, 96>}, {transform_indices = @transform_2, window_bounds = array<i64: 1, 96>}, {transform_indices = @transform_3, window_bounds = array<i64: 112, 96>}]} {
    %c0_i32 = arith.constant 0 : i32
    %0 = arith.cmpi eq, %arg2, %c0_i32 : i32
    %1 = arith.extui %0 : i1 to i32
    %c0_i32_0 = arith.constant 0 : i32
    %2 = arith.cmpi ne, %1, %c0_i32_0 : i32
    scf.if %2 {
      %cst_10 = arith.constant 0.000000e+00 : f32
      %13 = vector.broadcast %cst_10 : f32 to vector<112x96xf32>
      %c0_11 = arith.constant 0 : index
      %c0_12 = arith.constant 0 : index
      %14 = vector.load %arg7[%c0_11, %c0_12] : memref<112x96xf32, #tpu.memory_space<vmem>>, vector<112x96xf32>
      tpu.vector_store %arg7[%c0_11, %c0_12], %13 {strides = array<i32>} : memref<112x96xf32, #tpu.memory_space<vmem>>, vector<112x96xf32>,
    } else {
    }
    %c0 = arith.constant 0 : index
    %c0_1 = arith.constant 0 : index
    %3 = vector.load %arg7[%c0, %c0_1] : memref<112x96xf32, #tpu.memory_space<vmem>>, vector<112x96xf32>
    %c0_2 = arith.constant 0 : index
    %c0_3 = arith.constant 0 : index
    %4 = vector.load %arg3[%c0_2, %c0_3] : memref<112x32xf32, #tpu.memory_space<vmem>>, vector<112x32xf32>
    %5 = arith.truncf %4 : vector<112x32xf32> to vector<112x32xbf16>
    %c0_4 = arith.constant 0 : index
    %c0_5 = arith.constant 0 : index
    %6 = vector.load %arg4[%c0_4, %c0_5] : memref<32x96xbf16, #tpu.memory_space<vmem>>, vector<32x96xbf16>
    %cst = arith.constant dense<0.000000e+00> : vector<112x96xf32>
    %7 = tpu.matmul %5, %6, %cst {dimension_numbers = #tpu.dot_dimension_numbers<[1], [0], [0], [1], [0, 0, 1, 1], [], []>} : vector<112x32xbf16>, vector<32x96xbf16>, vector<112x96xf32> -> vector<112x96xf32>
    %8 = arith.addf %3, %7 : vector<112x96xf32>
    %c0_6 = arith.constant 0 : index
    %c0_7 = arith.constant 0 : index
    %9 = vector.load %arg7[%c0_6, %c0_7] : memref<112x96xf32, #tpu.memory_space<vmem>>, vector<112x96xf32>
    tpu.vector_store %arg7[%c0_6, %c0_7], %8 {strides = array<i32>} : memref<112x96xf32, #tpu.memory_space<vmem>>, vector<112x96xf32>,
    %c0_i32_8 = arith.constant 0 : i32
    %10 = arith.cmpi eq, %arg2, %c0_i32_8 : i32
    %11 = arith.extui %10 : i1 to i32
    %c0_i32_9 = arith.constant 0 : i32
    %12 = arith.cmpi ne, %11, %c0_i32_9 : i32
    scf.if %12 {
      %c0_10 = arith.constant 0 : index
      %c0_11 = arith.constant 0 : index
      %13 = vector.load %arg7[%c0_10, %c0_11] : memref<112x96xf32, #tpu.memory_space<vmem>>, vector<112x96xf32>
      %c0_12 = arith.constant 0 : index
      %c0_13 = arith.constant 0 : index
      %14 = vector.load %arg5[%c0_12, %c0_13] : memref<1x96xf32, #tpu.memory_space<vmem>>, vector<1x96xf32>
      %15 = vector.broadcast %14 : vector<1x96xf32> to vector<112x96xf32>
      %16 = arith.addf %13, %15 : vector<112x96xf32>
      %c0_14 = arith.constant 0 : index
      %c0_15 = arith.constant 0 : index
      %17 = vector.load %arg6[%c0_14, %c0_15] : memref<112x96xf32, #tpu.memory_space<vmem>>, vector<112x96xf32>
      tpu.vector_store %arg6[%c0_14, %c0_15], %16 {strides = array<i32>} : memref<112x96xf32, #tpu.memory_space<vmem>>, vector<112x96xf32>,
    } else {
    }
    return
  }
  func.func @transform_0(%arg0: i32, %arg1: i32, %arg2: i32) -> (i32, i32) {
    %c0_i32 = arith.constant 0 : i32
    return %arg0, %arg2 : i32, i32
  }
  func.func @transform_1(%arg0: i32, %arg1: i32, %arg2: i32) -> (i32, i32) {
    %c0_i32 = arith.constant 0 : i32
    return %arg2, %arg1 : i32, i32
  }
  func.func @transform_2(%arg0: i32, %arg1: i32, %arg2: i32) -> (i32, i32) {
    %c0_i32 = arith.constant 0 : i32
    %c0_i32_0 = arith.constant 0 : i32
    return %c0_i32, %arg1 : i32, i32
  }
  func.func @transform_3(%arg0: i32, %arg1: i32, %arg2: i32) -> (i32, i32) {
    %c0_i32 = arith.constant 0 : i32
    return %arg0, %arg1 : i32, i32
  }
}

module attributes {stable_mosaic.version = 11 : i64} {
  func.func @_performer_self_kernel(%arg0: i32, %arg1: memref<1x56x96xf32, #tpu.memory_space<vmem>>, %arg2: memref<1x56x32xf32, #tpu.memory_space<vmem>>) attributes {dimension_semantics = [#tpu.dimension_semantics<parallel>], iteration_bounds = array<i64: 2>, scalar_prefetch = 0 : i64, scratch_operands = 0 : i64, tpu.core_type = #tpu.core_type<tc>, window_params = [{transform_indices = @transform_0, window_bounds = array<i64: 1, 56, 96>}, {transform_indices = @transform_1, window_bounds = array<i64: 1, 56, 32>}]} {
    %c0 = arith.constant 0 : index
    %c0_0 = arith.constant 0 : index
    %c0_1 = arith.constant 0 : index
    %0 = vector.load %arg1[%c0, %c0_0, %c0_1] : memref<1x56x96xf32, #tpu.memory_space<vmem>>, vector<1x56x96xf32>
    %1 = vector.shape_cast %0 : vector<1x56x96xf32> to vector<56x96xf32>
    %2 = vector.extract_strided_slice %1 {offsets = [0, 0], sizes = [56, 32], strides = [1, 1]} : vector<56x96xf32> to vector<56x32xf32>
    %3 = vector.extract_strided_slice %1 {offsets = [0, 32], sizes = [56, 32], strides = [1, 1]} : vector<56x96xf32> to vector<56x32xf32>
    %4 = vector.extract_strided_slice %1 {offsets = [0, 64], sizes = [56, 32], strides = [1, 1]} : vector<56x96xf32> to vector<56x32xf32>
    %5 = vector.extract_strided_slice %2 {offsets = [0, 0], sizes = [56, 16], strides = [1, 1]} : vector<56x32xf32> to vector<56x16xf32>
    %cst = arith.constant 0.000000e+00 : f32
    %6 = vector.broadcast %cst : f32 to vector<56x16xf32>
    %7 = arith.maximumf %5, %6 : vector<56x16xf32>
    %8 = vector.extract_strided_slice %3 {offsets = [0, 0], sizes = [56, 16], strides = [1, 1]} : vector<56x32xf32> to vector<56x16xf32>
    %cst_2 = arith.constant 0.000000e+00 : f32
    %9 = vector.broadcast %cst_2 : f32 to vector<56x16xf32>
    %10 = arith.maximumf %8, %9 : vector<56x16xf32>
    %11 = vector.extract_strided_slice %4 {offsets = [0, 0], sizes = [56, 16], strides = [1, 1]} : vector<56x32xf32> to vector<56x16xf32>
    %12 = arith.truncf %10 : vector<56x16xf32> to vector<56x16xbf16>
    %13 = arith.truncf %11 : vector<56x16xf32> to vector<56x16xbf16>
    %cst_3 = arith.constant dense<0.000000e+00> : vector<16x16xf32>
    %14 = tpu.matmul %12, %13, %cst_3 {dimension_numbers = #tpu.dot_dimension_numbers<[0], [0], [1], [1], [0, 1, 1, 1], [], []>} : vector<56x16xbf16>, vector<56x16xbf16>, vector<16x16xf32> -> vector<16x16xf32>
    %15 = arith.truncf %7 : vector<56x16xf32> to vector<56x16xbf16>
    %16 = arith.truncf %14 : vector<16x16xf32> to vector<16x16xbf16>
    %cst_4 = arith.constant dense<0.000000e+00> : vector<56x16xf32>
    %17 = tpu.matmul %15, %16, %cst_4 {dimension_numbers = #tpu.dot_dimension_numbers<[1], [0], [0], [1], [0, 0, 1, 1], [], []>} : vector<56x16xbf16>, vector<16x16xbf16>, vector<56x16xf32> -> vector<56x16xf32>
    %cst_5 = arith.constant dense<0.000000e+00> : vector<16xf32>
    %18 = vector.multi_reduction <add>, %10, %cst_5 [0] : vector<56x16xf32> to vector<16xf32>
    %19 = vector.shape_cast %18 : vector<16xf32> to vector<1x16xf32>
    %20 = vector.broadcast %19 : vector<1x16xf32> to vector<56x16xf32>
    %21 = arith.mulf %7, %20 : vector<56x16xf32>
    %cst_6 = arith.constant dense<0.000000e+00> : vector<56xf32>
    %22 = vector.multi_reduction <add>, %21, %cst_6 [1] : vector<56x16xf32> to vector<56xf32>
    %23 = vector.shape_cast %22 : vector<56xf32> to vector<56x1xf32>
    %cst_7 = arith.constant 9.99999997E-7 : f32
    %24 = vector.broadcast %cst_7 : f32 to vector<56x1xf32>
    %25 = arith.addf %23, %24 : vector<56x1xf32>
    %26 = vector.broadcast %25 : vector<56x1xf32> to vector<56x16xf32>
    %27 = arith.divf %17, %26 : vector<56x16xf32>
    %28 = vector.extract_strided_slice %2 {offsets = [0, 16], sizes = [56, 16], strides = [1, 1]} : vector<56x32xf32> to vector<56x16xf32>
    %cst_8 = arith.constant 0.000000e+00 : f32
    %29 = vector.broadcast %cst_8 : f32 to vector<56x16xf32>
    %30 = arith.maximumf %28, %29 : vector<56x16xf32>
    %31 = vector.extract_strided_slice %3 {offsets = [0, 16], sizes = [56, 16], strides = [1, 1]} : vector<56x32xf32> to vector<56x16xf32>
    %cst_9 = arith.constant 0.000000e+00 : f32
    %32 = vector.broadcast %cst_9 : f32 to vector<56x16xf32>
    %33 = arith.maximumf %31, %32 : vector<56x16xf32>
    %34 = vector.extract_strided_slice %4 {offsets = [0, 16], sizes = [56, 16], strides = [1, 1]} : vector<56x32xf32> to vector<56x16xf32>
    %35 = arith.truncf %33 : vector<56x16xf32> to vector<56x16xbf16>
    %36 = arith.truncf %34 : vector<56x16xf32> to vector<56x16xbf16>
    %cst_10 = arith.constant dense<0.000000e+00> : vector<16x16xf32>
    %37 = tpu.matmul %35, %36, %cst_10 {dimension_numbers = #tpu.dot_dimension_numbers<[0], [0], [1], [1], [0, 1, 1, 1], [], []>} : vector<56x16xbf16>, vector<56x16xbf16>, vector<16x16xf32> -> vector<16x16xf32>
    %38 = arith.truncf %30 : vector<56x16xf32> to vector<56x16xbf16>
    %39 = arith.truncf %37 : vector<16x16xf32> to vector<16x16xbf16>
    %cst_11 = arith.constant dense<0.000000e+00> : vector<56x16xf32>
    %40 = tpu.matmul %38, %39, %cst_11 {dimension_numbers = #tpu.dot_dimension_numbers<[1], [0], [0], [1], [0, 0, 1, 1], [], []>} : vector<56x16xbf16>, vector<16x16xbf16>, vector<56x16xf32> -> vector<56x16xf32>
    %cst_12 = arith.constant dense<0.000000e+00> : vector<16xf32>
    %41 = vector.multi_reduction <add>, %33, %cst_12 [0] : vector<56x16xf32> to vector<16xf32>
    %42 = vector.shape_cast %41 : vector<16xf32> to vector<1x16xf32>
    %43 = vector.broadcast %42 : vector<1x16xf32> to vector<56x16xf32>
    %44 = arith.mulf %30, %43 : vector<56x16xf32>
    %cst_13 = arith.constant dense<0.000000e+00> : vector<56xf32>
    %45 = vector.multi_reduction <add>, %44, %cst_13 [1] : vector<56x16xf32> to vector<56xf32>
    %46 = vector.shape_cast %45 : vector<56xf32> to vector<56x1xf32>
    %cst_14 = arith.constant 9.99999997E-7 : f32
    %47 = vector.broadcast %cst_14 : f32 to vector<56x1xf32>
    %48 = arith.addf %46, %47 : vector<56x1xf32>
    %49 = vector.broadcast %48 : vector<56x1xf32> to vector<56x16xf32>
    %50 = arith.divf %40, %49 : vector<56x16xf32>
    %51 = tpu.concatenate %27, %50 in 1 : vector<56x16xf32>, vector<56x16xf32> -> vector<56x32xf32>
    %c0_15 = arith.constant 0 : index
    %c0_16 = arith.constant 0 : index
    %c0_17 = arith.constant 0 : index
    %52 = vector.load %arg2[%c0_15, %c0_16, %c0_17] : memref<1x56x32xf32, #tpu.memory_space<vmem>>, vector<1x56x32xf32>
    %53 = vector.shape_cast %52 : vector<1x56x32xf32> to vector<56x32xf32>
    %54 = vector.shape_cast %51 : vector<56x32xf32> to vector<1x56x32xf32>
    tpu.vector_store %arg2[%c0_15, %c0_16, %c0_17], %54 {strides = array<i32>} : memref<1x56x32xf32, #tpu.memory_space<vmem>>, vector<1x56x32xf32>,
    return
  }
  func.func @transform_0(%arg0: i32) -> (i32, i32, i32) {
    %c0_i32 = arith.constant 0 : i32
    %c0_i32_0 = arith.constant 0 : i32
    %c0_i32_1 = arith.constant 0 : i32
    return %arg0, %c0_i32, %c0_i32_0 : i32, i32, i32
  }
  func.func @transform_1(%arg0: i32) -> (i32, i32, i32) {
    %c0_i32 = arith.constant 0 : i32
    %c0_i32_0 = arith.constant 0 : i32
    %c0_i32_1 = arith.constant 0 : i32
    return %arg0, %c0_i32, %c0_i32_0 : i32, i32, i32
  }
}

module attributes {stable_mosaic.version = 11 : i64} {
  func.func @_embed_kernel(%arg0: i32, %arg1: memref<1x56x5xf32, #tpu.memory_space<vmem>>, %arg2: memref<5x32xbf16, #tpu.memory_space<vmem>>, %arg3: memref<1x32xf32, #tpu.memory_space<vmem>>, %arg4: memref<1x32xf32, #tpu.memory_space<vmem>>, %arg5: memref<56x32xf32, #tpu.memory_space<vmem>>, %arg6: memref<1x56x32xf32, #tpu.memory_space<vmem>>) attributes {dimension_semantics = [#tpu.dimension_semantics<parallel>], iteration_bounds = array<i64: 2>, scalar_prefetch = 0 : i64, scratch_operands = 0 : i64, tpu.core_type = #tpu.core_type<tc>, window_params = [{transform_indices = @transform_0, window_bounds = array<i64: 1, 56, 5>}, {pipeline_mode = #tpu.pipeline_mode<synchronous>, transform_indices = @transform_1, window_bounds = array<i64: 5, 32>}, {pipeline_mode = #tpu.pipeline_mode<synchronous>, transform_indices = @transform_2, window_bounds = array<i64: 1, 32>}, {pipeline_mode = #tpu.pipeline_mode<synchronous>, transform_indices = @transform_3, window_bounds = array<i64: 1, 32>}, {pipeline_mode = #tpu.pipeline_mode<synchronous>, transform_indices = @transform_4, window_bounds = array<i64: 56, 32>}, {transform_indices = @transform_5, window_bounds = array<i64: 1, 56, 32>}]} {
    %c0 = arith.constant 0 : index
    %c0_0 = arith.constant 0 : index
    %c0_1 = arith.constant 0 : index
    %0 = vector.load %arg1[%c0, %c0_0, %c0_1] : memref<1x56x5xf32, #tpu.memory_space<vmem>>, vector<1x56x5xf32>
    %1 = vector.shape_cast %0 : vector<1x56x5xf32> to vector<56x5xf32>
    %2 = arith.truncf %1 : vector<56x5xf32> to vector<56x5xbf16>
    %c0_2 = arith.constant 0 : index
    %c0_3 = arith.constant 0 : index
    %3 = vector.load %arg2[%c0_2, %c0_3] : memref<5x32xbf16, #tpu.memory_space<vmem>>, vector<5x32xbf16>
    %cst = arith.constant dense<0.000000e+00> : vector<56x32xf32>
    %4 = tpu.matmul %2, %3, %cst {dimension_numbers = #tpu.dot_dimension_numbers<[1], [0], [0], [1], [0, 0, 1, 1], [], []>} : vector<56x5xbf16>, vector<5x32xbf16>, vector<56x32xf32> -> vector<56x32xf32>
    %c0_4 = arith.constant 0 : index
    %c0_5 = arith.constant 0 : index
    %5 = vector.load %arg3[%c0_4, %c0_5] : memref<1x32xf32, #tpu.memory_space<vmem>>, vector<1x32xf32>
    %6 = vector.broadcast %5 : vector<1x32xf32> to vector<56x32xf32>
    %7 = arith.addf %4, %6 : vector<56x32xf32>
    %c0_6 = arith.constant 0 : index
    %c0_7 = arith.constant 0 : index
    %8 = vector.load %arg4[%c0_6, %c0_7] : memref<1x32xf32, #tpu.memory_space<vmem>>, vector<1x32xf32>
    %9 = vector.broadcast %8 : vector<1x32xf32> to vector<56x32xf32>
    %10 = arith.addf %7, %9 : vector<56x32xf32>
    %c0_8 = arith.constant 0 : index
    %c0_9 = arith.constant 0 : index
    %11 = vector.load %arg5[%c0_8, %c0_9] : memref<56x32xf32, #tpu.memory_space<vmem>>, vector<56x32xf32>
    %12 = arith.addf %10, %11 : vector<56x32xf32>
    %c0_10 = arith.constant 0 : index
    %c0_11 = arith.constant 0 : index
    %c0_12 = arith.constant 0 : index
    %13 = vector.load %arg6[%c0_10, %c0_11, %c0_12] : memref<1x56x32xf32, #tpu.memory_space<vmem>>, vector<1x56x32xf32>
    %14 = vector.shape_cast %13 : vector<1x56x32xf32> to vector<56x32xf32>
    %15 = vector.shape_cast %12 : vector<56x32xf32> to vector<1x56x32xf32>
    tpu.vector_store %arg6[%c0_10, %c0_11, %c0_12], %15 {strides = array<i32>} : memref<1x56x32xf32, #tpu.memory_space<vmem>>, vector<1x56x32xf32>,
    return
  }
  func.func @transform_0(%arg0: i32) -> (i32, i32, i32) {
    %c0_i32 = arith.constant 0 : i32
    %c0_i32_0 = arith.constant 0 : i32
    %c0_i32_1 = arith.constant 0 : i32
    return %arg0, %c0_i32, %c0_i32_0 : i32, i32, i32
  }
  func.func @transform_1(%arg0: i32) -> (i32, i32) {
    %c0_i32 = arith.constant 0 : i32
    %c0_i32_0 = arith.constant 0 : i32
    %c0_i32_1 = arith.constant 0 : i32
    return %c0_i32, %c0_i32_0 : i32, i32
  }
  func.func @transform_2(%arg0: i32) -> (i32, i32) {
    %c0_i32 = arith.constant 0 : i32
    %c0_i32_0 = arith.constant 0 : i32
    %c0_i32_1 = arith.constant 0 : i32
    return %c0_i32, %c0_i32_0 : i32, i32
  }
  func.func @transform_3(%arg0: i32) -> (i32, i32) {
    %c0_i32 = arith.constant 0 : i32
    %c0_i32_0 = arith.constant 0 : i32
    %c0_i32_1 = arith.constant 0 : i32
    return %c0_i32, %c0_i32_0 : i32, i32
  }
  func.func @transform_4(%arg0: i32) -> (i32, i32) {
    %c0_i32 = arith.constant 0 : i32
    %c0_i32_0 = arith.constant 0 : i32
    %c0_i32_1 = arith.constant 0 : i32
    return %c0_i32, %c0_i32_0 : i32, i32
  }
  func.func @transform_5(%arg0: i32) -> (i32, i32, i32) {
    %c0_i32 = arith.constant 0 : i32
    %c0_i32_0 = arith.constant 0 : i32
    %c0_i32_1 = arith.constant 0 : i32
    return %arg0, %c0_i32, %c0_i32_0 : i32, i32, i32
  }
}

module attributes {stable_mosaic.version = 11 : i64} {
  func.func @_linear_kernel(%arg0: i32, %arg1: i32, %arg2: i32, %arg3: memref<112x32xf32, #tpu.memory_space<vmem>>, %arg4: memref<32x32xbf16, #tpu.memory_space<vmem>>, %arg5: memref<1x32xf32, #tpu.memory_space<vmem>>, %arg6: memref<112x32xf32, #tpu.memory_space<vmem>>, %arg7: memref<112x32xf32, #tpu.memory_space<vmem>>, %arg8: memref<112x32xf32, #tpu.memory_space<vmem>>) attributes {dimension_semantics = [#tpu.dimension_semantics<parallel>, #tpu.dimension_semantics<parallel>, #tpu.dimension_semantics<arbitrary>], iteration_bounds = array<i64: 1, 1, 1>, scalar_prefetch = 0 : i64, scratch_operands = 1 : i64, tpu.core_type = #tpu.core_type<tc>, window_params = [{transform_indices = @transform_0, window_bounds = array<i64: 112, 32>}, {transform_indices = @transform_1, window_bounds = array<i64: 32, 32>}, {transform_indices = @transform_2, window_bounds = array<i64: 1, 32>}, {transform_indices = @transform_3, window_bounds = array<i64: 112, 32>}, {transform_indices = @transform_4, window_bounds = array<i64: 112, 32>}]} {
    %c0_i32 = arith.constant 0 : i32
    %0 = arith.cmpi eq, %arg2, %c0_i32 : i32
    %1 = arith.extui %0 : i1 to i32
    %c0_i32_0 = arith.constant 0 : i32
    %2 = arith.cmpi ne, %1, %c0_i32_0 : i32
    scf.if %2 {
      %cst_10 = arith.constant 0.000000e+00 : f32
      %13 = vector.broadcast %cst_10 : f32 to vector<112x32xf32>
      %c0_11 = arith.constant 0 : index
      %c0_12 = arith.constant 0 : index
      %14 = vector.load %arg8[%c0_11, %c0_12] : memref<112x32xf32, #tpu.memory_space<vmem>>, vector<112x32xf32>
      tpu.vector_store %arg8[%c0_11, %c0_12], %13 {strides = array<i32>} : memref<112x32xf32, #tpu.memory_space<vmem>>, vector<112x32xf32>,
    } else {
    }
    %c0 = arith.constant 0 : index
    %c0_1 = arith.constant 0 : index
    %3 = vector.load %arg8[%c0, %c0_1] : memref<112x32xf32, #tpu.memory_space<vmem>>, vector<112x32xf32>
    %c0_2 = arith.constant 0 : index
    %c0_3 = arith.constant 0 : index
    %4 = vector.load %arg3[%c0_2, %c0_3] : memref<112x32xf32, #tpu.memory_space<vmem>>, vector<112x32xf32>
    %5 = arith.truncf %4 : vector<112x32xf32> to vector<112x32xbf16>
    %c0_4 = arith.constant 0 : index
    %c0_5 = arith.constant 0 : index
    %6 = vector.load %arg4[%c0_4, %c0_5] : memref<32x32xbf16, #tpu.memory_space<vmem>>, vector<32x32xbf16>
    %cst = arith.constant dense<0.000000e+00> : vector<112x32xf32>
    %7 = tpu.matmul %5, %6, %cst {dimension_numbers = #tpu.dot_dimension_numbers<[1], [0], [0], [1], [0, 0, 1, 1], [], []>} : vector<112x32xbf16>, vector<32x32xbf16>, vector<112x32xf32> -> vector<112x32xf32>
    %8 = arith.addf %3, %7 : vector<112x32xf32>
    %c0_6 = arith.constant 0 : index
    %c0_7 = arith.constant 0 : index
    %9 = vector.load %arg8[%c0_6, %c0_7] : memref<112x32xf32, #tpu.memory_space<vmem>>, vector<112x32xf32>
    tpu.vector_store %arg8[%c0_6, %c0_7], %8 {strides = array<i32>} : memref<112x32xf32, #tpu.memory_space<vmem>>, vector<112x32xf32>,
    %c0_i32_8 = arith.constant 0 : i32
    %10 = arith.cmpi eq, %arg2, %c0_i32_8 : i32
    %11 = arith.extui %10 : i1 to i32
    %c0_i32_9 = arith.constant 0 : i32
    %12 = arith.cmpi ne, %11, %c0_i32_9 : i32
    scf.if %12 {
      %c0_10 = arith.constant 0 : index
      %c0_11 = arith.constant 0 : index
      %13 = vector.load %arg8[%c0_10, %c0_11] : memref<112x32xf32, #tpu.memory_space<vmem>>, vector<112x32xf32>
      %c0_12 = arith.constant 0 : index
      %c0_13 = arith.constant 0 : index
      %14 = vector.load %arg5[%c0_12, %c0_13] : memref<1x32xf32, #tpu.memory_space<vmem>>, vector<1x32xf32>
      %15 = vector.broadcast %14 : vector<1x32xf32> to vector<112x32xf32>
      %16 = arith.addf %13, %15 : vector<112x32xf32>
      %c0_14 = arith.constant 0 : index
      %c0_15 = arith.constant 0 : index
      %17 = vector.load %arg6[%c0_14, %c0_15] : memref<112x32xf32, #tpu.memory_space<vmem>>, vector<112x32xf32>
      %18 = arith.addf %16, %17 : vector<112x32xf32>
      %c0_16 = arith.constant 0 : index
      %c0_17 = arith.constant 0 : index
      %19 = vector.load %arg7[%c0_16, %c0_17] : memref<112x32xf32, #tpu.memory_space<vmem>>, vector<112x32xf32>
      tpu.vector_store %arg7[%c0_16, %c0_17], %18 {strides = array<i32>} : memref<112x32xf32, #tpu.memory_space<vmem>>, vector<112x32xf32>,
    } else {
    }
    return
  }
  func.func @transform_0(%arg0: i32, %arg1: i32, %arg2: i32) -> (i32, i32) {
    %c0_i32 = arith.constant 0 : i32
    return %arg0, %arg2 : i32, i32
  }
  func.func @transform_1(%arg0: i32, %arg1: i32, %arg2: i32) -> (i32, i32) {
    %c0_i32 = arith.constant 0 : i32
    return %arg2, %arg1 : i32, i32
  }
  func.func @transform_2(%arg0: i32, %arg1: i32, %arg2: i32) -> (i32, i32) {
    %c0_i32 = arith.constant 0 : i32
    %c0_i32_0 = arith.constant 0 : i32
    return %c0_i32, %arg1 : i32, i32
  }
  func.func @transform_3(%arg0: i32, %arg1: i32, %arg2: i32) -> (i32, i32) {
    %c0_i32 = arith.constant 0 : i32
    return %arg0, %arg1 : i32, i32
  }
  func.func @transform_4(%arg0: i32, %arg1: i32, %arg2: i32) -> (i32, i32) {
    %c0_i32 = arith.constant 0 : i32
    return %arg0, %arg1 : i32, i32
  }
}

module attributes {stable_mosaic.version = 11 : i64} {
  func.func @_layernorm_kernel(%arg0: i32, %arg1: memref<112x32xf32, #tpu.memory_space<vmem>>, %arg2: memref<1x32xf32, #tpu.memory_space<vmem>>, %arg3: memref<1x32xf32, #tpu.memory_space<vmem>>, %arg4: memref<112x32xf32, #tpu.memory_space<vmem>>) attributes {dimension_semantics = [#tpu.dimension_semantics<parallel>], iteration_bounds = array<i64: 1>, scalar_prefetch = 0 : i64, scratch_operands = 0 : i64, tpu.core_type = #tpu.core_type<tc>, window_params = [{transform_indices = @transform_0, window_bounds = array<i64: 112, 32>}, {pipeline_mode = #tpu.pipeline_mode<synchronous>, transform_indices = @transform_1, window_bounds = array<i64: 1, 32>}, {pipeline_mode = #tpu.pipeline_mode<synchronous>, transform_indices = @transform_2, window_bounds = array<i64: 1, 32>}, {transform_indices = @transform_3, window_bounds = array<i64: 112, 32>}]} {
    %c0 = arith.constant 0 : index
    %c0_0 = arith.constant 0 : index
    %0 = vector.load %arg1[%c0, %c0_0] : memref<112x32xf32, #tpu.memory_space<vmem>>, vector<112x32xf32>
    %cst = arith.constant dense<0.000000e+00> : vector<112xf32>
    %1 = vector.multi_reduction <add>, %0, %cst [1] : vector<112x32xf32> to vector<112xf32>
    %2 = vector.shape_cast %1 : vector<112xf32> to vector<112x1xf32>
    %cst_1 = arith.constant 3.200000e+01 : f32
    %3 = vector.broadcast %cst_1 : f32 to vector<112x1xf32>
    %4 = arith.divf %2, %3 : vector<112x1xf32>
    %5 = vector.broadcast %4 : vector<112x1xf32> to vector<112x32xf32>
    %6 = arith.subf %0, %5 : vector<112x32xf32>
    %7 = arith.mulf %6, %6 : vector<112x32xf32>
    %cst_2 = arith.constant dense<0.000000e+00> : vector<112xf32>
    %8 = vector.multi_reduction <add>, %7, %cst_2 [1] : vector<112x32xf32> to vector<112xf32>
    %9 = vector.shape_cast %8 : vector<112xf32> to vector<112x1xf32>
    %cst_3 = arith.constant 3.200000e+01 : f32
    %10 = vector.broadcast %cst_3 : f32 to vector<112x1xf32>
    %11 = arith.divf %9, %10 : vector<112x1xf32>
    %12 = vector.broadcast %4 : vector<112x1xf32> to vector<112x32xf32>
    %13 = arith.subf %0, %12 : vector<112x32xf32>
    %cst_4 = arith.constant 9.99999974E-6 : f32
    %14 = vector.broadcast %cst_4 : f32 to vector<112x1xf32>
    %15 = arith.addf %11, %14 : vector<112x1xf32>
    %16 = math.rsqrt %15 : vector<112x1xf32>
    %17 = vector.broadcast %16 : vector<112x1xf32> to vector<112x32xf32>
    %18 = arith.mulf %13, %17 : vector<112x32xf32>
    %c0_5 = arith.constant 0 : index
    %c0_6 = arith.constant 0 : index
    %19 = vector.load %arg2[%c0_5, %c0_6] : memref<1x32xf32, #tpu.memory_space<vmem>>, vector<1x32xf32>
    %20 = vector.broadcast %19 : vector<1x32xf32> to vector<112x32xf32>
    %21 = arith.mulf %18, %20 : vector<112x32xf32>
    %c0_7 = arith.constant 0 : index
    %c0_8 = arith.constant 0 : index
    %22 = vector.load %arg3[%c0_7, %c0_8] : memref<1x32xf32, #tpu.memory_space<vmem>>, vector<1x32xf32>
    %23 = vector.broadcast %22 : vector<1x32xf32> to vector<112x32xf32>
    %24 = arith.addf %21, %23 : vector<112x32xf32>
    %c0_9 = arith.constant 0 : index
    %c0_10 = arith.constant 0 : index
    %25 = vector.load %arg4[%c0_9, %c0_10] : memref<112x32xf32, #tpu.memory_space<vmem>>, vector<112x32xf32>
    tpu.vector_store %arg4[%c0_9, %c0_10], %24 {strides = array<i32>} : memref<112x32xf32, #tpu.memory_space<vmem>>, vector<112x32xf32>,
    return
  }
  func.func @transform_0(%arg0: i32) -> (i32, i32) {
    %c0_i32 = arith.constant 0 : i32
    %c0_i32_0 = arith.constant 0 : i32
    return %arg0, %c0_i32 : i32, i32
  }
  func.func @transform_1(%arg0: i32) -> (i32, i32) {
    %c0_i32 = arith.constant 0 : i32
    %c0_i32_0 = arith.constant 0 : i32
    %c0_i32_1 = arith.constant 0 : i32
    return %c0_i32, %c0_i32_0 : i32, i32
  }
  func.func @transform_2(%arg0: i32) -> (i32, i32) {
    %c0_i32 = arith.constant 0 : i32
    %c0_i32_0 = arith.constant 0 : i32
    %c0_i32_1 = arith.constant 0 : i32
    return %c0_i32, %c0_i32_0 : i32, i32
  }
  func.func @transform_3(%arg0: i32) -> (i32, i32) {
    %c0_i32 = arith.constant 0 : i32
    %c0_i32_0 = arith.constant 0 : i32
    return %arg0, %c0_i32 : i32, i32
  }
}

module attributes {stable_mosaic.version = 11 : i64} {
  func.func @_linear_kernel(%arg0: i32, %arg1: i32, %arg2: i32, %arg3: memref<112x32xf32, #tpu.memory_space<vmem>>, %arg4: memref<32x64xbf16, #tpu.memory_space<vmem>>, %arg5: memref<1x64xf32, #tpu.memory_space<vmem>>, %arg6: memref<112x64xf32, #tpu.memory_space<vmem>>, %arg7: memref<112x64xf32, #tpu.memory_space<vmem>>) attributes {dimension_semantics = [#tpu.dimension_semantics<parallel>, #tpu.dimension_semantics<parallel>, #tpu.dimension_semantics<arbitrary>], iteration_bounds = array<i64: 1, 1, 1>, scalar_prefetch = 0 : i64, scratch_operands = 1 : i64, tpu.core_type = #tpu.core_type<tc>, window_params = [{transform_indices = @transform_0, window_bounds = array<i64: 112, 32>}, {transform_indices = @transform_1, window_bounds = array<i64: 32, 64>}, {transform_indices = @transform_2, window_bounds = array<i64: 1, 64>}, {transform_indices = @transform_3, window_bounds = array<i64: 112, 64>}]} {
    %c0_i32 = arith.constant 0 : i32
    %0 = arith.cmpi eq, %arg2, %c0_i32 : i32
    %1 = arith.extui %0 : i1 to i32
    %c0_i32_0 = arith.constant 0 : i32
    %2 = arith.cmpi ne, %1, %c0_i32_0 : i32
    scf.if %2 {
      %cst_10 = arith.constant 0.000000e+00 : f32
      %13 = vector.broadcast %cst_10 : f32 to vector<112x64xf32>
      %c0_11 = arith.constant 0 : index
      %c0_12 = arith.constant 0 : index
      %14 = vector.load %arg7[%c0_11, %c0_12] : memref<112x64xf32, #tpu.memory_space<vmem>>, vector<112x64xf32>
      tpu.vector_store %arg7[%c0_11, %c0_12], %13 {strides = array<i32>} : memref<112x64xf32, #tpu.memory_space<vmem>>, vector<112x64xf32>,
    } else {
    }
    %c0 = arith.constant 0 : index
    %c0_1 = arith.constant 0 : index
    %3 = vector.load %arg7[%c0, %c0_1] : memref<112x64xf32, #tpu.memory_space<vmem>>, vector<112x64xf32>
    %c0_2 = arith.constant 0 : index
    %c0_3 = arith.constant 0 : index
    %4 = vector.load %arg3[%c0_2, %c0_3] : memref<112x32xf32, #tpu.memory_space<vmem>>, vector<112x32xf32>
    %5 = arith.truncf %4 : vector<112x32xf32> to vector<112x32xbf16>
    %c0_4 = arith.constant 0 : index
    %c0_5 = arith.constant 0 : index
    %6 = vector.load %arg4[%c0_4, %c0_5] : memref<32x64xbf16, #tpu.memory_space<vmem>>, vector<32x64xbf16>
    %cst = arith.constant dense<0.000000e+00> : vector<112x64xf32>
    %7 = tpu.matmul %5, %6, %cst {dimension_numbers = #tpu.dot_dimension_numbers<[1], [0], [0], [1], [0, 0, 1, 1], [], []>} : vector<112x32xbf16>, vector<32x64xbf16>, vector<112x64xf32> -> vector<112x64xf32>
    %8 = arith.addf %3, %7 : vector<112x64xf32>
    %c0_6 = arith.constant 0 : index
    %c0_7 = arith.constant 0 : index
    %9 = vector.load %arg7[%c0_6, %c0_7] : memref<112x64xf32, #tpu.memory_space<vmem>>, vector<112x64xf32>
    tpu.vector_store %arg7[%c0_6, %c0_7], %8 {strides = array<i32>} : memref<112x64xf32, #tpu.memory_space<vmem>>, vector<112x64xf32>,
    %c0_i32_8 = arith.constant 0 : i32
    %10 = arith.cmpi eq, %arg2, %c0_i32_8 : i32
    %11 = arith.extui %10 : i1 to i32
    %c0_i32_9 = arith.constant 0 : i32
    %12 = arith.cmpi ne, %11, %c0_i32_9 : i32
    scf.if %12 {
      %c0_10 = arith.constant 0 : index
      %c0_11 = arith.constant 0 : index
      %13 = vector.load %arg7[%c0_10, %c0_11] : memref<112x64xf32, #tpu.memory_space<vmem>>, vector<112x64xf32>
      %c0_12 = arith.constant 0 : index
      %c0_13 = arith.constant 0 : index
      %14 = vector.load %arg5[%c0_12, %c0_13] : memref<1x64xf32, #tpu.memory_space<vmem>>, vector<1x64xf32>
      %15 = vector.broadcast %14 : vector<1x64xf32> to vector<112x64xf32>
      %16 = arith.addf %13, %15 : vector<112x64xf32>
      %c0_14 = arith.constant 0 : index
      %c0_15 = arith.constant 0 : index
      %17 = vector.load %arg6[%c0_14, %c0_15] : memref<112x64xf32, #tpu.memory_space<vmem>>, vector<112x64xf32>
      tpu.vector_store %arg6[%c0_14, %c0_15], %16 {strides = array<i32>} : memref<112x64xf32, #tpu.memory_space<vmem>>, vector<112x64xf32>,
    } else {
    }
    return
  }
  func.func @transform_0(%arg0: i32, %arg1: i32, %arg2: i32) -> (i32, i32) {
    %c0_i32 = arith.constant 0 : i32
    return %arg0, %arg2 : i32, i32
  }
  func.func @transform_1(%arg0: i32, %arg1: i32, %arg2: i32) -> (i32, i32) {
    %c0_i32 = arith.constant 0 : i32
    return %arg2, %arg1 : i32, i32
  }
  func.func @transform_2(%arg0: i32, %arg1: i32, %arg2: i32) -> (i32, i32) {
    %c0_i32 = arith.constant 0 : i32
    %c0_i32_0 = arith.constant 0 : i32
    return %c0_i32, %arg1 : i32, i32
  }
  func.func @transform_3(%arg0: i32, %arg1: i32, %arg2: i32) -> (i32, i32) {
    %c0_i32 = arith.constant 0 : i32
    return %arg0, %arg1 : i32, i32
  }
}

module attributes {stable_mosaic.version = 11 : i64} {
  func.func @_linear_kernel(%arg0: i32, %arg1: i32, %arg2: i32, %arg3: memref<112x32xf32, #tpu.memory_space<vmem>>, %arg4: memref<32x32xbf16, #tpu.memory_space<vmem>>, %arg5: memref<1x32xf32, #tpu.memory_space<vmem>>, %arg6: memref<112x32xf32, #tpu.memory_space<vmem>>, %arg7: memref<112x32xf32, #tpu.memory_space<vmem>>) attributes {dimension_semantics = [#tpu.dimension_semantics<parallel>, #tpu.dimension_semantics<parallel>, #tpu.dimension_semantics<arbitrary>], iteration_bounds = array<i64: 1, 1, 1>, scalar_prefetch = 0 : i64, scratch_operands = 1 : i64, tpu.core_type = #tpu.core_type<tc>, window_params = [{transform_indices = @transform_0, window_bounds = array<i64: 112, 32>}, {transform_indices = @transform_1, window_bounds = array<i64: 32, 32>}, {transform_indices = @transform_2, window_bounds = array<i64: 1, 32>}, {transform_indices = @transform_3, window_bounds = array<i64: 112, 32>}]} {
    %c0_i32 = arith.constant 0 : i32
    %0 = arith.cmpi eq, %arg2, %c0_i32 : i32
    %1 = arith.extui %0 : i1 to i32
    %c0_i32_0 = arith.constant 0 : i32
    %2 = arith.cmpi ne, %1, %c0_i32_0 : i32
    scf.if %2 {
      %cst_10 = arith.constant 0.000000e+00 : f32
      %13 = vector.broadcast %cst_10 : f32 to vector<112x32xf32>
      %c0_11 = arith.constant 0 : index
      %c0_12 = arith.constant 0 : index
      %14 = vector.load %arg7[%c0_11, %c0_12] : memref<112x32xf32, #tpu.memory_space<vmem>>, vector<112x32xf32>
      tpu.vector_store %arg7[%c0_11, %c0_12], %13 {strides = array<i32>} : memref<112x32xf32, #tpu.memory_space<vmem>>, vector<112x32xf32>,
    } else {
    }
    %c0 = arith.constant 0 : index
    %c0_1 = arith.constant 0 : index
    %3 = vector.load %arg7[%c0, %c0_1] : memref<112x32xf32, #tpu.memory_space<vmem>>, vector<112x32xf32>
    %c0_2 = arith.constant 0 : index
    %c0_3 = arith.constant 0 : index
    %4 = vector.load %arg3[%c0_2, %c0_3] : memref<112x32xf32, #tpu.memory_space<vmem>>, vector<112x32xf32>
    %5 = arith.truncf %4 : vector<112x32xf32> to vector<112x32xbf16>
    %c0_4 = arith.constant 0 : index
    %c0_5 = arith.constant 0 : index
    %6 = vector.load %arg4[%c0_4, %c0_5] : memref<32x32xbf16, #tpu.memory_space<vmem>>, vector<32x32xbf16>
    %cst = arith.constant dense<0.000000e+00> : vector<112x32xf32>
    %7 = tpu.matmul %5, %6, %cst {dimension_numbers = #tpu.dot_dimension_numbers<[1], [0], [0], [1], [0, 0, 1, 1], [], []>} : vector<112x32xbf16>, vector<32x32xbf16>, vector<112x32xf32> -> vector<112x32xf32>
    %8 = arith.addf %3, %7 : vector<112x32xf32>
    %c0_6 = arith.constant 0 : index
    %c0_7 = arith.constant 0 : index
    %9 = vector.load %arg7[%c0_6, %c0_7] : memref<112x32xf32, #tpu.memory_space<vmem>>, vector<112x32xf32>
    tpu.vector_store %arg7[%c0_6, %c0_7], %8 {strides = array<i32>} : memref<112x32xf32, #tpu.memory_space<vmem>>, vector<112x32xf32>,
    %c0_i32_8 = arith.constant 0 : i32
    %10 = arith.cmpi eq, %arg2, %c0_i32_8 : i32
    %11 = arith.extui %10 : i1 to i32
    %c0_i32_9 = arith.constant 0 : i32
    %12 = arith.cmpi ne, %11, %c0_i32_9 : i32
    scf.if %12 {
      %c0_10 = arith.constant 0 : index
      %c0_11 = arith.constant 0 : index
      %13 = vector.load %arg7[%c0_10, %c0_11] : memref<112x32xf32, #tpu.memory_space<vmem>>, vector<112x32xf32>
      %c0_12 = arith.constant 0 : index
      %c0_13 = arith.constant 0 : index
      %14 = vector.load %arg5[%c0_12, %c0_13] : memref<1x32xf32, #tpu.memory_space<vmem>>, vector<1x32xf32>
      %15 = vector.broadcast %14 : vector<1x32xf32> to vector<112x32xf32>
      %16 = arith.addf %13, %15 : vector<112x32xf32>
      %17 = arith.mulf %16, %16 : vector<112x32xf32>
      %18 = arith.mulf %16, %17 : vector<112x32xf32>
      %cst_14 = arith.constant 4.471500e-02 : f32
      %19 = vector.broadcast %cst_14 : f32 to vector<112x32xf32>
      %20 = arith.mulf %19, %18 : vector<112x32xf32>
      %21 = arith.addf %16, %20 : vector<112x32xf32>
      %cst_15 = arith.constant 0.797884583 : f32
      %22 = vector.broadcast %cst_15 : f32 to vector<112x32xf32>
      %23 = arith.mulf %22, %21 : vector<112x32xf32>
      %24 = math.tanh %23 : vector<112x32xf32>
      %cst_16 = arith.constant 1.000000e+00 : f32
      %25 = vector.broadcast %cst_16 : f32 to vector<112x32xf32>
      %26 = arith.addf %25, %24 : vector<112x32xf32>
      %cst_17 = arith.constant 5.000000e-01 : f32
      %27 = vector.broadcast %cst_17 : f32 to vector<112x32xf32>
      %28 = arith.mulf %27, %26 : vector<112x32xf32>
      %29 = arith.mulf %16, %28 : vector<112x32xf32>
      %c0_18 = arith.constant 0 : index
      %c0_19 = arith.constant 0 : index
      %30 = vector.load %arg6[%c0_18, %c0_19] : memref<112x32xf32, #tpu.memory_space<vmem>>, vector<112x32xf32>
      tpu.vector_store %arg6[%c0_18, %c0_19], %29 {strides = array<i32>} : memref<112x32xf32, #tpu.memory_space<vmem>>, vector<112x32xf32>,
    } else {
    }
    return
  }
  func.func @transform_0(%arg0: i32, %arg1: i32, %arg2: i32) -> (i32, i32) {
    %c0_i32 = arith.constant 0 : i32
    return %arg0, %arg2 : i32, i32
  }
  func.func @transform_1(%arg0: i32, %arg1: i32, %arg2: i32) -> (i32, i32) {
    %c0_i32 = arith.constant 0 : i32
    return %arg2, %arg1 : i32, i32
  }
  func.func @transform_2(%arg0: i32, %arg1: i32, %arg2: i32) -> (i32, i32) {
    %c0_i32 = arith.constant 0 : i32
    %c0_i32_0 = arith.constant 0 : i32
    return %c0_i32, %arg1 : i32, i32
  }
  func.func @transform_3(%arg0: i32, %arg1: i32, %arg2: i32) -> (i32, i32) {
    %c0_i32 = arith.constant 0 : i32
    return %arg0, %arg1 : i32, i32
  }
}

module attributes {stable_mosaic.version = 11 : i64} {
  func.func @_linear_kernel(%arg0: i32, %arg1: i32, %arg2: i32, %arg3: memref<112x32xf32, #tpu.memory_space<vmem>>, %arg4: memref<32x32xbf16, #tpu.memory_space<vmem>>, %arg5: memref<1x32xf32, #tpu.memory_space<vmem>>, %arg6: memref<112x32xf32, #tpu.memory_space<vmem>>, %arg7: memref<112x32xf32, #tpu.memory_space<vmem>>) attributes {dimension_semantics = [#tpu.dimension_semantics<parallel>, #tpu.dimension_semantics<parallel>, #tpu.dimension_semantics<arbitrary>], iteration_bounds = array<i64: 1, 1, 1>, scalar_prefetch = 0 : i64, scratch_operands = 1 : i64, tpu.core_type = #tpu.core_type<tc>, window_params = [{transform_indices = @transform_0, window_bounds = array<i64: 112, 32>}, {transform_indices = @transform_1, window_bounds = array<i64: 32, 32>}, {transform_indices = @transform_2, window_bounds = array<i64: 1, 32>}, {transform_indices = @transform_3, window_bounds = array<i64: 112, 32>}]} {
    %c0_i32 = arith.constant 0 : i32
    %0 = arith.cmpi eq, %arg2, %c0_i32 : i32
    %1 = arith.extui %0 : i1 to i32
    %c0_i32_0 = arith.constant 0 : i32
    %2 = arith.cmpi ne, %1, %c0_i32_0 : i32
    scf.if %2 {
      %cst_10 = arith.constant 0.000000e+00 : f32
      %13 = vector.broadcast %cst_10 : f32 to vector<112x32xf32>
      %c0_11 = arith.constant 0 : index
      %c0_12 = arith.constant 0 : index
      %14 = vector.load %arg7[%c0_11, %c0_12] : memref<112x32xf32, #tpu.memory_space<vmem>>, vector<112x32xf32>
      tpu.vector_store %arg7[%c0_11, %c0_12], %13 {strides = array<i32>} : memref<112x32xf32, #tpu.memory_space<vmem>>, vector<112x32xf32>,
    } else {
    }
    %c0 = arith.constant 0 : index
    %c0_1 = arith.constant 0 : index
    %3 = vector.load %arg7[%c0, %c0_1] : memref<112x32xf32, #tpu.memory_space<vmem>>, vector<112x32xf32>
    %c0_2 = arith.constant 0 : index
    %c0_3 = arith.constant 0 : index
    %4 = vector.load %arg3[%c0_2, %c0_3] : memref<112x32xf32, #tpu.memory_space<vmem>>, vector<112x32xf32>
    %5 = arith.truncf %4 : vector<112x32xf32> to vector<112x32xbf16>
    %c0_4 = arith.constant 0 : index
    %c0_5 = arith.constant 0 : index
    %6 = vector.load %arg4[%c0_4, %c0_5] : memref<32x32xbf16, #tpu.memory_space<vmem>>, vector<32x32xbf16>
    %cst = arith.constant dense<0.000000e+00> : vector<112x32xf32>
    %7 = tpu.matmul %5, %6, %cst {dimension_numbers = #tpu.dot_dimension_numbers<[1], [0], [0], [1], [0, 0, 1, 1], [], []>} : vector<112x32xbf16>, vector<32x32xbf16>, vector<112x32xf32> -> vector<112x32xf32>
    %8 = arith.addf %3, %7 : vector<112x32xf32>
    %c0_6 = arith.constant 0 : index
    %c0_7 = arith.constant 0 : index
    %9 = vector.load %arg7[%c0_6, %c0_7] : memref<112x32xf32, #tpu.memory_space<vmem>>, vector<112x32xf32>
    tpu.vector_store %arg7[%c0_6, %c0_7], %8 {strides = array<i32>} : memref<112x32xf32, #tpu.memory_space<vmem>>, vector<112x32xf32>,
    %c0_i32_8 = arith.constant 0 : i32
    %10 = arith.cmpi eq, %arg2, %c0_i32_8 : i32
    %11 = arith.extui %10 : i1 to i32
    %c0_i32_9 = arith.constant 0 : i32
    %12 = arith.cmpi ne, %11, %c0_i32_9 : i32
    scf.if %12 {
      %c0_10 = arith.constant 0 : index
      %c0_11 = arith.constant 0 : index
      %13 = vector.load %arg7[%c0_10, %c0_11] : memref<112x32xf32, #tpu.memory_space<vmem>>, vector<112x32xf32>
      %c0_12 = arith.constant 0 : index
      %c0_13 = arith.constant 0 : index
      %14 = vector.load %arg5[%c0_12, %c0_13] : memref<1x32xf32, #tpu.memory_space<vmem>>, vector<1x32xf32>
      %15 = vector.broadcast %14 : vector<1x32xf32> to vector<112x32xf32>
      %16 = arith.addf %13, %15 : vector<112x32xf32>
      %c0_14 = arith.constant 0 : index
      %c0_15 = arith.constant 0 : index
      %17 = vector.load %arg6[%c0_14, %c0_15] : memref<112x32xf32, #tpu.memory_space<vmem>>, vector<112x32xf32>
      tpu.vector_store %arg6[%c0_14, %c0_15], %16 {strides = array<i32>} : memref<112x32xf32, #tpu.memory_space<vmem>>, vector<112x32xf32>,
    } else {
    }
    return
  }
  func.func @transform_0(%arg0: i32, %arg1: i32, %arg2: i32) -> (i32, i32) {
    %c0_i32 = arith.constant 0 : i32
    return %arg0, %arg2 : i32, i32
  }
  func.func @transform_1(%arg0: i32, %arg1: i32, %arg2: i32) -> (i32, i32) {
    %c0_i32 = arith.constant 0 : i32
    return %arg2, %arg1 : i32, i32
  }
  func.func @transform_2(%arg0: i32, %arg1: i32, %arg2: i32) -> (i32, i32) {
    %c0_i32 = arith.constant 0 : i32
    %c0_i32_0 = arith.constant 0 : i32
    return %c0_i32, %arg1 : i32, i32
  }
  func.func @transform_3(%arg0: i32, %arg1: i32, %arg2: i32) -> (i32, i32) {
    %c0_i32 = arith.constant 0 : i32
    return %arg0, %arg1 : i32, i32
  }
}

module attributes {stable_mosaic.version = 11 : i64} {
  func.func @_performer_cross_kernel(%arg0: i32, %arg1: memref<1x56x32xf32, #tpu.memory_space<vmem>>, %arg2: memref<1x56x64xf32, #tpu.memory_space<vmem>>, %arg3: memref<1x56x32xf32, #tpu.memory_space<vmem>>) attributes {dimension_semantics = [#tpu.dimension_semantics<parallel>], iteration_bounds = array<i64: 2>, scalar_prefetch = 0 : i64, scratch_operands = 0 : i64, tpu.core_type = #tpu.core_type<tc>, window_params = [{transform_indices = @transform_0, window_bounds = array<i64: 1, 56, 32>}, {transform_indices = @transform_1, window_bounds = array<i64: 1, 56, 64>}, {transform_indices = @transform_2, window_bounds = array<i64: 1, 56, 32>}]} {
    %c0 = arith.constant 0 : index
    %c0_0 = arith.constant 0 : index
    %c0_1 = arith.constant 0 : index
    %0 = vector.load %arg1[%c0, %c0_0, %c0_1] : memref<1x56x32xf32, #tpu.memory_space<vmem>>, vector<1x56x32xf32>
    %1 = vector.shape_cast %0 : vector<1x56x32xf32> to vector<56x32xf32>
    %c0_2 = arith.constant 0 : index
    %c0_3 = arith.constant 0 : index
    %c0_4 = arith.constant 0 : index
    %2 = vector.load %arg2[%c0_2, %c0_3, %c0_4] : memref<1x56x64xf32, #tpu.memory_space<vmem>>, vector<1x56x64xf32>
    %3 = vector.shape_cast %2 : vector<1x56x64xf32> to vector<56x64xf32>
    %4 = vector.extract_strided_slice %3 {offsets = [0, 0], sizes = [56, 32], strides = [1, 1]} : vector<56x64xf32> to vector<56x32xf32>
    %5 = vector.extract_strided_slice %3 {offsets = [0, 32], sizes = [56, 32], strides = [1, 1]} : vector<56x64xf32> to vector<56x32xf32>
    %6 = vector.extract_strided_slice %1 {offsets = [0, 0], sizes = [56, 16], strides = [1, 1]} : vector<56x32xf32> to vector<56x16xf32>
    %cst = arith.constant 0.000000e+00 : f32
    %7 = vector.broadcast %cst : f32 to vector<56x16xf32>
    %8 = arith.maximumf %6, %7 : vector<56x16xf32>
    %9 = vector.extract_strided_slice %4 {offsets = [0, 0], sizes = [56, 16], strides = [1, 1]} : vector<56x32xf32> to vector<56x16xf32>
    %cst_5 = arith.constant 0.000000e+00 : f32
    %10 = vector.broadcast %cst_5 : f32 to vector<56x16xf32>
    %11 = arith.maximumf %9, %10 : vector<56x16xf32>
    %12 = vector.extract_strided_slice %5 {offsets = [0, 0], sizes = [56, 16], strides = [1, 1]} : vector<56x32xf32> to vector<56x16xf32>
    %13 = arith.truncf %11 : vector<56x16xf32> to vector<56x16xbf16>
    %14 = arith.truncf %12 : vector<56x16xf32> to vector<56x16xbf16>
    %cst_6 = arith.constant dense<0.000000e+00> : vector<16x16xf32>
    %15 = tpu.matmul %13, %14, %cst_6 {dimension_numbers = #tpu.dot_dimension_numbers<[0], [0], [1], [1], [0, 1, 1, 1], [], []>} : vector<56x16xbf16>, vector<56x16xbf16>, vector<16x16xf32> -> vector<16x16xf32>
    %16 = arith.truncf %8 : vector<56x16xf32> to vector<56x16xbf16>
    %17 = arith.truncf %15 : vector<16x16xf32> to vector<16x16xbf16>
    %cst_7 = arith.constant dense<0.000000e+00> : vector<56x16xf32>
    %18 = tpu.matmul %16, %17, %cst_7 {dimension_numbers = #tpu.dot_dimension_numbers<[1], [0], [0], [1], [0, 0, 1, 1], [], []>} : vector<56x16xbf16>, vector<16x16xbf16>, vector<56x16xf32> -> vector<56x16xf32>
    %cst_8 = arith.constant dense<0.000000e+00> : vector<16xf32>
    %19 = vector.multi_reduction <add>, %11, %cst_8 [0] : vector<56x16xf32> to vector<16xf32>
    %20 = vector.shape_cast %19 : vector<16xf32> to vector<1x16xf32>
    %21 = vector.broadcast %20 : vector<1x16xf32> to vector<56x16xf32>
    %22 = arith.mulf %8, %21 : vector<56x16xf32>
    %cst_9 = arith.constant dense<0.000000e+00> : vector<56xf32>
    %23 = vector.multi_reduction <add>, %22, %cst_9 [1] : vector<56x16xf32> to vector<56xf32>
    %24 = vector.shape_cast %23 : vector<56xf32> to vector<56x1xf32>
    %cst_10 = arith.constant 9.99999997E-7 : f32
    %25 = vector.broadcast %cst_10 : f32 to vector<56x1xf32>
    %26 = arith.addf %24, %25 : vector<56x1xf32>
    %27 = vector.broadcast %26 : vector<56x1xf32> to vector<56x16xf32>
    %28 = arith.divf %18, %27 : vector<56x16xf32>
    %29 = vector.extract_strided_slice %1 {offsets = [0, 16], sizes = [56, 16], strides = [1, 1]} : vector<56x32xf32> to vector<56x16xf32>
    %cst_11 = arith.constant 0.000000e+00 : f32
    %30 = vector.broadcast %cst_11 : f32 to vector<56x16xf32>
    %31 = arith.maximumf %29, %30 : vector<56x16xf32>
    %32 = vector.extract_strided_slice %4 {offsets = [0, 16], sizes = [56, 16], strides = [1, 1]} : vector<56x32xf32> to vector<56x16xf32>
    %cst_12 = arith.constant 0.000000e+00 : f32
    %33 = vector.broadcast %cst_12 : f32 to vector<56x16xf32>
    %34 = arith.maximumf %32, %33 : vector<56x16xf32>
    %35 = vector.extract_strided_slice %5 {offsets = [0, 16], sizes = [56, 16], strides = [1, 1]} : vector<56x32xf32> to vector<56x16xf32>
    %36 = arith.truncf %34 : vector<56x16xf32> to vector<56x16xbf16>
    %37 = arith.truncf %35 : vector<56x16xf32> to vector<56x16xbf16>
    %cst_13 = arith.constant dense<0.000000e+00> : vector<16x16xf32>
    %38 = tpu.matmul %36, %37, %cst_13 {dimension_numbers = #tpu.dot_dimension_numbers<[0], [0], [1], [1], [0, 1, 1, 1], [], []>} : vector<56x16xbf16>, vector<56x16xbf16>, vector<16x16xf32> -> vector<16x16xf32>
    %39 = arith.truncf %31 : vector<56x16xf32> to vector<56x16xbf16>
    %40 = arith.truncf %38 : vector<16x16xf32> to vector<16x16xbf16>
    %cst_14 = arith.constant dense<0.000000e+00> : vector<56x16xf32>
    %41 = tpu.matmul %39, %40, %cst_14 {dimension_numbers = #tpu.dot_dimension_numbers<[1], [0], [0], [1], [0, 0, 1, 1], [], []>} : vector<56x16xbf16>, vector<16x16xbf16>, vector<56x16xf32> -> vector<56x16xf32>
    %cst_15 = arith.constant dense<0.000000e+00> : vector<16xf32>
    %42 = vector.multi_reduction <add>, %34, %cst_15 [0] : vector<56x16xf32> to vector<16xf32>
    %43 = vector.shape_cast %42 : vector<16xf32> to vector<1x16xf32>
    %44 = vector.broadcast %43 : vector<1x16xf32> to vector<56x16xf32>
    %45 = arith.mulf %31, %44 : vector<56x16xf32>
    %cst_16 = arith.constant dense<0.000000e+00> : vector<56xf32>
    %46 = vector.multi_reduction <add>, %45, %cst_16 [1] : vector<56x16xf32> to vector<56xf32>
    %47 = vector.shape_cast %46 : vector<56xf32> to vector<56x1xf32>
    %cst_17 = arith.constant 9.99999997E-7 : f32
    %48 = vector.broadcast %cst_17 : f32 to vector<56x1xf32>
    %49 = arith.addf %47, %48 : vector<56x1xf32>
    %50 = vector.broadcast %49 : vector<56x1xf32> to vector<56x16xf32>
    %51 = arith.divf %41, %50 : vector<56x16xf32>
    %52 = tpu.concatenate %28, %51 in 1 : vector<56x16xf32>, vector<56x16xf32> -> vector<56x32xf32>
    %c0_18 = arith.constant 0 : index
    %c0_19 = arith.constant 0 : index
    %c0_20 = arith.constant 0 : index
    %53 = vector.load %arg3[%c0_18, %c0_19, %c0_20] : memref<1x56x32xf32, #tpu.memory_space<vmem>>, vector<1x56x32xf32>
    %54 = vector.shape_cast %53 : vector<1x56x32xf32> to vector<56x32xf32>
    %55 = vector.shape_cast %52 : vector<56x32xf32> to vector<1x56x32xf32>
    tpu.vector_store %arg3[%c0_18, %c0_19, %c0_20], %55 {strides = array<i32>} : memref<1x56x32xf32, #tpu.memory_space<vmem>>, vector<1x56x32xf32>,
    return
  }
  func.func @transform_0(%arg0: i32) -> (i32, i32, i32) {
    %c0_i32 = arith.constant 0 : i32
    %c0_i32_0 = arith.constant 0 : i32
    %c0_i32_1 = arith.constant 0 : i32
    return %arg0, %c0_i32, %c0_i32_0 : i32, i32, i32
  }
  func.func @transform_1(%arg0: i32) -> (i32, i32, i32) {
    %c0_i32 = arith.constant 0 : i32
    %c0_i32_0 = arith.constant 0 : i32
    %c0_i32_1 = arith.constant 0 : i32
    return %arg0, %c0_i32, %c0_i32_0 : i32, i32, i32
  }
  func.func @transform_2(%arg0: i32) -> (i32, i32, i32) {
    %c0_i32 = arith.constant 0 : i32
    %c0_i32_0 = arith.constant 0 : i32
    %c0_i32_1 = arith.constant 0 : i32
    return %arg0, %c0_i32, %c0_i32_0 : i32, i32, i32
  }
}

module attributes {stable_mosaic.version = 11 : i64} {
  func.func @_linear_kernel(%arg0: i32, %arg1: i32, %arg2: i32, %arg3: memref<112x32xf32, #tpu.memory_space<vmem>>, %arg4: memref<32x7xbf16, #tpu.memory_space<vmem>>, %arg5: memref<1x7xf32, #tpu.memory_space<vmem>>, %arg6: memref<112x7xf32, #tpu.memory_space<vmem>>, %arg7: memref<112x7xf32, #tpu.memory_space<vmem>>) attributes {dimension_semantics = [#tpu.dimension_semantics<parallel>, #tpu.dimension_semantics<parallel>, #tpu.dimension_semantics<arbitrary>], iteration_bounds = array<i64: 1, 1, 1>, scalar_prefetch = 0 : i64, scratch_operands = 1 : i64, tpu.core_type = #tpu.core_type<tc>, window_params = [{transform_indices = @transform_0, window_bounds = array<i64: 112, 32>}, {transform_indices = @transform_1, window_bounds = array<i64: 32, 7>}, {transform_indices = @transform_2, window_bounds = array<i64: 1, 7>}, {transform_indices = @transform_3, window_bounds = array<i64: 112, 7>}]} {
    %c0_i32 = arith.constant 0 : i32
    %0 = arith.cmpi eq, %arg2, %c0_i32 : i32
    %1 = arith.extui %0 : i1 to i32
    %c0_i32_0 = arith.constant 0 : i32
    %2 = arith.cmpi ne, %1, %c0_i32_0 : i32
    scf.if %2 {
      %cst_10 = arith.constant 0.000000e+00 : f32
      %13 = vector.broadcast %cst_10 : f32 to vector<112x7xf32>
      %c0_11 = arith.constant 0 : index
      %c0_12 = arith.constant 0 : index
      %14 = vector.load %arg7[%c0_11, %c0_12] : memref<112x7xf32, #tpu.memory_space<vmem>>, vector<112x7xf32>
      tpu.vector_store %arg7[%c0_11, %c0_12], %13 {strides = array<i32>} : memref<112x7xf32, #tpu.memory_space<vmem>>, vector<112x7xf32>,
    } else {
    }
    %c0 = arith.constant 0 : index
    %c0_1 = arith.constant 0 : index
    %3 = vector.load %arg7[%c0, %c0_1] : memref<112x7xf32, #tpu.memory_space<vmem>>, vector<112x7xf32>
    %c0_2 = arith.constant 0 : index
    %c0_3 = arith.constant 0 : index
    %4 = vector.load %arg3[%c0_2, %c0_3] : memref<112x32xf32, #tpu.memory_space<vmem>>, vector<112x32xf32>
    %5 = arith.truncf %4 : vector<112x32xf32> to vector<112x32xbf16>
    %c0_4 = arith.constant 0 : index
    %c0_5 = arith.constant 0 : index
    %6 = vector.load %arg4[%c0_4, %c0_5] : memref<32x7xbf16, #tpu.memory_space<vmem>>, vector<32x7xbf16>
    %cst = arith.constant dense<0.000000e+00> : vector<112x7xf32>
    %7 = tpu.matmul %5, %6, %cst {dimension_numbers = #tpu.dot_dimension_numbers<[1], [0], [0], [1], [0, 0, 1, 1], [], []>} : vector<112x32xbf16>, vector<32x7xbf16>, vector<112x7xf32> -> vector<112x7xf32>
    %8 = arith.addf %3, %7 : vector<112x7xf32>
    %c0_6 = arith.constant 0 : index
    %c0_7 = arith.constant 0 : index
    %9 = vector.load %arg7[%c0_6, %c0_7] : memref<112x7xf32, #tpu.memory_space<vmem>>, vector<112x7xf32>
    tpu.vector_store %arg7[%c0_6, %c0_7], %8 {strides = array<i32>} : memref<112x7xf32, #tpu.memory_space<vmem>>, vector<112x7xf32>,
    %c0_i32_8 = arith.constant 0 : i32
    %10 = arith.cmpi eq, %arg2, %c0_i32_8 : i32
    %11 = arith.extui %10 : i1 to i32
    %c0_i32_9 = arith.constant 0 : i32
    %12 = arith.cmpi ne, %11, %c0_i32_9 : i32
    scf.if %12 {
      %c0_10 = arith.constant 0 : index
      %c0_11 = arith.constant 0 : index
      %13 = vector.load %arg7[%c0_10, %c0_11] : memref<112x7xf32, #tpu.memory_space<vmem>>, vector<112x7xf32>
      %c0_12 = arith.constant 0 : index
      %c0_13 = arith.constant 0 : index
      %14 = vector.load %arg5[%c0_12, %c0_13] : memref<1x7xf32, #tpu.memory_space<vmem>>, vector<1x7xf32>
      %15 = vector.broadcast %14 : vector<1x7xf32> to vector<112x7xf32>
      %16 = arith.addf %13, %15 : vector<112x7xf32>
      %c0_14 = arith.constant 0 : index
      %c0_15 = arith.constant 0 : index
      %17 = vector.load %arg6[%c0_14, %c0_15] : memref<112x7xf32, #tpu.memory_space<vmem>>, vector<112x7xf32>
      tpu.vector_store %arg6[%c0_14, %c0_15], %16 {strides = array<i32>} : memref<112x7xf32, #tpu.memory_space<vmem>>, vector<112x7xf32>,
    } else {
    }
    return
  }
  func.func @transform_0(%arg0: i32, %arg1: i32, %arg2: i32) -> (i32, i32) {
    %c0_i32 = arith.constant 0 : i32
    return %arg0, %arg2 : i32, i32
  }
  func.func @transform_1(%arg0: i32, %arg1: i32, %arg2: i32) -> (i32, i32) {
    %c0_i32 = arith.constant 0 : i32
    return %arg2, %arg1 : i32, i32
  }
  func.func @transform_2(%arg0: i32, %arg1: i32, %arg2: i32) -> (i32, i32) {
    %c0_i32 = arith.constant 0 : i32
    %c0_i32_0 = arith.constant 0 : i32
    return %c0_i32, %arg1 : i32, i32
  }
  func.func @transform_3(%arg0: i32, %arg1: i32, %arg2: i32) -> (i32, i32) {
    %c0_i32 = arith.constant 0 : i32
    return %arg0, %arg1 : i32, i32
  }
}

</mosaic_0001>

<bundles_post_ra>
// kernel: spacetimeformer_forward.56
= control target key start
LH: loop header
LB: loop body
LE: loop exit
PB: predicated region body
PF: predicated region fallthrough
CT: control target
= control target key end

     0   :  { %s501_s18 = smov 0   ;;  %s571_s0 = inlined_call_operand.vmem [shape: f32[2,56,5], index: 0, kind: input, shape index: {}]   ;;  %s572_s1 = inlined_call_operand.vmem [shape: bf16[5,32], index: 1, kind: input, shape index: {}]   ;;  %s573_s2 = inlined_call_operand.vmem [shape: f32[1,32], index: 2, kind: input, shape index: {}]   ;;  %s574_s3 = inlined_call_operand.vmem [shape: f32[1,32], index: 3, kind: input, shape index: {}]   ;;  %s575_s4 = inlined_call_operand.vmem [shape: f32[56,32], index: 4, kind: input, shape index: {}]   ;;  %s576_s5 = inlined_call_operand.vmem [shape: f32[2,56,32], index: 5, kind: output, shape index: {}]  }
   0x1 LB: > { %s420_s19 = sadd.s32 4294967295, %s468_s18   ;;  %p424_p0 = scmp.ge.s32.totalorder %s468_s18, 1  ;;  %s468_s18 = sphi %s501_s18, %s15_s18  }
   0x2   : > { %p187_p1 = scmp.lt.s32.totalorder %s468_s18, 3 }
   0x4   : > { %p188_p2 = pnand %p424_p0, %p187_p1 }
   0x5   : > { %p215_p3 = scmp.lt.s32.totalorder (!%p188_p2), %s420_s19, 1 }
   0x6   : > { %191 = sbr.rel (%p188_p2) target bundleno = 227 (0xe3), region = 40 }
   0xb   : > { %v237_v0 = vld [vmem:[%s572_s1] sm:$0x7]  ;;  %vm258_vm0 = vcmask 1041408   ;;  %vm259_vm1 = vcmask 1042432   ;;  %v470_v1 = vmov 65535   ;;  %s578_s19 = smov (!%p215_p3, %s420_s19), 1 }
   0xc   : > { %v260_v2 = vsel %vm258_vm0, 4294967295, %v470_v1  ;;  %s452_s22 = smul.u32 56, %s578_s19  ;;  %vm245_vm2 = vcmask 39936   ;;  %v427_v16 = vld [vmem:[%s573_s2] ss:$0 sm:$0xff]  ;;  %v345_v21 = vld [vmem:[%s575_s4 + $0x10] sm:$0xff] }
   0xd   : > { %v261_v3 = vsel %vm259_vm1, %v260_v2, 0  ;;  %v432_v18 = vld [vmem:[%s574_s3] ss:$0 sm:$0xff]  ;;  %v349_v25 = vld [vmem:[%s575_s4 + $0x30] sm:$0xff]  ;;  %vm357_vm3 = vcmask 261120   ;;  %v346_v39 = vld [vmem:[%s575_s4 + $0x18] sm:$0xff] }
   0xe   : > { %v263_v4 = vand.u32 %v261_v3, %v237_v0  ;;  %s219_s25 = scalar_lea.vmem %s571_s0, %s452_s22  ;;  %s537_s11 = scalar_lea.vmem %s576_s5, %s452_s22  ;;  %v343_v29 = vld [vmem:[%s575_s4] sm:$0xff]  ;;  %v344_v46 = vld [vmem:[%s575_s4 + $0x8] sm:$0xff] }
   0xf   : > { %v226_v5 = vld [vmem:[%s219_s25] sm:$0xff]  ;;  %v227_v6 = vld [vmem:[%s219_s25 + $0x8] sm:$0xff]  ;;  %v228_v10 = vld [vmem:[%s219_s25 + $0x10] sm:$0xff] }
  0x10   : > { %440 = vmatprep.subr.bf16.mxu0 %v263_v4  ;;  %450 = vmatprep.subr.bf16.mxu1 %v263_v4  ;;  %v230_v7 = vld [vmem:[%s219_s25 + $0x20] sm:$0xff]  ;;  %v233_v8 = vpack.c.bf16 %v227_v6, %v226_v5  ;;  %v231_v9 = vld [vmem:[%s219_s25 + $0x28] sm:$0xff]  ;;  %v229_v11 = vld [vmem:[%s219_s25 + $0x18] sm:$0xff] }
  0x11   : > { %441 = vmatpush3.bf16.msra.mxu0 %v263_v4  ;;  %451 = vmatpush3.bf16.msra.mxu1 %v263_v4  ;;  %v235_v12 = vpack.c.bf16 %v231_v9, %v230_v7  ;;  %v234_v13 = vpack.c.bf16 %v229_v11, %v228_v10  ;;  %v232_v14 = vld [vmem:[%s219_s25 + $0x30] sm:$0xff]  ;;  %v347_v34 = vld [vmem:[%s575_s4 + $0x20] sm:$0xff]  ;;  %v348_v50 = vld [vmem:[%s575_s4 + $0x28] sm:$0xff] }
  0x12   : > { %442 = vmatprep.mubr.msk.bf16.mxu0 %vm245_vm2, %v233_v8  ;;  %v236_v15 = vpack.c.bf16 %v232_v14, %v232_v14 }
  0x13   : > { %446 = vmatprep.mubr.msk.bf16.mxu1 %vm245_vm2, %v235_v12 }
  0x14   : > { %443 = vmatmul.mubr.msk.bf16.vlgmr.msra.gmra.mxu0 %vm245_vm2, %v234_v13  ;;  %447 = vmatmul.mubr.msk.bf16.vlgmr.msra.gmra.mxu1 %vm245_vm2, %v236_v15 }
  0xd4   : > { %v444_v17 = vpop.f32.mrf.mxu0  ;;  %v448_v20 = vpop.f32.mrf.mxu1 }
  0xd5   : > { %v308_v19 = vadd.f32 %v444_v17, %v427_v16  ;;  %v324_v22 = vadd.f32 %v448_v20, %v427_v16 }
  0xd6   : > { %v299_v23 = vpop.f32.mrf.mxu0  ;;  %v315_v27 = vpop.f32.mrf.mxu1 }
  0xd7   : > { %v338_v24 = vadd.f32 %v432_v18, %v308_v19  ;;  %v300_v26 = vadd.f32 %v427_v16, %v299_v23  ;;  %v342_v28 = vadd.f32 %v432_v18, %v324_v22  ;;  %v316_v30 = vadd.f32 %v427_v16, %v315_v27 }
  0xd8   : > { %v445_v31 = vpop.f32.mrf.mxu0  ;;  %v449_v36 = vpop.f32.mrf.mxu1 }
  0xd9   : > { %v352_v32 = vadd.f32 %v345_v21, %v338_v24  ;;  %v336_v33 = vadd.f32 %v432_v18, %v300_v26  ;;  %v311_v35 = vadd.f32 %v445_v31, %v427_v16  ;;  %v356_v37 = vadd.f32 %v349_v25, %v342_v28 }
  0xda   : > { %v340_v38 = vadd.f32 %v432_v18, %v316_v30  ;;  %v302_v40 = vpop.f32.mrf.mxu0  ;;  %v318_v44 = vpop.f32.mrf.mxu1 }
  0xdb   : > { %360 = vst.msk [vmem:[%s537_s11 + $0x10] sm:$0xff] %vm357_vm3, %v352_v32  ;;  %v350_v41 = vadd.f32 %v343_v29, %v336_v33  ;;  %v339_v42 = vadd.f32 %v432_v18, %v311_v35  ;;  %v303_v43 = vadd.f32 %v427_v16, %v302_v40  ;;  %364 = vst.msk [vmem:[%s537_s11 + $0x30] sm:$0xff] %vm357_vm3, %v356_v37 }
  0xdc   : > { %v354_v45 = vadd.f32 %v347_v34, %v340_v38  ;;  %v319_v47 = vadd.f32 %v427_v16, %v318_v44 }
  0xdd   : > { %358 = vst.msk [vmem:[%s537_s11] sm:$0xff] %vm357_vm3, %v350_v41  ;;  %v353_v48 = vadd.f32 %v346_v39, %v339_v42  ;;  %v337_v49 = vadd.f32 %v432_v18, %v303_v43 }
  0xde   : > { %362 = vst.msk [vmem:[%s537_s11 + $0x20] sm:$0xff] %vm357_vm3, %v354_v45  ;;  %v341_v51 = vadd.f32 %v432_v18, %v319_v47 }
  0xdf   : > { %361 = vst.msk [vmem:[%s537_s11 + $0x18] sm:$0xff] %vm357_vm3, %v353_v48  ;;  %v351_v52 = vadd.f32 %v344_v46, %v337_v49 }
  0xe0   : > { %v355_v53 = vadd.f32 %v348_v50, %v341_v51 }
  0xe1   : > { %359 = vst.msk [vmem:[%s537_s11 + $0x8] sm:$0xff] %vm357_vm3, %v351_v52 }
  0xe2   : > { %363 = vst.msk [vmem:[%s537_s11 + $0x28] sm:$0xff] %vm357_vm3, %v355_v53 }
  0xe3 PF: > { %s15_s18 = sadd.s32 1, %s468_s18  }
  0xe4   : > { %p12_p4 = scmp.ge.s32.totalorder %s15_s18, 4  }
  0xe6   :  { %14 = sbr.rel (!%p12_p4) target bundleno = 1 (0x1), region = 70 }

// kernel: spacetimeformer_forward.42
= control target key start
LH: loop header
LB: loop body
LE: loop exit
PB: predicated region body
PF: predicated region fallthrough
CT: control target
= control target key end

     0   :  { %vm19_vm0 = vcmask 785408   ;;  %v340_v0 = vmov 0.0   ;;  %vm341_vm1 = vmmov 0   ;;  %vm85_vm2 = vcmask 261120   ;;  %s527_s1 = inlined_call_operand.vmem [shape: bf16[32,96], index: 1, kind: input, shape index: {}]   ;;  %s528_s0 = inlined_call_operand.vmem [shape: f32[112,32], index: 0, kind: input, shape index: {}]   ;;  %s529_s2 = inlined_call_operand.vmem [shape: f32[1,96], index: 2, kind: input, shape index: {}]   ;;  %s530_s3 = inlined_call_operand.vmem [shape: f32[112,96], index: 3, kind: output, shape index: {}]  }
   0x1   :  { %300 = vmatprep.subr.bf16.mxu0 %v340_v0  ;;  %v338_v1 = vld [vmem:[%s527_s1 + $0x8] sm:$0xff]   ;;  %332 = vmatprep.subr.bf16.mxu1 %v340_v0  ;;  %20 = vst.msk [vmem:[#allocation2] sm:$0xff] %vm19_vm0, %v340_v0  ;;  %21 = vst.msk [vmem:[#allocation2 + $0x8] sm:$0xff] %vm19_vm0, %v340_v0  ;;  %v339_v2 = vld [vmem:[%s527_s1] sm:$0xff]  }
   0x2   :  { %22 = vst.msk [vmem:[#allocation2 + $0x10] sm:$0xff] %vm19_vm0, %v340_v0  ;;  %23 = vst.msk [vmem:[#allocation2 + $0x18] sm:$0xff] %vm19_vm0, %v340_v0  ;;  %304 = vmatprep.mubr.msk.bf16.mxu0 %vm341_vm1, %v340_v0  ;;  %320 = vmatprep.mubr.msk.bf16.mxu1 %vm341_vm1, %v340_v0  ;;  %v48_v3 = vld [vmem:[%s528_s0] sm:$0xff]  ;;  %v49_v4 = vld [vmem:[%s528_s0 + $0x8] sm:$0xff] }
   0x3   :  { %24 = vst.msk [vmem:[#allocation2 + $0x20] sm:$0xff] %vm19_vm0, %v340_v0  ;;  %25 = vst.msk [vmem:[#allocation2 + $0x28] sm:$0xff] %vm19_vm0, %v340_v0  ;;  %301 = vmatpush3.bf16.msra.mxu0 %v338_v1  ;;  %334 = vmatpush3.bf16.msra.mxu1 %v338_v1  ;;  %v56_v5 = vld [vmem:[%s528_s0 + $0x40] sm:$0xff]  ;;  %v57_v6 = vld [vmem:[%s528_s0 + $0x48] sm:$0xff]  ;;  %v62_v7 = vpack.c.bf16 %v49_v4, %v48_v3 }
   0x4   :  { %26 = vst.msk [vmem:[#allocation2 + $0x30] sm:$0xff] %vm19_vm0, %v340_v0  ;;  %27 = vst.msk [vmem:[#allocation2 + $0x38] sm:$0xff] %vm19_vm0, %v340_v0  ;;  %302 = vmatprep.subr.bf16.mxu0 %v340_v0  ;;  %333 = vmatprep.subr.bf16.mxu1 %v340_v0  ;;  %v66_v8 = vpack.c.bf16 %v57_v6, %v56_v5  ;;  %v50_v9 = vld [vmem:[%s528_s0 + $0x10] sm:$0xff]  ;;  %v51_v10 = vld [vmem:[%s528_s0 + $0x18] sm:$0xff] }
   0x5   :  { %28 = vst.msk [vmem:[#allocation2 + $0x40] sm:$0xff] %vm19_vm0, %v340_v0  ;;  %29 = vst.msk [vmem:[#allocation2 + $0x48] sm:$0xff] %vm19_vm0, %v340_v0  ;;  %v58_v11 = vld [vmem:[%s528_s0 + $0x50] sm:$0xff]  ;;  %v59_v12 = vld [vmem:[%s528_s0 + $0x58] sm:$0xff]  ;;  %v63_v13 = vpack.c.bf16 %v51_v10, %v50_v9 }
   0x6   :  { %30 = vst.msk [vmem:[#allocation2 + $0x50] sm:$0xff] %vm19_vm0, %v340_v0  ;;  %31 = vst.msk [vmem:[#allocation2 + $0x58] sm:$0xff] %vm19_vm0, %v340_v0  ;;  %v67_v14 = vpack.c.bf16 %v59_v12, %v58_v11  ;;  %v52_v15 = vld [vmem:[%s528_s0 + $0x20] sm:$0xff]  ;;  %v53_v16 = vld [vmem:[%s528_s0 + $0x28] sm:$0xff] }
   0x7   :  { %32 = vst.msk [vmem:[#allocation2 + $0x60] sm:$0xff] %vm19_vm0, %v340_v0  ;;  %33 = vst.msk [vmem:[#allocation2 + $0x68] sm:$0xff] %vm19_vm0, %v340_v0  ;;  %303 = vmatpush3.bf16.msra.mxu0 %v339_v2  ;;  %335 = vmatpush3.bf16.msra.mxu1 %v339_v2  ;;  %v60_v17 = vld [vmem:[%s528_s0 + $0x60] sm:$0xff]  ;;  %v61_v18 = vld [vmem:[%s528_s0 + $0x68] sm:$0xff]  ;;  %v64_v19 = vpack.c.bf16 %v53_v16, %v52_v15 }
   0x8   :  { %v68_v20 = vpack.c.bf16 %v61_v18, %v60_v17  ;;  %v54_v21 = vld [vmem:[%s528_s0 + $0x30] sm:$0xff]  ;;  %v55_v22 = vld [vmem:[%s528_s0 + $0x38] sm:$0xff]  ;;  %v34_v24 = vld [vmem:[#allocation2] sm:$0xff] }
   0x9   :  { %v65_v23 = vpack.c.bf16 %v55_v22, %v54_v21  ;;  %v35_v31 = vld [vmem:[#allocation2 + $0x8] sm:$0xff]  ;;  %v36_v39 = vld [vmem:[#allocation2 + $0x10] sm:$0xff]  ;;  %v445_v42 = vld [vmem:[%s529_s2] ss:$0 sm:$0xff] }
   0xa   :  { %305 = vmatmul.mubr.msk.bf16.vlgmr.msra.gmra.mxu0 %vm85_vm2, %v62_v7  ;;  %321 = vmatmul.mubr.msk.bf16.vlgmr.msra.gmra.mxu1 %vm85_vm2, %v66_v8  ;;  %v37_v47 = vld [vmem:[#allocation2 + $0x18] sm:$0xff]  ;;  %v38_v59 = vld [vmem:[#allocation2 + $0x20] sm:$0xff]  ;;  %v39_v7 = vld [vmem:[#allocation2 + $0x28] sm:$0xff] }
   0xb   :  { %308 = vmatprep.mubr.msk.bf16.mxu0 %vm341_vm1, %v340_v0  ;;  %324 = vmatprep.mubr.msk.bf16.mxu1 %vm341_vm1, %v340_v0  ;;  %v40_v22 = vld [vmem:[#allocation2 + $0x30] sm:$0xff] }
   0xc   :  { %v42_v25 = vld [vmem:[#allocation2 + $0x40] sm:$0xff]  ;;  %v43_v33 = vld [vmem:[#allocation2 + $0x48] sm:$0xff] }
   0xd   :  { %v44_v41 = vld [vmem:[#allocation2 + $0x50] sm:$0xff]  ;;  %v45_v52 = vld [vmem:[#allocation2 + $0x58] sm:$0xff] }
   0xe   :  { %v47_v12 = vld [vmem:[#allocation2 + $0x68] sm:$0xff] }
  0x12   :  { %309 = vmatmul.mubr.msk.bf16.gmra.mxu0 %vm85_vm2, %v63_v13  ;;  %325 = vmatmul.mubr.msk.bf16.gmra.mxu1 %vm85_vm2, %v67_v14 }
  0x13   :  { %312 = vmatprep.mubr.msk.bf16.mxu0 %vm341_vm1, %v340_v0  ;;  %328 = vmatprep.mubr.msk.bf16.mxu1 %vm341_vm1, %v340_v0 }
  0x1a   :  { %313 = vmatmul.mubr.msk.bf16.gmra.mxu0 %vm85_vm2, %v64_v19  ;;  %329 = vmatmul.mubr.msk.bf16.gmra.mxu1 %vm85_vm2, %v68_v20 }
  0x1b   :  { %316 = vmatprep.mubr.msk.bf16.mxu0 %vm341_vm1, %v340_v0  ;;  %v46_v0 = vld [vmem:[#allocation2 + $0x60] sm:$0xff] }
  0x22   :  { %317 = vmatmul.mubr.msk.bf16.gmra.mxu0 %vm85_vm2, %v65_v23 }
  0xca   :  { %v141_v26 = vpop.f32.mrf.mxu0  ;;  %v173_v27 = vpop.f32.mrf.mxu1 }
  0xcb   :  { %v196_v28 = vadd.f32 %v141_v26, %v34_v24  ;;  %v204_v29 = vadd.f32 %v173_v27, %v42_v25 }
  0xcc   :  { %v306_v30 = vpop.f32.mrf.mxu0  ;;  %v322_v32 = vpop.f32.mrf.mxu1 }
  0xcd   :  { %211 = vst.msk [vmem:[#allocation2] sm:$0xff] %vm19_vm0, %v196_v28  ;;  %219 = vst.msk [vmem:[#allocation2 + $0x40] sm:$0xff] %vm19_vm0, %v204_v29 }
  0xce   :  { %v144_v34 = vpop.f32.mrf.mxu0  ;;  %v176_v35 = vpop.f32.mrf.mxu1 }
  0xcf   :  { %v197_v36 = vadd.f32 %v144_v34, %v35_v31  ;;  %v205_v37 = vadd.f32 %v176_v35, %v43_v33  ;;  %v41_v31 = vld [vmem:[#allocation2 + $0x38] sm:$0xff] }
  0xd0   :  { %v307_v38 = vpop.f32.mrf.mxu0  ;;  %v323_v40 = vpop.f32.mrf.mxu1 }
  0xd1   :  { %212 = vst.msk [vmem:[#allocation2 + $0x8] sm:$0xff] %vm19_vm0, %v197_v36  ;;  %220 = vst.msk [vmem:[#allocation2 + $0x48] sm:$0xff] %vm19_vm0, %v205_v37 }
  0xd2   :  { %v149_v43 = vpop.f32.mrf.mxu0  ;;  %v181_v44 = vpop.f32.mrf.mxu1 }
  0xd3   :  { %v198_v45 = vadd.f32 %v149_v43, %v36_v39  ;;  %v206_v46 = vadd.f32 %v181_v44, %v44_v41 }
  0xd4   :  { %v228_v48 = vld [vmem:[#allocation2] sm:$0xff]  ;;  %v310_v50 = vpop.f32.mrf.mxu0  ;;  %v326_v51 = vpop.f32.mrf.mxu1 }
  0xd5   :  { %v236_v49 = vld [vmem:[#allocation2 + $0x40] sm:$0xff]  ;;  %v249_v53 = vadd.f32 %v445_v42, %v228_v48  ;;  %213 = vst.msk [vmem:[#allocation2 + $0x10] sm:$0xff] %vm19_vm0, %v198_v45  ;;  %221 = vst.msk [vmem:[#allocation2 + $0x50] sm:$0xff] %vm19_vm0, %v206_v46 }
  0xd6   :  { %v257_v54 = vadd.f32 %v445_v42, %v236_v49  ;;  %v152_v55 = vpop.f32.mrf.mxu0  ;;  %v184_v56 = vpop.f32.mrf.mxu1 }
  0xd7   :  { %263 = vst.msk [vmem:[%s530_s3] sm:$0xff] %vm19_vm0, %v249_v53  ;;  %v199_v57 = vadd.f32 %v152_v55, %v37_v47  ;;  %v207_v58 = vadd.f32 %v184_v56, %v45_v52 }
  0xd8   :  { %271 = vst.msk [vmem:[%s530_s3 + $0x40] sm:$0xff] %vm19_vm0, %v257_v54  ;;  %v229_v60 = vld [vmem:[#allocation2 + $0x8] sm:$0xff]  ;;  %v311_v62 = vpop.f32.mrf.mxu0  ;;  %v327_v63 = vpop.f32.mrf.mxu1 }
  0xd9   :  { %v237_v61 = vld [vmem:[#allocation2 + $0x48] sm:$0xff]  ;;  %v250_v1 = vadd.f32 %v445_v42, %v229_v60  ;;  %214 = vst.msk [vmem:[#allocation2 + $0x18] sm:$0xff] %vm19_vm0, %v199_v57  ;;  %222 = vst.msk [vmem:[#allocation2 + $0x58] sm:$0xff] %vm19_vm0, %v207_v58 }
  0xda   :  { %v258_v2 = vadd.f32 %v445_v42, %v237_v61  ;;  %v157_v3 = vpop.f32.mrf.mxu0  ;;  %v189_v4 = vpop.f32.mrf.mxu1 }
  0xdb   :  { %264 = vst.msk [vmem:[%s530_s3 + $0x8] sm:$0xff] %vm19_vm0, %v250_v1  ;;  %v200_v5 = vadd.f32 %v157_v3, %v38_v59  ;;  %v208_v6 = vadd.f32 %v189_v4, %v46_v0 }
  0xdc   :  { %272 = vst.msk [vmem:[%s530_s3 + $0x48] sm:$0xff] %vm19_vm0, %v258_v2  ;;  %v230_v8 = vld [vmem:[#allocation2 + $0x10] sm:$0xff]  ;;  %v314_v10 = vpop.f32.mrf.mxu0  ;;  %v330_v11 = vpop.f32.mrf.mxu1 }
  0xdd   :  { %v238_v9 = vld [vmem:[#allocation2 + $0x50] sm:$0xff]  ;;  %v251_v13 = vadd.f32 %v445_v42, %v230_v8  ;;  %215 = vst.msk [vmem:[#allocation2 + $0x20] sm:$0xff] %vm19_vm0, %v200_v5  ;;  %223 = vst.msk [vmem:[#allocation2 + $0x60] sm:$0xff] %vm19_vm0, %v208_v6 }
  0xde   :  { %v259_v14 = vadd.f32 %v445_v42, %v238_v9  ;;  %v160_v15 = vpop.f32.mrf.mxu0  ;;  %v192_v16 = vpop.f32.mrf.mxu1 }
  0xdf   :  { %265 = vst.msk [vmem:[%s530_s3 + $0x10] sm:$0xff] %vm19_vm0, %v251_v13  ;;  %v201_v17 = vadd.f32 %v160_v15, %v39_v7  ;;  %v209_v18 = vadd.f32 %v192_v16, %v47_v12 }
  0xe0   :  { %273 = vst.msk [vmem:[%s530_s3 + $0x50] sm:$0xff] %vm19_vm0, %v259_v14  ;;  %v231_v19 = vld [vmem:[#allocation2 + $0x18] sm:$0xff]  ;;  %v315_v21 = vpop.f32.mrf.mxu0  ;;  %v331_v23 = vpop.f32.mrf.mxu1 }
  0xe1   :  { %v239_v20 = vld [vmem:[#allocation2 + $0x58] sm:$0xff]  ;;  %v252_v24 = vadd.f32 %v445_v42, %v231_v19  ;;  %216 = vst.msk [vmem:[#allocation2 + $0x28] sm:$0xff] %vm19_vm0, %v201_v17  ;;  %224 = vst.msk [vmem:[#allocation2 + $0x68] sm:$0xff] %vm19_vm0, %v209_v18 }
  0xe2   :  { %v260_v25 = vadd.f32 %v445_v42, %v239_v20  ;;  %v165_v26 = vpop.f32.mrf.mxu0 }
  0xe3   :  { %266 = vst.msk [vmem:[%s530_s3 + $0x18] sm:$0xff] %vm19_vm0, %v252_v24  ;;  %v202_v27 = vadd.f32 %v165_v26, %v40_v22 }
  0xe4   :  { %274 = vst.msk [vmem:[%s530_s3 + $0x58] sm:$0xff] %vm19_vm0, %v260_v25  ;;  %v232_v28 = vld [vmem:[#allocation2 + $0x20] sm:$0xff]  ;;  %v318_v30 = vpop.f32.mrf.mxu0 }
  0xe5   :  { %v240_v29 = vld [vmem:[#allocation2 + $0x60] sm:$0xff]  ;;  %v253_v32 = vadd.f32 %v445_v42, %v232_v28  ;;  %217 = vst.msk [vmem:[#allocation2 + $0x30] sm:$0xff] %vm19_vm0, %v202_v27 }
  0xe6   :  { %v261_v33 = vadd.f32 %v445_v42, %v240_v29  ;;  %v168_v34 = vpop.f32.mrf.mxu0 }
  0xe7   :  { %267 = vst.msk [vmem:[%s530_s3 + $0x20] sm:$0xff] %vm19_vm0, %v253_v32  ;;  %v203_v35 = vadd.f32 %v168_v34, %v41_v31 }
  0xe8   :  { %275 = vst.msk [vmem:[%s530_s3 + $0x60] sm:$0xff] %vm19_vm0, %v261_v33  ;;  %v233_v36 = vld [vmem:[#allocation2 + $0x28] sm:$0xff]  ;;  %v319_v38 = vpop.f32.mrf.mxu0 }
  0xe9   :  { %v241_v37 = vld [vmem:[#allocation2 + $0x68] sm:$0xff]  ;;  %v254_v39 = vadd.f32 %v445_v42, %v233_v36  ;;  %218 = vst.msk [vmem:[#allocation2 + $0x38] sm:$0xff] %vm19_vm0, %v203_v35 }
  0xea   :  { %v262_v40 = vadd.f32 %v445_v42, %v241_v37 }
  0xeb   :  { %268 = vst.msk [vmem:[%s530_s3 + $0x28] sm:$0xff] %vm19_vm0, %v254_v39 }
  0xec   :  { %276 = vst.msk [vmem:[%s530_s3 + $0x68] sm:$0xff] %vm19_vm0, %v262_v40  ;;  %v234_v41 = vld [vmem:[#allocation2 + $0x30] sm:$0xff] }
  0xed   :  { %v255_v43 = vadd.f32 %v445_v42, %v234_v41 }
  0xef   :  { %269 = vst.msk [vmem:[%s530_s3 + $0x30] sm:$0xff] %vm19_vm0, %v255_v43 }
  0xf0   :  { %v235_v44 = vld [vmem:[#allocation2 + $0x38] sm:$0xff] }
  0xf1   :  { %v256_v45 = vadd.f32 %v445_v42, %v235_v44 }
  0xf3   :  { %270 = vst.msk [vmem:[%s530_s3 + $0x38] sm:$0xff] %vm19_vm0, %v256_v45 }

// kernel: spacetimeformer_forward.44
= control target key start
LH: loop header
LB: loop body
LE: loop exit
PB: predicated region body
PF: predicated region fallthrough
CT: control target
= control target key end

     0   :  { %vm22_vm0 = vcmask 261120   ;;  %v370_v0 = vmov 0.0   ;;  %vm371_vm1 = vmmov 0   ;;  %s604_s1 = inlined_call_operand.vmem [shape: bf16[32,32], index: 1, kind: input, shape index: {}]   ;;  %s605_s0 = inlined_call_operand.vmem [shape: f32[112,32], index: 0, kind: input, shape index: {}]   ;;  %s606_s2 = inlined_call_operand.vmem [shape: f32[1,32], index: 2, kind: input, shape index: {}]   ;;  %s607_s3 = inlined_call_operand.vmem [shape: f32[112,32], index: 3, kind: input, shape index: {}]   ;;  %s608_s4 = inlined_call_operand.vmem [shape: f32[112,32], index: 4, kind: output, shape index: {}]  }
   0x1   :  { %330 = vmatprep.subr.bf16.mxu0 %v370_v0  ;;  %v368_v1 = vld [vmem:[%s604_s1 + $0x8] sm:$0xff]   ;;  %362 = vmatprep.subr.bf16.mxu1 %v370_v0  ;;  %23 = vst.msk [vmem:[#allocation2] sm:$0xff] %vm22_vm0, %v370_v0  ;;  %24 = vst.msk [vmem:[#allocation2 + $0x8] sm:$0xff] %vm22_vm0, %v370_v0  ;;  %v369_v2 = vld [vmem:[%s604_s1] sm:$0xff]  }
   0x2   :  { %25 = vst.msk [vmem:[#allocation2 + $0x10] sm:$0xff] %vm22_vm0, %v370_v0  ;;  %26 = vst.msk [vmem:[#allocation2 + $0x18] sm:$0xff] %vm22_vm0, %v370_v0  ;;  %334 = vmatprep.mubr.msk.bf16.mxu0 %vm371_vm1, %v370_v0  ;;  %350 = vmatprep.mubr.msk.bf16.mxu1 %vm371_vm1, %v370_v0  ;;  %v51_v3 = vld [vmem:[%s605_s0] sm:$0xff]  ;;  %v52_v4 = vld [vmem:[%s605_s0 + $0x8] sm:$0xff] }
   0x3   :  { %27 = vst.msk [vmem:[#allocation2 + $0x20] sm:$0xff] %vm22_vm0, %v370_v0  ;;  %28 = vst.msk [vmem:[#allocation2 + $0x28] sm:$0xff] %vm22_vm0, %v370_v0  ;;  %331 = vmatpush3.bf16.msra.mxu0 %v368_v1  ;;  %364 = vmatpush3.bf16.msra.mxu1 %v368_v1  ;;  %v59_v5 = vld [vmem:[%s605_s0 + $0x40] sm:$0xff]  ;;  %v60_v6 = vld [vmem:[%s605_s0 + $0x48] sm:$0xff]  ;;  %v65_v7 = vpack.c.bf16 %v52_v4, %v51_v3 }
   0x4   :  { %29 = vst.msk [vmem:[#allocation2 + $0x30] sm:$0xff] %vm22_vm0, %v370_v0  ;;  %30 = vst.msk [vmem:[#allocation2 + $0x38] sm:$0xff] %vm22_vm0, %v370_v0  ;;  %332 = vmatprep.subr.bf16.mxu0 %v370_v0  ;;  %363 = vmatprep.subr.bf16.mxu1 %v370_v0  ;;  %v69_v8 = vpack.c.bf16 %v60_v6, %v59_v5  ;;  %v53_v9 = vld [vmem:[%s605_s0 + $0x10] sm:$0xff]  ;;  %v54_v10 = vld [vmem:[%s605_s0 + $0x18] sm:$0xff] }
   0x5   :  { %31 = vst.msk [vmem:[#allocation2 + $0x40] sm:$0xff] %vm22_vm0, %v370_v0  ;;  %32 = vst.msk [vmem:[#allocation2 + $0x48] sm:$0xff] %vm22_vm0, %v370_v0  ;;  %v61_v11 = vld [vmem:[%s605_s0 + $0x50] sm:$0xff]  ;;  %v62_v12 = vld [vmem:[%s605_s0 + $0x58] sm:$0xff]  ;;  %v66_v13 = vpack.c.bf16 %v54_v10, %v53_v9 }
   0x6   :  { %33 = vst.msk [vmem:[#allocation2 + $0x50] sm:$0xff] %vm22_vm0, %v370_v0  ;;  %34 = vst.msk [vmem:[#allocation2 + $0x58] sm:$0xff] %vm22_vm0, %v370_v0  ;;  %v70_v14 = vpack.c.bf16 %v62_v12, %v61_v11  ;;  %v55_v15 = vld [vmem:[%s605_s0 + $0x20] sm:$0xff]  ;;  %v56_v16 = vld [vmem:[%s605_s0 + $0x28] sm:$0xff] }
   0x7   :  { %35 = vst.msk [vmem:[#allocation2 + $0x60] sm:$0xff] %vm22_vm0, %v370_v0  ;;  %36 = vst.msk [vmem:[#allocation2 + $0x68] sm:$0xff] %vm22_vm0, %v370_v0  ;;  %333 = vmatpush3.bf16.msra.mxu0 %v369_v2  ;;  %365 = vmatpush3.bf16.msra.mxu1 %v369_v2  ;;  %v63_v17 = vld [vmem:[%s605_s0 + $0x60] sm:$0xff]  ;;  %v64_v18 = vld [vmem:[%s605_s0 + $0x68] sm:$0xff]  ;;  %v67_v19 = vpack.c.bf16 %v56_v16, %v55_v15 }
   0x8   :  { %v71_v20 = vpack.c.bf16 %v64_v18, %v63_v17  ;;  %v57_v21 = vld [vmem:[%s605_s0 + $0x30] sm:$0xff]  ;;  %v58_v22 = vld [vmem:[%s605_s0 + $0x38] sm:$0xff]  ;;  %v37_v24 = vld [vmem:[#allocation2] sm:$0xff] }
   0x9   :  { %v68_v23 = vpack.c.bf16 %v58_v22, %v57_v21  ;;  %v38_v31 = vld [vmem:[#allocation2 + $0x8] sm:$0xff]  ;;  %v39_v39 = vld [vmem:[#allocation2 + $0x10] sm:$0xff]  ;;  %v480_v42 = vld [vmem:[%s606_s2] ss:$0 sm:$0xff] }
   0xa   :  { %335 = vmatmul.mubr.msk.bf16.vlgmr.msra.gmra.mxu0 %vm22_vm0, %v65_v7  ;;  %351 = vmatmul.mubr.msk.bf16.vlgmr.msra.gmra.mxu1 %vm22_vm0, %v69_v8  ;;  %v265_v45 = vld [vmem:[%s607_s3] sm:$0xff]  ;;  %v40_v49 = vld [vmem:[#allocation2 + $0x18] sm:$0xff]  ;;  %v266_v61 = vld [vmem:[%s607_s3 + $0x8] sm:$0xff] }
   0xb   :  { %338 = vmatprep.mubr.msk.bf16.mxu0 %vm371_vm1, %v370_v0  ;;  %354 = vmatprep.mubr.msk.bf16.mxu1 %vm371_vm1, %v370_v0  ;;  %v273_v46 = vld [vmem:[%s607_s3 + $0x40] sm:$0xff]  ;;  %v274_v62 = vld [vmem:[%s607_s3 + $0x48] sm:$0xff] }
   0xc   :  { %v45_v25 = vld [vmem:[#allocation2 + $0x40] sm:$0xff]  ;;  %v46_v33 = vld [vmem:[#allocation2 + $0x48] sm:$0xff] }
   0xd   :  { %v47_v41 = vld [vmem:[#allocation2 + $0x50] sm:$0xff]  ;;  %v48_v54 = vld [vmem:[#allocation2 + $0x58] sm:$0xff]  ;;  %v41_v1 = vld [vmem:[#allocation2 + $0x20] sm:$0xff] }
   0xe   :  { %v49_v6 = vld [vmem:[#allocation2 + $0x60] sm:$0xff]  ;;  %v42_v17 = vld [vmem:[#allocation2 + $0x28] sm:$0xff] }
   0xf   :  { %v50_v22 = vld [vmem:[#allocation2 + $0x68] sm:$0xff] }
  0x12   :  { %339 = vmatmul.mubr.msk.bf16.gmra.mxu0 %vm22_vm0, %v66_v13  ;;  %355 = vmatmul.mubr.msk.bf16.gmra.mxu1 %vm22_vm0, %v70_v14  ;;  %v267_v13 = vld [vmem:[%s607_s3 + $0x10] sm:$0xff] }
  0x13   :  { %342 = vmatprep.mubr.msk.bf16.mxu0 %vm371_vm1, %v370_v0  ;;  %358 = vmatprep.mubr.msk.bf16.mxu1 %vm371_vm1, %v370_v0  ;;  %v275_v14 = vld [vmem:[%s607_s3 + $0x50] sm:$0xff] }
  0x1a   :  { %343 = vmatmul.mubr.msk.bf16.gmra.mxu0 %vm22_vm0, %v67_v19  ;;  %359 = vmatmul.mubr.msk.bf16.gmra.mxu1 %vm22_vm0, %v71_v20 }
  0x1b   :  { %346 = vmatprep.mubr.msk.bf16.mxu0 %vm371_vm1, %v370_v0 }
  0x22   :  { %347 = vmatmul.mubr.msk.bf16.gmra.mxu0 %vm22_vm0, %v68_v23 }
  0xca   :  { %v144_v26 = vpop.f32.mrf.mxu0  ;;  %v176_v27 = vpop.f32.mrf.mxu1 }
  0xcb   :  { %v199_v28 = vadd.f32 %v144_v26, %v37_v24  ;;  %v207_v29 = vadd.f32 %v176_v27, %v45_v25 }
  0xcc   :  { %v336_v30 = vpop.f32.mrf.mxu0  ;;  %v352_v32 = vpop.f32.mrf.mxu1 }
  0xcd   :  { %213 = vst.msk [vmem:[#allocation2] sm:$0xff] %vm22_vm0, %v199_v28  ;;  %221 = vst.msk [vmem:[#allocation2 + $0x40] sm:$0xff] %vm22_vm0, %v207_v29  ;;  %v268_v29 = vld [vmem:[%s607_s3 + $0x18] sm:$0xff]  ;;  %v43_v32 = vld [vmem:[#allocation2 + $0x30] sm:$0xff] }
  0xce   :  { %v147_v34 = vpop.f32.mrf.mxu0  ;;  %v179_v35 = vpop.f32.mrf.mxu1 }
  0xcf   :  { %v200_v36 = vadd.f32 %v147_v34, %v38_v31  ;;  %v208_v37 = vadd.f32 %v179_v35, %v46_v33  ;;  %v276_v35 = vld [vmem:[%s607_s3 + $0x58] sm:$0xff] }
  0xd0   :  { %v337_v38 = vpop.f32.mrf.mxu0  ;;  %v353_v40 = vpop.f32.mrf.mxu1 }
  0xd1   :  { %214 = vst.msk [vmem:[#allocation2 + $0x8] sm:$0xff] %vm22_vm0, %v200_v36  ;;  %222 = vst.msk [vmem:[#allocation2 + $0x48] sm:$0xff] %vm22_vm0, %v208_v37 }
  0xd2   :  { %v152_v43 = vpop.f32.mrf.mxu0  ;;  %v184_v44 = vpop.f32.mrf.mxu1 }
  0xd3   :  { %v201_v47 = vadd.f32 %v152_v43, %v39_v39  ;;  %v209_v48 = vadd.f32 %v184_v44, %v47_v41  ;;  %v269_v44 = vld [vmem:[%s607_s3 + $0x20] sm:$0xff] }
  0xd4   :  { %v230_v50 = vld [vmem:[#allocation2] sm:$0xff]  ;;  %v340_v52 = vpop.f32.mrf.mxu0  ;;  %v356_v53 = vpop.f32.mrf.mxu1 }
  0xd5   :  { %v238_v51 = vld [vmem:[#allocation2 + $0x40] sm:$0xff]  ;;  %v251_v55 = vadd.f32 %v480_v42, %v230_v50  ;;  %215 = vst.msk [vmem:[#allocation2 + $0x10] sm:$0xff] %vm22_vm0, %v201_v47  ;;  %223 = vst.msk [vmem:[#allocation2 + $0x50] sm:$0xff] %vm22_vm0, %v209_v48 }
  0xd6   :  { %v259_v56 = vadd.f32 %v480_v42, %v238_v51  ;;  %v155_v57 = vpop.f32.mrf.mxu0  ;;  %v187_v58 = vpop.f32.mrf.mxu1 }
  0xd7   :  { %v279_v59 = vadd.f32 %v265_v45, %v251_v55  ;;  %v202_v63 = vadd.f32 %v155_v57, %v40_v49  ;;  %v210_v0 = vadd.f32 %v187_v58, %v48_v54  ;;  %v277_v49 = vld [vmem:[%s607_s3 + $0x60] sm:$0xff] }
  0xd8   :  { %v287_v60 = vadd.f32 %v273_v46, %v259_v56  ;;  %v231_v2 = vld [vmem:[#allocation2 + $0x8] sm:$0xff]  ;;  %v341_v4 = vpop.f32.mrf.mxu0  ;;  %v357_v5 = vpop.f32.mrf.mxu1  ;;  %v44_v46 = vld [vmem:[#allocation2 + $0x38] sm:$0xff] }
  0xd9   :  { %v239_v3 = vld [vmem:[#allocation2 + $0x48] sm:$0xff]  ;;  %293 = vst.msk [vmem:[%s608_s4] sm:$0xff] %vm22_vm0, %v279_v59  ;;  %v252_v7 = vadd.f32 %v480_v42, %v231_v2  ;;  %216 = vst.msk [vmem:[#allocation2 + $0x18] sm:$0xff] %vm22_vm0, %v202_v63 }
  0xda   :  { %301 = vst.msk [vmem:[%s608_s4 + $0x40] sm:$0xff] %vm22_vm0, %v287_v60  ;;  %v260_v8 = vadd.f32 %v480_v42, %v239_v3  ;;  %224 = vst.msk [vmem:[#allocation2 + $0x58] sm:$0xff] %vm22_vm0, %v210_v0  ;;  %v160_v9 = vpop.f32.mrf.mxu0  ;;  %v192_v10 = vpop.f32.mrf.mxu1  ;;  %v270_v56 = vld [vmem:[%s607_s3 + $0x28] sm:$0xff]  ;;  %v271_v3 = vld [vmem:[%s607_s3 + $0x30] sm:$0xff] }
  0xdb   :  { %v280_v11 = vadd.f32 %v266_v61, %v252_v7  ;;  %v203_v15 = vadd.f32 %v160_v9, %v41_v1  ;;  %v211_v16 = vadd.f32 %v192_v10, %v49_v6  ;;  %v278_v60 = vld [vmem:[%s607_s3 + $0x68] sm:$0xff]  ;;  %v272_v7 = vld [vmem:[%s607_s3 + $0x38] sm:$0xff] }
  0xdc   :  { %v288_v12 = vadd.f32 %v274_v62, %v260_v8  ;;  %v232_v18 = vld [vmem:[#allocation2 + $0x10] sm:$0xff]  ;;  %v344_v20 = vpop.f32.mrf.mxu0  ;;  %v360_v21 = vpop.f32.mrf.mxu1 }
  0xdd   :  { %v240_v19 = vld [vmem:[#allocation2 + $0x50] sm:$0xff]  ;;  %294 = vst.msk [vmem:[%s608_s4 + $0x8] sm:$0xff] %vm22_vm0, %v280_v11  ;;  %v253_v23 = vadd.f32 %v480_v42, %v232_v18  ;;  %217 = vst.msk [vmem:[#allocation2 + $0x20] sm:$0xff] %vm22_vm0, %v203_v15 }
  0xde   :  { %302 = vst.msk [vmem:[%s608_s4 + $0x48] sm:$0xff] %vm22_vm0, %v288_v12  ;;  %v261_v24 = vadd.f32 %v480_v42, %v240_v19  ;;  %225 = vst.msk [vmem:[#allocation2 + $0x60] sm:$0xff] %vm22_vm0, %v211_v16  ;;  %v163_v25 = vpop.f32.mrf.mxu0  ;;  %v195_v26 = vpop.f32.mrf.mxu1 }
  0xdf   :  { %v281_v27 = vadd.f32 %v267_v13, %v253_v23  ;;  %v204_v30 = vadd.f32 %v163_v25, %v42_v17  ;;  %v212_v31 = vadd.f32 %v195_v26, %v50_v22 }
  0xe0   :  { %v289_v28 = vadd.f32 %v275_v14, %v261_v24  ;;  %v233_v33 = vld [vmem:[#allocation2 + $0x18] sm:$0xff]  ;;  %v345_v36 = vpop.f32.mrf.mxu0  ;;  %v361_v37 = vpop.f32.mrf.mxu1 }
  0xe1   :  { %v241_v34 = vld [vmem:[#allocation2 + $0x58] sm:$0xff]  ;;  %295 = vst.msk [vmem:[%s608_s4 + $0x10] sm:$0xff] %vm22_vm0, %v281_v27  ;;  %v254_v38 = vadd.f32 %v480_v42, %v233_v33  ;;  %218 = vst.msk [vmem:[#allocation2 + $0x28] sm:$0xff] %vm22_vm0, %v204_v30 }
  0xe2   :  { %303 = vst.msk [vmem:[%s608_s4 + $0x50] sm:$0xff] %vm22_vm0, %v289_v28  ;;  %v262_v39 = vadd.f32 %v480_v42, %v241_v34  ;;  %226 = vst.msk [vmem:[#allocation2 + $0x68] sm:$0xff] %vm22_vm0, %v212_v31  ;;  %v168_v40 = vpop.f32.mrf.mxu0 }
  0xe3   :  { %v282_v41 = vadd.f32 %v268_v29, %v254_v38  ;;  %v205_v45 = vadd.f32 %v168_v40, %v43_v32 }
  0xe4   :  { %v290_v43 = vadd.f32 %v276_v35, %v262_v39  ;;  %v234_v47 = vld [vmem:[#allocation2 + $0x20] sm:$0xff]  ;;  %v348_v50 = vpop.f32.mrf.mxu0 }
  0xe5   :  { %v242_v48 = vld [vmem:[#allocation2 + $0x60] sm:$0xff]  ;;  %296 = vst.msk [vmem:[%s608_s4 + $0x18] sm:$0xff] %vm22_vm0, %v282_v41  ;;  %v255_v51 = vadd.f32 %v480_v42, %v234_v47  ;;  %219 = vst.msk [vmem:[#allocation2 + $0x30] sm:$0xff] %vm22_vm0, %v205_v45 }
  0xe6   :  { %304 = vst.msk [vmem:[%s608_s4 + $0x58] sm:$0xff] %vm22_vm0, %v290_v43  ;;  %v263_v52 = vadd.f32 %v480_v42, %v242_v48  ;;  %v171_v53 = vpop.f32.mrf.mxu0 }
  0xe7   :  { %v283_v54 = vadd.f32 %v269_v44, %v255_v51  ;;  %v206_v57 = vadd.f32 %v171_v53, %v44_v46 }
  0xe8   :  { %v291_v55 = vadd.f32 %v277_v49, %v263_v52  ;;  %v235_v58 = vld [vmem:[#allocation2 + $0x28] sm:$0xff]  ;;  %v349_v61 = vpop.f32.mrf.mxu0 }
  0xe9   :  { %v243_v59 = vld [vmem:[#allocation2 + $0x68] sm:$0xff]  ;;  %297 = vst.msk [vmem:[%s608_s4 + $0x20] sm:$0xff] %vm22_vm0, %v283_v54  ;;  %v256_v62 = vadd.f32 %v480_v42, %v235_v58  ;;  %220 = vst.msk [vmem:[#allocation2 + $0x38] sm:$0xff] %vm22_vm0, %v206_v57 }
  0xea   :  { %305 = vst.msk [vmem:[%s608_s4 + $0x60] sm:$0xff] %vm22_vm0, %v291_v55  ;;  %v264_v63 = vadd.f32 %v480_v42, %v243_v59 }
  0xeb   :  { %v284_v0 = vadd.f32 %v270_v56, %v256_v62 }
  0xec   :  { %v292_v1 = vadd.f32 %v278_v60, %v264_v63  ;;  %v236_v2 = vld [vmem:[#allocation2 + $0x30] sm:$0xff] }
  0xed   :  { %298 = vst.msk [vmem:[%s608_s4 + $0x28] sm:$0xff] %vm22_vm0, %v284_v0  ;;  %v257_v4 = vadd.f32 %v480_v42, %v236_v2 }
  0xee   :  { %306 = vst.msk [vmem:[%s608_s4 + $0x68] sm:$0xff] %vm22_vm0, %v292_v1 }
  0xef   :  { %v285_v5 = vadd.f32 %v271_v3, %v257_v4 }
  0xf0   :  { %v237_v6 = vld [vmem:[#allocation2 + $0x38] sm:$0xff] }
  0xf1   :  { %299 = vst.msk [vmem:[%s608_s4 + $0x30] sm:$0xff] %vm22_vm0, %v285_v5  ;;  %v258_v8 = vadd.f32 %v480_v42, %v237_v6 }
  0xf3   :  { %v286_v9 = vadd.f32 %v272_v7, %v258_v8 }
  0xf5   :  { %300 = vst.msk [vmem:[%s608_s4 + $0x38] sm:$0xff] %vm22_vm0, %v286_v9 }

// kernel: spacetimeformer_forward.43
= control target key start
LH: loop header
LB: loop body
LE: loop exit
PB: predicated region body
PF: predicated region fallthrough
CT: control target
= control target key end

     0   :  { %s914_s6 = smov 0   ;;  %s1130_s0 = inlined_call_operand.vmem [shape: f32[2,56,96], index: 0, kind: input, shape index: {}]   ;;  %s1131_s1 = inlined_call_operand.vmem [shape: f32[2,56,32], index: 1, kind: output, shape index: {}]  }
   0x1 LB: > { %s757_s7 = sadd.s32 4294967295, %s894_s6   ;;  %p761_p0 = scmp.ge.s32.totalorder %s894_s6, 1  ;;  %s894_s6 = sphi %s914_s6, %s11_s6  }
   0x2   : > { %p87_p1 = scmp.lt.s32.totalorder %s894_s6, 3 }
   0x4   : > { %p88_p2 = pnand %p761_p0, %p87_p1 }
   0x5   : > { %p107_p3 = scmp.lt.s32.totalorder (!%p88_p2), %s757_s7, 1  ;;  %s896_s12 = smov (!%p88_p2), 96  }
   0x6   : > { %91 = sbr.rel (%p88_p2) target bundleno = 980 (0x3d4), region = 24  ;;  %s897_s13 = smov (!%p88_p2), 64  }
   0x7   : > { %s899_s14 = smov (!%p88_p2), 80   ;;  %s901_s15 = smov (!%p88_p2), 48  }
   0x8   : > { %s902_s16 = smov (!%p88_p2), 112   ;;  %s903_s17 = smov (!%p88_p2), 16  }
   0xb   : > { %s1133_s7 = smov (!%p107_p3, %s757_s7), 1  ;;  %v898_v22 = vmov 0.0   ;;  %vm900_vm0 = vmmov 0   ;;  %vm558_vm1 = vcmask 523648   ;;  %vm191_vm2 = vcmask 1043456  }
   0xc   : > { %s842_s8 = smul.u32 56, %s1133_s7  ;;  %796 = vmatprep.subr.bf16.mxu0 %v898_v22  ;;  %804 = vmatprep.mubr.msk.bf16.mxu0 %vm900_vm0, %v898_v22  ;;  %vm187_vm3 = vcmask 457728   ;;  %vm314_vm4 = vcmask 392448   ;;  %vm237_vm5 = vcmask 130048   ;;  %vm694_vm6 = vcmask 261120  }
   0xe   : > { %s111_s11 = scalar_lea.vmem %s1130_s0, %s842_s8  ;;  %s1098_s20 = scalar_lea.vmem %s1131_s1, %s842_s8 }
   0xf   : > { %v118_v0 = vld [vmem:[%s111_s11] sm:$0xff]  ;;  %v119_v1 = vld [vmem:[%s111_s11 + $0x8] sm:$0xff]  ;;  %v120_v2 = vld [vmem:[%s111_s11 + $0x10] sm:$0xff] }
  0x10   : > { %v930_v3 = vmax.f32 %v118_v0, 0.0  ;;  %v932_v4 = vmax.f32 %v119_v1, 0.0  ;;  %v121_v5 = vld [vmem:[%s111_s11 + $0x18] sm:$0xff]  ;;  %v934_v6 = vmax.f32 %v120_v2, 0.0  ;;  %v122_v7 = vld [vmem:[%s111_s11 + $0x20] sm:$0xff]  ;;  %v123_v8 = vld [vmem:[%s111_s11 + $0x28] sm:$0xff]  ;;  %v136_v21 = vpack.c.bf16 %v119_v1, %v118_v0 }
  0x11   : > { %v936_v9 = vmax.f32 %v121_v5, 0.0  ;;  %v938_v10 = vmax.f32 %v122_v7, 0.0  ;;  %v940_v11 = vmax.f32 %v123_v8, 0.0  ;;  %v124_v12 = vld [vmem:[%s111_s11 + $0x30] sm:$0xff]  ;;  %v138_v19 = vpack.c.bf16 %v123_v8, %v122_v7 }
  0x12   : > { %v944_v13 = vpack.c.bf16 %v932_v4, %v930_v3  ;;  %v946_v14 = vmax.f32 %v124_v12, 0.0  ;;  %v139_v18 = vpack.c.bf16 %v124_v12, %v124_v12  ;;  %v137_v20 = vpack.c.bf16 %v121_v5, %v120_v2 }
  0x13   : > { %v950_v15 = vpack.c.bf16 %v940_v11, %v938_v10  ;;  %v956_v16 = vpack.c.bf16 %v936_v9, %v934_v6  ;;  %v559_v23 = vsel %vm558_vm1, %v930_v3, 0.0  ;;  %v560_v24 = vsel %vm558_vm1, %v932_v4, 0.0 }
  0x14   : > { %144 = vrot.lane.b32.xlu0 %v944_v13, %s896_s12  ;;  %v962_v17 = vpack.c.bf16 %v946_v14, %v946_v14  ;;  %v561_v25 = vadd.f32 %v560_v24, %v559_v23  ;;  %v562_v26 = vsel %vm558_vm1, %v934_v6, 0.0  ;;  %v564_v28 = vsel %vm558_vm1, %v936_v9, 0.0  ;;  %810 = vmatprep.mubr.msk.bf16.mxu1 %vm237_vm5, %v944_v13 }
  0x15   : > { %148 = vrot.lane.b32.xlu1 %v950_v15, %s896_s12  ;;  %v566_v30 = vsel %vm558_vm1, %v938_v10, 0.0  ;;  %v568_v34 = vsel %vm558_vm1, %v940_v11, 0.0  ;;  %v570_v38 = vsel %vm558_vm1, %v946_v14, 0.0  ;;  %v315_v56 = vsel %vm314_vm4, %v930_v3, 0.0 }
  0x16   : > { %v563_v27 = vadd.f32 %v562_v26, %v561_v25  ;;  %v316_v57 = vsel %vm314_vm4, %v932_v4, 0.0  ;;  %v318_v59 = vsel %vm314_vm4, %v934_v6, 0.0  ;;  %v320_v61 = vsel %vm314_vm4, %v936_v9, 0.0 }
  0x17   : > { %v317_v58 = vadd.f32 %v316_v57, %v315_v56  ;;  %v322_v0 = vsel %vm314_vm4, %v938_v10, 0.0  ;;  %v324_v5 = vsel %vm314_vm4, %v940_v11, 0.0  ;;  %v326_v12 = vsel %vm314_vm4, %v946_v14, 0.0 }
  0x18   : > { %146 = vrot.lane.b32.xlu0 %v956_v16, %s896_s12  ;;  %v565_v29 = vadd.f32 %v564_v28, %v563_v27 }
  0x19   : > { %150 = vrot.lane.b32.xlu1 %v962_v17, %s896_s12  ;;  %v319_v60 = vadd.f32 %v318_v59, %v317_v58 }
  0x1a   : > { %v567_v33 = vadd.f32 %v566_v30, %v565_v29 }
  0x1b   : > { %v321_v62 = vadd.f32 %v320_v61, %v319_v60 }
  0x1c   : > { %182 = vrot.lane.b32.xlu0 %v139_v18, %s897_s13  ;;  %v569_v36 = vadd.f32 %v568_v34, %v567_v33 }
  0x1d   : > { %180 = vrot.lane.b32.xlu1 %v138_v19, %s897_s13  ;;  %v323_v1 = vadd.f32 %v322_v0, %v321_v62 }
  0x1e   : > { %v571_v41 = vadd.f32 %v570_v38, %v569_v36 }
  0x1f   : > { %v325_v7 = vadd.f32 %v324_v5, %v323_v1 }
  0x20   : > { %178 = vrot.lane.b32.xlu0 %v137_v20, %s897_s13  ;;  %v572_v43 = vrot.slane %v571_v41, 4 }
  0x21   : > { %176 = vrot.lane.b32.xlu1 %v136_v21, %s897_s13 }
  0x22   : > { %v573_v45 = vadd.f32 %v572_v43, %v571_v41 }
  0x24   : > { %v574_v47 = vrot.slane %v573_v45, 2 }
  0x25   : > { %387 = vrot.lane.b32.xlu1 %v944_v13, %s899_s14 }
  0x26   : > { %v575_v48 = vadd.f32 %v574_v47, %v573_v45 }
  0x28   : > { %v576_v50 = vrot.slane %v575_v48, 1 }
  0x29   : > { %389 = vrot.lane.b32.xlu1 %v956_v16, %s899_s14 }
  0x2a   : > { %v577_v52 = vadd.f32 %v576_v50, %v575_v48 }
  0x2d   : > { %391 = vrot.lane.b32.xlu1 %v950_v15, %s899_s14 }
  0x31   : > { %393 = vrot.lane.b32.xlu1 %v962_v17, %s899_s14 }
  0x35   : > { %421 = vrot.lane.b32.xlu1 %v139_v18, %s901_s15  ;;  %v327_v18 = vadd.f32 %v326_v12, %v325_v7 }
  0x39   : > { %419 = vrot.lane.b32.xlu1 %v138_v19, %s901_s15 }
  0x3d   : > { %417 = vrot.lane.b32.xlu1 %v137_v20, %s901_s15  ;;  %v328_v20 = vrot.slane %v327_v18, 4 }
  0x3f   : > { %v329_v26 = vadd.f32 %v328_v20, %v327_v18 }
  0x41   : > { %415 = vrot.lane.b32.xlu1 %v136_v21, %s901_s15  ;;  %v330_v29 = vrot.slane %v329_v26, 2 }
  0x86   : > { %v145_v31 = vpop.permute.xlu0 %144 }
  0x87   : > { %156 = vxpose.xlu0.c.b16.start [1/4] (short) (narrow) %v145_v31, 16  ;;  %v149_v32 = vpop.permute.xlu1 %148  ;;  %v331_v31 = vadd.f32 %v330_v29, %v329_v26 }
  0x89   : > { %v332_v33 = vrot.slane %v331_v31, 1 }
  0x8a   : > { %v147_v35 = vpop.permute.xlu0 %146 }
  0x8b   : > { %157 = vxpose.xlu0.c.b16.cont [2/4] (short) (narrow) %v147_v35, 16  ;;  %v151_v37 = vpop.permute.xlu1 %150  ;;  %v333_v34 = vadd.f32 %v332_v33, %v331_v31 }
  0x8e   : > { %v183_v39 = vpop.permute.xlu0 %182 }
  0x8f   : > { %158 = vxpose.xlu0.c.b16.cont [3/4] (short) (narrow) %v149_v32, 16  ;;  %v193_v40 = vsel %vm191_vm2, %v183_v39, 0  ;;  %v181_v42 = vpop.permute.xlu1 %180 }
  0x90   : > { %797 = vmatpush3.bf16.msra.mxu0 %v193_v40 }
  0x91   : > { %798 = vmatprep.subr.bf16.mxu0 %v898_v22 }
  0x92   : > { %v179_v44 = vpop.permute.xlu0 %178 }
  0x93   : > { %159 = vxpose.xlu0.c.b16.end [4/4] (short) (narrow) %v151_v37, 16  ;;  %v177_v46 = vpop.permute.xlu1 %176 }
  0x94   : > { %799 = vmatpush3.bf16.msra.mxu0 %v181_v42 }
  0x95   : > { %800 = vmatprep.subr.bf16.mxu0 %v898_v22 }
  0x97   : > { %v388_v49 = vpop.permute.xlu1 %387 }
  0x98   : > { %801 = vmatpush3.bf16.msra.mxu0 %v179_v44  ;;  %399 = vxpose.xlu1.c.b16.start [1/4] (short) (narrow) %v388_v49, 16 }
  0x99   : > { %802 = vmatprep.subr.bf16.mxu0 %v898_v22 }
  0x9b   : > { %v390_v51 = vpop.permute.xlu1 %389 }
  0x9c   : > { %474 = vrot.lane.b32.xlu0 %v944_v13, %s902_s16  ;;  %803 = vmatpush3.bf16.msra.mxu0 %v177_v46 }
  0x9d   : > { %400 = vxpose.xlu1.c.b16.cont [2/4] (short) (narrow) %v390_v51, 16 }
  0x9f   : > { %v392_v53 = vpop.permute.xlu1 %391 }
  0xa0   : > { %478 = vrot.lane.b32.xlu0 %v950_v15, %s902_s16 }
  0xa1   : > { %401 = vxpose.xlu1.c.b16.cont [3/4] (short) (narrow) %v392_v53, 16 }
  0xa3   : > { %v394_v54 = vpop.permute.xlu1 %393 }
  0xa4   : > { %476 = vrot.lane.b32.xlu0 %v956_v16, %s902_s16 }
  0xa5   : > { %402 = vxpose.xlu1.c.b16.end [4/4] (short) (narrow) %v394_v54, 16 }
  0xa7   : > { %v422_v35 = vpop.permute.xlu1 %421 }
  0xa8   : > { %480 = vrot.lane.b32.xlu0 %v962_v17, %s902_s16 }
  0xab   : > { %v420_v36 = vpop.permute.xlu1 %419 }
  0xac   : > { %579 = vrot.lane.b32.xlu0 %v577_v52, %s896_s12 }
  0xaf   : > { %v418_v37 = vpop.permute.xlu1 %417 }
  0xb3   : > { %v1034_v38 = vpop.permute.xlu1 %415 }
  0xe9   : > { %v164_v55 = vpop.trf.xlu0 }
  0xea   : > { %805 = vmatmul.mubr.msk.bf16.vlgmr.msra.gmra.mxu0 %vm187_vm3, %v164_v55 }
  0xfb   : > { %v407_v41 = vpop.trf.xlu1 }
 0x10e   : > { %v475_v63 = vpop.permute.xlu0 %474 }
 0x10f   : > { %832 = vmatprep.mubr.msk.bf16.mxu0 %vm237_vm5, %v475_v63 }
 0x112   : > { %v1008_v2 = vpop.permute.xlu0 %478 }
 0x116   : > { %v1011_v8 = vpop.permute.xlu0 %476 }
 0x11a   : > { %v1014_v19 = vpop.permute.xlu0 %480 }
 0x11e   : > { %v580_v21 = vpop.permute.xlu0 %579 }
 0x11f   : > { %v582_v23 = vmul.f32 %v580_v21, %v930_v3  ;;  %v586_v24 = vmul.f32 %v580_v21, %v938_v10  ;;  %v583_v25 = vmul.f32 %v580_v21, %v932_v4  ;;  %v588_v27 = vmul.f32 %v580_v21, %v946_v14 }
 0x120   : > { %v584_v28 = vmul.f32 %v580_v21, %v934_v6  ;;  %v585_v30 = vmul.f32 %v580_v21, %v936_v9  ;;  %v587_v32 = vmul.f32 %v580_v21, %v940_v11 }
 0x121   : > { %596 = vrot.lane.b32.xlu0 %v582_v23, %s902_s16  ;;  %604 = vrot.lane.b32.xlu1 %v586_v24, %s902_s16 }
 0x125   : > { %598 = vrot.lane.b32.xlu0 %v583_v25, %s902_s16  ;;  %608 = vrot.lane.b32.xlu1 %v588_v27, %s902_s16 }
 0x129   : > { %600 = vrot.lane.b32.xlu0 %v584_v28, %s902_s16 }
 0x12d   : > { %602 = vrot.lane.b32.xlu0 %v585_v30, %s902_s16 }
 0x131   : > { %606 = vrot.lane.b32.xlu0 %v587_v32, %s902_s16 }
 0x135   : > { %335 = vrot.lane.b32.xlu0 %v333_v34, %s896_s12 }
 0x193   : > { %v597_v39 = vpop.permute.xlu0 %596  ;;  %v605_v44 = vpop.permute.xlu1 %604 }
 0x194   : > { %v617_v40 = vsel %vm237_vm5, %v597_v39, 0.0  ;;  %v629_v46 = vsel %vm237_vm5, %v605_v44, 0.0 }
 0x195   : > { %618 = vadd.xlane.f32.xlu1 %v617_v40 }
 0x197   : > { %v599_v42 = vpop.permute.xlu0 %598  ;;  %v609_v48 = vpop.permute.xlu1 %608 }
 0x198   : > { %v620_v43 = vsel %vm237_vm5, %v599_v42, 0.0  ;;  %v635_v50 = vsel %vm237_vm5, %v609_v48, 0.0 }
 0x199   : > { %621 = vadd.xlane.f32.xlu0 %v620_v43 }
 0x19b   : > { %v601_v13 = vpop.permute.xlu0 %600 }
 0x19c   : > { %v623_v45 = vsel %vm237_vm5, %v601_v13, 0.0 }
 0x19d   : > { %624 = vadd.xlane.f32.xlu0 %v623_v45 }
 0x19f   : > { %v603_v47 = vpop.permute.xlu0 %602 }
 0x1a0   : > { %v626_v49 = vsel %vm237_vm5, %v603_v47, 0.0 }
 0x1a1   : > { %627 = vadd.xlane.f32.xlu1 %v626_v49  ;;  %630 = vadd.xlane.f32.xlu0 %v629_v46 }
 0x1a3   : > { %v607_v51 = vpop.permute.xlu0 %606 }
 0x1a4   : > { %v632_v52 = vsel %vm237_vm5, %v607_v51, 0.0 }
 0x1a5   : > { %633 = vadd.xlane.f32.xlu1 %v632_v52  ;;  %636 = vadd.xlane.f32.xlu0 %v635_v50 }
 0x1a7   : > { %v336_v53 = vpop.permute.xlu0 %335 }
 0x1a8   : > { %v338_v54 = vmul.f32 %v336_v53, %v930_v3  ;;  %v339_v55 = vmul.f32 %v336_v53, %v932_v4  ;;  %v340_v56 = vmul.f32 %v336_v53, %v934_v6  ;;  %v341_v57 = vmul.f32 %v336_v53, %v936_v9 }
 0x1a9   : > { %v342_v3 = vmul.f32 %v336_v53, %v938_v10  ;;  %v343_v4 = vmul.f32 %v336_v53, %v940_v11  ;;  %v344_v5 = vmul.f32 %v336_v53, %v946_v14  ;;  %v430_v11 = vsel %vm191_vm2, %v422_v35, 0 }
 0x1aa   : > { %v229_v58 = vpop.f32.mrf.mxu0  ;;  %v345_v59 = vsel %vm237_vm5, %v338_v54, 0.0  ;;  %v348_v60 = vsel %vm237_vm5, %v339_v55, 0.0  ;;  %v351_v62 = vsel %vm237_vm5, %v340_v56, 0.0  ;;  %v354_v63 = vsel %vm237_vm5, %v341_v57, 0.0 }
 0x1ab   : > { %346 = vadd.xlane.f32.xlu1 %v345_v59  ;;  %349 = vadd.xlane.f32.xlu0 %v348_v60  ;;  %v357_v1 = vsel %vm237_vm5, %v342_v3, 0.0  ;;  %v360_v7 = vsel %vm237_vm5, %v343_v4, 0.0  ;;  %v363_v10 = vsel %vm237_vm5, %v344_v5, 0.0 }
 0x1ac   : > { %v806_v61 = vpop.f32.mrf.mxu0 }
 0x1ae   : > { %v232_v0 = vpop.f32.mrf.mxu0 }
 0x1af   : > { %v236_v6 = vpack.c.bf16 %v232_v0, %v229_v58  ;;  %352 = vadd.xlane.f32.xlu1 %v351_v62  ;;  %355 = vadd.xlane.f32.xlu0 %v354_v63 }
 0x1b0   : > { %v807_v9 = vpop.f32.mrf.mxu0 }
 0x1b1   : > { %808 = vmatprep.subr.bf16.mxu1 %v236_v6 }
 0x1b2   : > { %809 = vmatpush3.bf16.msra.mxu1 %v236_v6 }
 0x1b3   : > { %818 = vmatprep.subr.bf16.mxu1 %v898_v22  ;;  %358 = vadd.xlane.f32.xlu1 %v357_v1 }
 0x1b4   : > { %361 = vadd.xlane.f32.xlu0 %v360_v7 }
 0x1b5   : > { %811 = vmatmul.mubr.msk.bf16.vlgmr.msra.gmra.mxu1 %vm237_vm5, %v956_v16 }
 0x1b6   : > { %819 = vmatpush3.bf16.msra.mxu1 %v430_v11  ;;  %814 = vmatprep.mubr.msk.bf16.mxu1 %vm237_vm5, %v950_v15 }
 0x1b7   : > { %820 = vmatprep.subr.bf16.mxu1 %v898_v22  ;;  %364 = vadd.xlane.f32.xlu1 %v363_v10 }
 0x1ba   : > { %821 = vmatpush3.bf16.msra.mxu1 %v420_v36 }
 0x1bb   : > { %822 = vmatprep.subr.bf16.mxu1 %v898_v22 }
 0x1bd   : > { %815 = vmatmul.mubr.msk.bf16.gmra.mxu1 %vm237_vm5, %v962_v17 }
 0x1be   : > { %823 = vmatpush3.bf16.msra.mxu1 %v418_v37  ;;  %826 = vmatprep.mubr.msk.bf16.mxu1 %vm900_vm0, %v898_v22 }
 0x1bf   : > { %824 = vmatprep.subr.bf16.mxu1 %v898_v22 }
 0x1c2   : > { %825 = vmatpush3.bf16.msra.mxu1 %v1034_v38 }
 0x1c5   : > { %827 = vmatmul.mubr.msk.bf16.vlgmr.msra.gmra.mxu1 %vm187_vm3, %v407_v41 }
 0x1c6   : > { %836 = vmatprep.mubr.msk.bf16.mxu1 %vm237_vm5, %v1008_v2 }
 0x21e   : > { %v619_v27 = vpop.xlane.xlu1 %618 }
 0x21f   : > { %v638_v30 = vadd.f32 1e-06, %v619_v27 }
 0x222   : > { %v622_v26 = vpop.xlane.xlu0 %621 }
 0x223   : > { %v639_v35 = vadd.f32 1e-06, %v622_v26 }
 0x226   : > { %v625_v28 = vpop.xlane.xlu0 %624 }
 0x227   : > { %v640_v29 = vadd.f32 1e-06, %v625_v28 }
 0x229   : > { %860 = vrcp.f32 %v640_v29 }
 0x22a   : > { %v628_v31 = vpop.xlane.xlu1 %627  ;;  %v631_v32 = vpop.xlane.xlu0 %630  ;;  %862 = vrcp.f32 %v638_v30 }
 0x22b   : > { %v642_v33 = vadd.f32 1e-06, %v631_v32  ;;  %v641_v34 = vadd.f32 1e-06, %v628_v31 }
 0x22d   : > { %864 = vrcp.f32 %v642_v33 }
 0x22e   : > { %v634_v36 = vpop.xlane.xlu1 %633  ;;  %866 = vrcp.f32 %v641_v34 }
 0x22f   : > { %v643_v37 = vadd.f32 1e-06, %v634_v36  ;;  %868 = vrcp.f32 %v639_v35 }
 0x231   : > { %870 = vrcp.f32 %v643_v37 }
 0x234   : > { %v347_v59 = vpop.xlane.xlu1 %346 }
 0x235   : > { %v366_v63 = vadd.f32 1e-06, %v347_v59 }
 0x238   : > { %v353_v60 = vpop.xlane.xlu1 %352 }
 0x239   : > { %v368_v62 = vadd.f32 1e-06, %v353_v60 }
 0x23c   : > { %v359_v3 = vpop.xlane.xlu1 %358 }
 0x23d   : > { %v370_v0 = vadd.f32 1e-06, %v359_v3 }
 0x240   : > { %v365_v5 = vpop.xlane.xlu1 %364 }
 0x241   : > { %v372_v10 = vadd.f32 1e-06, %v365_v5 }
 0x275   : > { %v1074_v14 = vpop.f32.mrf.mxu1 }
 0x277   : > { %v1076_v15 = vpop.f32.mrf.mxu1 }
 0x279   : > { %v1078_v16 = vpop.f32.mrf.mxu1 }
 0x27b   : > { %v1080_v17 = vpop.f32.mrf.mxu1 }
 0x27d   : > { %v1082_v12 = vpop.f32.mrf.mxu1 }
 0x27f   : > { %v1084_v18 = vpop.f32.mrf.mxu1 }
 0x281   : > { %v817_v22 = vpop.f32.mrf.mxu1 }
 0x283   : > { %v1086_v20 = vpop.f32.mrf.mxu1 }
 0x285   : > { %v466_v21 = vpop.f32.mrf.mxu1 }
 0x287   : > { %v828_v23 = vpop.f32.mrf.mxu1 }
 0x289   : > { %v469_v24 = vpop.f32.mrf.mxu1 }
 0x28a   : > { %v473_v25 = vpack.c.bf16 %v469_v24, %v466_v21 }
 0x28b   : > { %v829_v2 = vpop.f32.mrf.mxu1 }
 0x28c   : > { %830 = vmatprep.subr.bf16.mxu0 %v473_v25  ;;  %840 = vmatprep.subr.bf16.mxu1 %v473_v25 }
 0x28d   : > { %831 = vmatpush3.bf16.msra.mxu0 %v473_v25  ;;  %841 = vmatpush3.bf16.msra.mxu1 %v473_v25 }
 0x290   : > { %833 = vmatmul.mubr.msk.bf16.vlgmr.msra.gmra.mxu0 %vm237_vm5, %v1011_v8  ;;  %837 = vmatmul.mubr.msk.bf16.vlgmr.msra.gmra.mxu1 %vm237_vm5, %v1014_v19  ;;  %v637_v8 = vpop.xlane.xlu0 %636  ;;  %v861_v19 = vpop.eup %860 }
 0x291   : > { %v644_v38 = vadd.f32 1e-06, %v637_v8  ;;  %v863_v42 = vpop.eup %862 }
 0x292   : > { %v865_v45 = vpop.eup %864 }
 0x293   : > { %872 = vrcp.f32 %v644_v38  ;;  %v867_v49 = vpop.eup %866 }
 0x294   : > { %v869_v52 = vpop.eup %868  ;;  %v350_v61 = vpop.xlane.xlu0 %349  ;;  %874 = vrcp.f32 %v368_v62 }
 0x295   : > { %v871_v55 = vpop.eup %870  ;;  %876 = vrcp.f32 %v366_v63  ;;  %v367_v1 = vadd.f32 1e-06, %v350_v61 }
 0x296   : > { %878 = vrcp.f32 %v370_v0 }
 0x298   : > { %v356_v4 = vpop.xlane.xlu0 %355 }
 0x299   : > { %v369_v6 = vadd.f32 1e-06, %v356_v4 }
 0x29b   : > { %880 = vrcp.f32 %v369_v6 }
 0x29c   : > { %v362_v9 = vpop.xlane.xlu0 %361  ;;  %882 = vrcp.f32 %v367_v1 }
 0x29d   : > { %v371_v7 = vadd.f32 1e-06, %v362_v9 }
 0x29f   : > { %884 = vrcp.f32 %v371_v7 }
 0x2a0   : > { %v873_v57 = vpop.eup %872  ;;  %886 = vrcp.f32 %v372_v10 }
 0x2a1   : > { %v875_v11 = vpop.eup %874 }
 0x2a2   : > { %v877_v22 = vpop.eup %876  ;;  %v378_v21 = vmul.f32 %v875_v11, %v1074_v14 }
 0x2a3   : > { %v879_v23 = vpop.eup %878  ;;  %v374_v25 = vmul.f32 %v877_v22, %v1076_v15 }
 0x2a4   : > { %v382_v27 = vmul.f32 %v879_v23, %v1084_v18 }
 0x2a8   : > { %v881_v26 = vpop.eup %880 }
 0x2a9   : > { %v883_v29 = vpop.eup %882  ;;  %v380_v31 = vmul.f32 %v881_v26, %v1078_v16 }
 0x2aa   : > { %v376_v34 = vmul.f32 %v883_v29, %v1080_v17 }
 0x2ac   : > { %v885_v32 = vpop.eup %884 }
 0x2ad   : > { %v887_v35 = vpop.eup %886  ;;  %v384_v37 = vmul.f32 %v885_v32, %v1086_v20 }
 0x2ae   : > { %v386_v38 = vmul.f32 %v887_v35, %v1082_v12 }
 0x350   : > { %v834_v39 = vpop.f32.mrf.mxu0  ;;  %v838_v40 = vpop.f32.mrf.mxu1 }
 0x351   : > { %v650_v41 = vmul.f32 %v861_v19, %v834_v39  ;;  %v658_v58 = vmul.f32 %v873_v57, %v838_v40 }
 0x352   : > { %v528_v43 = vpop.f32.mrf.mxu0  ;;  %v544_v44 = vpop.f32.mrf.mxu1 }
 0x353   : > { %v646_v13 = vmul.f32 %v863_v42, %v528_v43  ;;  %670 = vrot.lane.b32.xlu1 %v650_v41, %s903_s17  ;;  %v654_v48 = vmul.f32 %v865_v45, %v544_v44 }
 0x354   : > { %v835_v46 = vpop.f32.mrf.mxu0  ;;  %v839_v47 = vpop.f32.mrf.mxu1 }
 0x355   : > { %666 = vrot.lane.b32.xlu0 %v646_v13, %s903_s17  ;;  %v652_v51 = vmul.f32 %v867_v49, %v835_v46 }
 0x356   : > { %v531_v50 = vpop.f32.mrf.mxu0  ;;  %v547_v53 = vpop.f32.mrf.mxu1 }
 0x357   : > { %674 = vrot.lane.b32.xlu1 %v654_v48, %s903_s17  ;;  %v648_v54 = vmul.f32 %v869_v52, %v531_v50  ;;  %v656_v56 = vmul.f32 %v871_v55, %v547_v53 }
 0x359   : > { %672 = vrot.lane.b32.xlu0 %v652_v51, %s903_s17 }
 0x35b   : > { %668 = vrot.lane.b32.xlu1 %v648_v54, %s903_s17 }
 0x35d   : > { %676 = vrot.lane.b32.xlu0 %v656_v56, %s903_s17 }
 0x35f   : > { %678 = vrot.lane.b32.xlu1 %v658_v58, %s903_s17 }
 0x3c5   : > { %v671_v24 = vpop.permute.xlu1 %670 }
 0x3c6   : > { %v689_v2 = vsel %vm237_vm5, %v378_v21, %v671_v24 }
 0x3c7   : > { %697 = vst.msk [vmem:[%s1098_s20 + $0x10] sm:$0xff] %vm694_vm6, %v689_v2  ;;  %v667_v14 = vpop.permute.xlu0 %666 }
 0x3c8   : > { %v687_v28 = vsel %vm237_vm5, %v374_v25, %v667_v14 }
 0x3c9   : > { %695 = vst.msk [vmem:[%s1098_s20] sm:$0xff] %vm694_vm6, %v687_v28  ;;  %v675_v30 = vpop.permute.xlu1 %674 }
 0x3ca   : > { %v691_v15 = vsel %vm237_vm5, %v382_v27, %v675_v30 }
 0x3cb   : > { %699 = vst.msk [vmem:[%s1098_s20 + $0x20] sm:$0xff] %vm694_vm6, %v691_v15  ;;  %v673_v33 = vpop.permute.xlu0 %672 }
 0x3cc   : > { %v690_v18 = vsel %vm237_vm5, %v380_v31, %v673_v33 }
 0x3cd   : > { %698 = vst.msk [vmem:[%s1098_s20 + $0x18] sm:$0xff] %vm694_vm6, %v690_v18  ;;  %v669_v36 = vpop.permute.xlu1 %668 }
 0x3ce   : > { %v688_v16 = vsel %vm237_vm5, %v376_v34, %v669_v36 }
 0x3cf   : > { %696 = vst.msk [vmem:[%s1098_s20 + $0x8] sm:$0xff] %vm694_vm6, %v688_v16  ;;  %v677_v8 = vpop.permute.xlu0 %676 }
 0x3d0   : > { %v692_v19 = vsel %vm237_vm5, %v384_v37, %v677_v8 }
 0x3d1   : > { %700 = vst.msk [vmem:[%s1098_s20 + $0x28] sm:$0xff] %vm694_vm6, %v692_v19  ;;  %v679_v17 = vpop.permute.xlu1 %678 }
 0x3d2   : > { %v693_v39 = vsel %vm237_vm5, %v386_v38, %v679_v17 }
 0x3d3   : > { %701 = vst.msk [vmem:[%s1098_s20 + $0x30] sm:$0xff] %vm694_vm6, %v693_v39 }
 0x3d4 PF: > { %s11_s6 = sadd.s32 1, %s894_s6  }
 0x3d5   : > { %p8_p4 = scmp.ge.s32.totalorder %s11_s6, 4  }
 0x3d7   :  { %10 = sbr.rel (!%p8_p4) target bundleno = 1 (0x1), region = 54 }

// kernel: spacetimeformer_forward.45
= control target key start
LH: loop header
LB: loop body
LE: loop exit
PB: predicated region body
PF: predicated region fallthrough
CT: control target
= control target key end

     0   :  { %vm28_vm0 = vcmask 261120   ;;  %s580_s0 = inlined_call_operand.vmem [shape: f32[112,32], index: 0, kind: input, shape index: {}]   ;;  %s581_s1 = inlined_call_operand.vmem [shape: f32[1,32], index: 1, kind: input, shape index: {}]   ;;  %s582_s2 = inlined_call_operand.vmem [shape: f32[1,32], index: 2, kind: input, shape index: {}]   ;;  %s583_s3 = inlined_call_operand.vmem [shape: f32[112,32], index: 3, kind: output, shape index: {}]  }
   0x1   :  { %v14_v0 = vld [vmem:[%s580_s0] sm:$0xff]  ;;  %v16_v1 = vld [vmem:[%s580_s0 + $0x10] sm:$0xff]  ;;  %v15_v2 = vld [vmem:[%s580_s0 + $0x8] sm:$0xff] }
   0x2   :  { %v29_v3 = vsel %vm28_vm0, %v14_v0, 0.0  ;;  %v35_v4 = vsel %vm28_vm0, %v16_v1, 0.0  ;;  %v17_v5 = vld [vmem:[%s580_s0 + $0x18] sm:$0xff]  ;;  %v32_v6 = vsel %vm28_vm0, %v15_v2, 0.0  ;;  %v18_v8 = vld [vmem:[%s580_s0 + $0x20] sm:$0xff]  ;;  %v19_v9 = vld [vmem:[%s580_s0 + $0x28] sm:$0xff] }
   0x3   :  { %30 = vadd.xlane.f32.xlu0 %v29_v3  ;;  %36 = vadd.xlane.f32.xlu1 %v35_v4  ;;  %v38_v7 = vsel %vm28_vm0, %v17_v5, 0.0  ;;  %v41_v10 = vsel %vm28_vm0, %v18_v8, 0.0  ;;  %v44_v11 = vsel %vm28_vm0, %v19_v9, 0.0  ;;  %v20_v12 = vld [vmem:[%s580_s0 + $0x30] sm:$0xff]  ;;  %v21_v13 = vld [vmem:[%s580_s0 + $0x38] sm:$0xff]  ;;  %v357_v16 = vld [vmem:[%s580_s0 + $0x40] sm:$0xff] }
   0x4   :  { %v47_v14 = vsel %vm28_vm0, %v20_v12, 0.0  ;;  %v50_v15 = vsel %vm28_vm0, %v21_v13, 0.0  ;;  %v362_v17 = vld [vmem:[%s580_s0 + $0x48] sm:$0xff]  ;;  %v53_v18 = vsel %vm28_vm0, %v357_v16, 0.0  ;;  %v371_v20 = vld [vmem:[%s580_s0 + $0x50] sm:$0xff]  ;;  %v376_v21 = vld [vmem:[%s580_s0 + $0x58] sm:$0xff] }
   0x5   :  { %v56_v19 = vsel %vm28_vm0, %v362_v17, 0.0  ;;  %v59_v22 = vsel %vm28_vm0, %v371_v20, 0.0  ;;  %v62_v23 = vsel %vm28_vm0, %v376_v21, 0.0  ;;  %v385_v24 = vld [vmem:[%s580_s0 + $0x60] sm:$0xff]  ;;  %v390_v25 = vld [vmem:[%s580_s0 + $0x68] sm:$0xff] }
   0x6   :  { %v65_v26 = vsel %vm28_vm0, %v385_v24, 0.0  ;;  %v68_v27 = vsel %vm28_vm0, %v390_v25, 0.0 }
   0x7   :  { %33 = vadd.xlane.f32.xlu0 %v32_v6  ;;  %39 = vadd.xlane.f32.xlu1 %v38_v7 }
   0xb   :  { %42 = vadd.xlane.f32.xlu0 %v41_v10  ;;  %45 = vadd.xlane.f32.xlu1 %v44_v11 }
   0xf   :  { %48 = vadd.xlane.f32.xlu0 %v47_v14  ;;  %51 = vadd.xlane.f32.xlu1 %v50_v15 }
  0x13   :  { %54 = vadd.xlane.f32.xlu0 %v53_v18  ;;  %57 = vadd.xlane.f32.xlu1 %v56_v19 }
  0x17   :  { %60 = vadd.xlane.f32.xlu0 %v59_v22  ;;  %63 = vadd.xlane.f32.xlu1 %v62_v23 }
  0x1b   :  { %66 = vadd.xlane.f32.xlu0 %v65_v26  ;;  %69 = vadd.xlane.f32.xlu1 %v68_v27 }
  0x8c   :  { %v31_v28 = vpop.xlane.xlu0 %30  ;;  %v37_v29 = vpop.xlane.xlu1 %36 }
  0x8d   :  { %v72_v30 = vmul.f32 0.03125, %v31_v28  ;;  %v74_v31 = vmul.f32 0.03125, %v37_v29 }
  0x8f   :  { %v396_v32 = vsub.f32 %v14_v0, %v72_v30  ;;  %v398_v33 = vsub.f32 %v16_v1, %v74_v31 }
  0x90   :  { %v34_v34 = vpop.xlane.xlu0 %33  ;;  %v40_v35 = vpop.xlane.xlu1 %39 }
  0x91   :  { %v73_v36 = vmul.f32 0.03125, %v34_v34  ;;  %v75_v37 = vmul.f32 0.03125, %v40_v35  ;;  %v100_v38 = vmul.f32 %v396_v32, %v396_v32  ;;  %v102_v39 = vmul.f32 %v398_v33, %v398_v33 }
  0x93   :  { %v404_v40 = vsub.f32 %v15_v2, %v73_v36  ;;  %v406_v41 = vsub.f32 %v17_v5, %v75_v37  ;;  %v114_v42 = vsel %vm28_vm0, %v100_v38, 0.0  ;;  %v120_v45 = vsel %vm28_vm0, %v102_v39, 0.0 }
  0x94   :  { %115 = vadd.xlane.f32.xlu0 %v114_v42  ;;  %v43_v43 = vpop.xlane.xlu0 %42  ;;  %v46_v44 = vpop.xlane.xlu1 %45 }
  0x95   :  { %v76_v46 = vmul.f32 0.03125, %v43_v43  ;;  %v77_v47 = vmul.f32 0.03125, %v46_v44  ;;  %v101_v48 = vmul.f32 %v404_v40, %v404_v40  ;;  %v103_v49 = vmul.f32 %v406_v41, %v406_v41 }
  0x97   :  { %v414_v50 = vsub.f32 %v18_v8, %v76_v46  ;;  %v416_v51 = vsub.f32 %v19_v9, %v77_v47  ;;  %v117_v52 = vsel %vm28_vm0, %v101_v48, 0.0  ;;  %v123_v55 = vsel %vm28_vm0, %v103_v49, 0.0 }
  0x98   :  { %121 = vadd.xlane.f32.xlu0 %v120_v45  ;;  %118 = vadd.xlane.f32.xlu1 %v117_v52  ;;  %v49_v53 = vpop.xlane.xlu0 %48  ;;  %v52_v54 = vpop.xlane.xlu1 %51 }
  0x99   :  { %v78_v56 = vmul.f32 0.03125, %v49_v53  ;;  %v79_v57 = vmul.f32 0.03125, %v52_v54  ;;  %v104_v58 = vmul.f32 %v414_v50, %v414_v50  ;;  %v105_v59 = vmul.f32 %v416_v51, %v416_v51 }
  0x9b   :  { %v424_v60 = vsub.f32 %v20_v12, %v78_v56  ;;  %v426_v61 = vsub.f32 %v21_v13, %v79_v57  ;;  %v126_v62 = vsel %vm28_vm0, %v104_v58, 0.0  ;;  %v129_v1 = vsel %vm28_vm0, %v105_v59, 0.0 }
  0x9c   :  { %124 = vadd.xlane.f32.xlu1 %v123_v55  ;;  %127 = vadd.xlane.f32.xlu0 %v126_v62  ;;  %v55_v63 = vpop.xlane.xlu0 %54  ;;  %v58_v0 = vpop.xlane.xlu1 %57 }
  0x9d   :  { %v80_v2 = vmul.f32 0.03125, %v55_v63  ;;  %v81_v3 = vmul.f32 0.03125, %v58_v0  ;;  %v106_v4 = vmul.f32 %v424_v60, %v424_v60  ;;  %v107_v5 = vmul.f32 %v426_v61, %v426_v61 }
  0x9f   :  { %v435_v6 = vsub.f32 %v357_v16, %v80_v2  ;;  %v438_v7 = vsub.f32 %v362_v17, %v81_v3  ;;  %v132_v8 = vsel %vm28_vm0, %v106_v4, 0.0  ;;  %v135_v11 = vsel %vm28_vm0, %v107_v5, 0.0  ;;  %v475_v4 = vld [vmem:[%s581_s1] ss:$0 sm:$0xff] }
  0xa0   :  { %130 = vadd.xlane.f32.xlu1 %v129_v1  ;;  %133 = vadd.xlane.f32.xlu0 %v132_v8  ;;  %v61_v9 = vpop.xlane.xlu0 %60  ;;  %v64_v10 = vpop.xlane.xlu1 %63 }
  0xa1   :  { %v82_v12 = vmul.f32 0.03125, %v61_v9  ;;  %v83_v13 = vmul.f32 0.03125, %v64_v10  ;;  %v108_v14 = vmul.f32 %v435_v6, %v435_v6  ;;  %v109_v15 = vmul.f32 %v438_v7, %v438_v7  ;;  %v481_v10 = vld [vmem:[%s582_s2] ss:$0 sm:$0xff] }
  0xa3   :  { %v447_v16 = vsub.f32 %v371_v20, %v82_v12  ;;  %v450_v17 = vsub.f32 %v376_v21, %v83_v13  ;;  %v138_v18 = vsel %vm28_vm0, %v108_v14, 0.0  ;;  %v141_v23 = vsel %vm28_vm0, %v109_v15, 0.0 }
  0xa4   :  { %136 = vadd.xlane.f32.xlu1 %v135_v11  ;;  %139 = vadd.xlane.f32.xlu0 %v138_v18  ;;  %v67_v19 = vpop.xlane.xlu0 %66  ;;  %v70_v22 = vpop.xlane.xlu1 %69 }
  0xa5   :  { %v84_v26 = vmul.f32 0.03125, %v67_v19  ;;  %v85_v27 = vmul.f32 0.03125, %v70_v22  ;;  %v110_v28 = vmul.f32 %v447_v16, %v447_v16  ;;  %v111_v20 = vmul.f32 %v450_v17, %v450_v17 }
  0xa7   :  { %v459_v29 = vsub.f32 %v385_v24, %v84_v26  ;;  %v462_v21 = vsub.f32 %v390_v25, %v85_v27  ;;  %v144_v30 = vsel %vm28_vm0, %v110_v28, 0.0  ;;  %v147_v31 = vsel %vm28_vm0, %v111_v20, 0.0 }
  0xa8   :  { %142 = vadd.xlane.f32.xlu1 %v141_v23  ;;  %145 = vadd.xlane.f32.xlu0 %v144_v30 }
  0xa9   :  { %v112_v34 = vmul.f32 %v459_v29, %v459_v29  ;;  %v113_v35 = vmul.f32 %v462_v21, %v462_v21 }
  0xab   :  { %v150_v36 = vsel %vm28_vm0, %v112_v34, 0.0  ;;  %v153_v24 = vsel %vm28_vm0, %v113_v35, 0.0 }
  0xac   :  { %148 = vadd.xlane.f32.xlu1 %v147_v31  ;;  %151 = vadd.xlane.f32.xlu0 %v150_v36 }
  0xb0   :  { %154 = vadd.xlane.f32.xlu1 %v153_v24 }
 0x11d   :  { %v116_v25 = vpop.xlane.xlu0 %115 }
 0x11e   :  { %v156_v37 = vmul.f32 0.03125, %v116_v25 }
 0x120   :  { %v170_v38 = vadd.f32 1e-05, %v156_v37 }
 0x121   :  { %v119_v39 = vpop.xlane.xlu1 %118  ;;  %v122_v42 = vpop.xlane.xlu0 %121 }
 0x122   :  { %274 = vrsqrt.f32 %v170_v38  ;;  %v157_v43 = vmul.f32 0.03125, %v119_v39  ;;  %v158_v44 = vmul.f32 0.03125, %v122_v42 }
 0x124   :  { %v171_v45 = vadd.f32 1e-05, %v157_v43  ;;  %v172_v46 = vadd.f32 1e-05, %v158_v44 }
 0x125   :  { %v125_v47 = vpop.xlane.xlu1 %124  ;;  %v128_v48 = vpop.xlane.xlu0 %127 }
 0x126   :  { %276 = vrsqrt.f32 %v171_v45  ;;  %v159_v49 = vmul.f32 0.03125, %v125_v47  ;;  %v160_v52 = vmul.f32 0.03125, %v128_v48 }
 0x127   :  { %278 = vrsqrt.f32 %v172_v46 }
 0x128   :  { %v173_v53 = vadd.f32 1e-05, %v159_v49  ;;  %v174_v54 = vadd.f32 1e-05, %v160_v52 }
 0x129   :  { %v131_v55 = vpop.xlane.xlu1 %130  ;;  %v134_v56 = vpop.xlane.xlu0 %133 }
 0x12a   :  { %280 = vrsqrt.f32 %v173_v53  ;;  %v161_v57 = vmul.f32 0.03125, %v131_v55  ;;  %v162_v58 = vmul.f32 0.03125, %v134_v56 }
 0x12b   :  { %282 = vrsqrt.f32 %v174_v54 }
 0x12c   :  { %v175_v59 = vadd.f32 1e-05, %v161_v57  ;;  %v176_v62 = vadd.f32 1e-05, %v162_v58 }
 0x12d   :  { %v137_v63 = vpop.xlane.xlu1 %136  ;;  %v140_v0 = vpop.xlane.xlu0 %139 }
 0x12e   :  { %284 = vrsqrt.f32 %v175_v59  ;;  %v163_v1 = vmul.f32 0.03125, %v137_v63  ;;  %v164_v2 = vmul.f32 0.03125, %v140_v0 }
 0x12f   :  { %v275_v3 = vpop.eup %274  ;;  %286 = vrsqrt.f32 %v176_v62 }
 0x130   :  { %v198_v5 = vmul.f32 %v275_v3, %v396_v32  ;;  %v177_v8 = vadd.f32 1e-05, %v163_v1  ;;  %v178_v9 = vadd.f32 1e-05, %v164_v2 }
 0x131   :  { %v143_v11 = vpop.xlane.xlu1 %142  ;;  %v146_v12 = vpop.xlane.xlu0 %145 }
 0x132   :  { %v219_v13 = vmul.f32 %v475_v4, %v198_v5  ;;  %288 = vrsqrt.f32 %v177_v8  ;;  %v165_v14 = vmul.f32 0.03125, %v143_v11  ;;  %v166_v15 = vmul.f32 0.03125, %v146_v12 }
 0x133   :  { %v277_v18 = vpop.eup %276  ;;  %290 = vrsqrt.f32 %v178_v9 }
 0x134   :  { %v279_v19 = vpop.eup %278  ;;  %v240_v22 = vadd.f32 %v481_v10, %v219_v13  ;;  %v199_v32 = vmul.f32 %v277_v18, %v404_v40  ;;  %v179_v23 = vadd.f32 1e-05, %v165_v14  ;;  %v180_v26 = vadd.f32 1e-05, %v166_v15 }
 0x135   :  { %v200_v27 = vmul.f32 %v279_v19, %v398_v33  ;;  %v149_v28 = vpop.xlane.xlu1 %148  ;;  %v152_v20 = vpop.xlane.xlu0 %151 }
 0x136   :  { %254 = vst.msk [vmem:[%s583_s3] sm:$0xff] %vm28_vm0, %v240_v22  ;;  %v220_v30 = vmul.f32 %v475_v4, %v199_v32  ;;  %292 = vrsqrt.f32 %v179_v23  ;;  %v167_v31 = vmul.f32 0.03125, %v149_v28  ;;  %v168_v34 = vmul.f32 0.03125, %v152_v20 }
 0x137   :  { %v281_v35 = vpop.eup %280  ;;  %v221_v36 = vmul.f32 %v475_v4, %v200_v27  ;;  %294 = vrsqrt.f32 %v180_v26 }
 0x138   :  { %v283_v40 = vpop.eup %282  ;;  %v241_v24 = vadd.f32 %v481_v10, %v220_v30  ;;  %v201_v33 = vmul.f32 %v281_v35, %v406_v41  ;;  %v181_v25 = vadd.f32 1e-05, %v167_v31  ;;  %v182_v37 = vadd.f32 1e-05, %v168_v34 }
 0x139   :  { %v242_v38 = vadd.f32 %v481_v10, %v221_v36  ;;  %v202_v39 = vmul.f32 %v283_v40, %v414_v50  ;;  %v155_v42 = vpop.xlane.xlu1 %154 }
 0x13a   :  { %255 = vst.msk [vmem:[%s583_s3 + $0x8] sm:$0xff] %vm28_vm0, %v241_v24  ;;  %v222_v43 = vmul.f32 %v475_v4, %v201_v33  ;;  %296 = vrsqrt.f32 %v181_v25  ;;  %v169_v44 = vmul.f32 0.03125, %v155_v42 }
 0x13b   :  { %v285_v45 = vpop.eup %284  ;;  %256 = vst.msk [vmem:[%s583_s3 + $0x10] sm:$0xff] %vm28_vm0, %v242_v38  ;;  %v223_v41 = vmul.f32 %v475_v4, %v202_v39  ;;  %298 = vrsqrt.f32 %v182_v37 }
 0x13c   :  { %v287_v50 = vpop.eup %286  ;;  %v243_v46 = vadd.f32 %v481_v10, %v222_v43  ;;  %v203_v47 = vmul.f32 %v285_v45, %v416_v51  ;;  %v183_v48 = vadd.f32 1e-05, %v169_v44 }
 0x13d   :  { %v244_v49 = vadd.f32 %v481_v10, %v223_v41  ;;  %v204_v52 = vmul.f32 %v287_v50, %v424_v60 }
 0x13e   :  { %257 = vst.msk [vmem:[%s583_s3 + $0x18] sm:$0xff] %vm28_vm0, %v243_v46  ;;  %v224_v53 = vmul.f32 %v475_v4, %v203_v47  ;;  %300 = vrsqrt.f32 %v183_v48 }
 0x13f   :  { %v289_v54 = vpop.eup %288  ;;  %258 = vst.msk [vmem:[%s583_s3 + $0x20] sm:$0xff] %vm28_vm0, %v244_v49  ;;  %v225_v51 = vmul.f32 %v475_v4, %v204_v52 }
 0x140   :  { %v291_v55 = vpop.eup %290  ;;  %v245_v56 = vadd.f32 %v481_v10, %v224_v53  ;;  %v205_v60 = vmul.f32 %v289_v54, %v426_v61 }
 0x141   :  { %v246_v57 = vadd.f32 %v481_v10, %v225_v51  ;;  %v206_v58 = vmul.f32 %v291_v55, %v435_v6 }
 0x142   :  { %259 = vst.msk [vmem:[%s583_s3 + $0x28] sm:$0xff] %vm28_vm0, %v245_v56  ;;  %v226_v59 = vmul.f32 %v475_v4, %v205_v60 }
 0x143   :  { %v293_v62 = vpop.eup %292  ;;  %260 = vst.msk [vmem:[%s583_s3 + $0x30] sm:$0xff] %vm28_vm0, %v246_v57  ;;  %v227_v63 = vmul.f32 %v475_v4, %v206_v58 }
 0x144   :  { %v295_v61 = vpop.eup %294  ;;  %v247_v0 = vadd.f32 %v481_v10, %v226_v59  ;;  %v207_v6 = vmul.f32 %v293_v62, %v438_v7 }
 0x145   :  { %v248_v1 = vadd.f32 %v481_v10, %v227_v63  ;;  %v208_v2 = vmul.f32 %v295_v61, %v447_v16 }
 0x146   :  { %261 = vst.msk [vmem:[%s583_s3 + $0x38] sm:$0xff] %vm28_vm0, %v247_v0  ;;  %v228_v3 = vmul.f32 %v475_v4, %v207_v6 }
 0x147   :  { %v297_v5 = vpop.eup %296  ;;  %262 = vst.msk [vmem:[%s583_s3 + $0x40] sm:$0xff] %vm28_vm0, %v248_v1  ;;  %v229_v8 = vmul.f32 %v475_v4, %v208_v2 }
 0x148   :  { %v299_v7 = vpop.eup %298  ;;  %v249_v9 = vadd.f32 %v481_v10, %v228_v3  ;;  %v209_v16 = vmul.f32 %v297_v5, %v450_v17 }
 0x149   :  { %v250_v11 = vadd.f32 %v481_v10, %v229_v8  ;;  %v210_v12 = vmul.f32 %v299_v7, %v459_v29 }
 0x14a   :  { %263 = vst.msk [vmem:[%s583_s3 + $0x48] sm:$0xff] %vm28_vm0, %v249_v9  ;;  %v230_v13 = vmul.f32 %v475_v4, %v209_v16 }
 0x14b   :  { %v301_v14 = vpop.eup %300  ;;  %264 = vst.msk [vmem:[%s583_s3 + $0x50] sm:$0xff] %vm28_vm0, %v250_v11  ;;  %v231_v15 = vmul.f32 %v475_v4, %v210_v12 }
 0x14c   :  { %v251_v17 = vadd.f32 %v481_v10, %v230_v13  ;;  %v211_v18 = vmul.f32 %v301_v14, %v462_v21 }
 0x14d   :  { %v252_v29 = vadd.f32 %v481_v10, %v231_v15 }
 0x14e   :  { %265 = vst.msk [vmem:[%s583_s3 + $0x58] sm:$0xff] %vm28_vm0, %v251_v17  ;;  %v232_v19 = vmul.f32 %v475_v4, %v211_v18 }
 0x14f   :  { %266 = vst.msk [vmem:[%s583_s3 + $0x60] sm:$0xff] %vm28_vm0, %v252_v29 }
 0x150   :  { %v253_v22 = vadd.f32 %v481_v10, %v232_v19 }
 0x152   :  { %267 = vst.msk [vmem:[%s583_s3 + $0x68] sm:$0xff] %vm28_vm0, %v253_v22 }

// kernel: spacetimeformer_forward.74
= control target key start
LH: loop header
LB: loop body
LE: loop exit
PB: predicated region body
PF: predicated region fallthrough
CT: control target
= control target key end

     0   :  { %vm19_vm0 = vcmask 523264   ;;  %v340_v0 = vmov 0.0   ;;  %vm341_vm1 = vmmov 0   ;;  %vm85_vm2 = vcmask 261120   ;;  %s527_s1 = inlined_call_operand.vmem [shape: bf16[32,64], index: 1, kind: input, shape index: {}]   ;;  %s528_s0 = inlined_call_operand.vmem [shape: f32[112,32], index: 0, kind: input, shape index: {}]   ;;  %s529_s2 = inlined_call_operand.vmem [shape: f32[1,64], index: 2, kind: input, shape index: {}]   ;;  %s530_s3 = inlined_call_operand.vmem [shape: f32[112,64], index: 3, kind: output, shape index: {}]  }
   0x1   :  { %300 = vmatprep.subr.bf16.mxu0 %v340_v0  ;;  %v338_v1 = vld [vmem:[%s527_s1 + $0x8] sm:$0xff]   ;;  %332 = vmatprep.subr.bf16.mxu1 %v340_v0  ;;  %20 = vst.msk [vmem:[#allocation2] sm:$0xff] %vm19_vm0, %v340_v0  ;;  %21 = vst.msk [vmem:[#allocation2 + $0x8] sm:$0xff] %vm19_vm0, %v340_v0  ;;  %v339_v2 = vld [vmem:[%s527_s1] sm:$0xff]  }
   0x2   :  { %22 = vst.msk [vmem:[#allocation2 + $0x10] sm:$0xff] %vm19_vm0, %v340_v0  ;;  %23 = vst.msk [vmem:[#allocation2 + $0x18] sm:$0xff] %vm19_vm0, %v340_v0  ;;  %304 = vmatprep.mubr.msk.bf16.mxu0 %vm341_vm1, %v340_v0  ;;  %320 = vmatprep.mubr.msk.bf16.mxu1 %vm341_vm1, %v340_v0  ;;  %v48_v3 = vld [vmem:[%s528_s0] sm:$0xff]  ;;  %v49_v4 = vld [vmem:[%s528_s0 + $0x8] sm:$0xff] }
   0x3   :  { %24 = vst.msk [vmem:[#allocation2 + $0x20] sm:$0xff] %vm19_vm0, %v340_v0  ;;  %25 = vst.msk [vmem:[#allocation2 + $0x28] sm:$0xff] %vm19_vm0, %v340_v0  ;;  %301 = vmatpush3.bf16.msra.mxu0 %v338_v1  ;;  %334 = vmatpush3.bf16.msra.mxu1 %v338_v1  ;;  %v56_v5 = vld [vmem:[%s528_s0 + $0x40] sm:$0xff]  ;;  %v57_v6 = vld [vmem:[%s528_s0 + $0x48] sm:$0xff]  ;;  %v62_v7 = vpack.c.bf16 %v49_v4, %v48_v3 }
   0x4   :  { %26 = vst.msk [vmem:[#allocation2 + $0x30] sm:$0xff] %vm19_vm0, %v340_v0  ;;  %27 = vst.msk [vmem:[#allocation2 + $0x38] sm:$0xff] %vm19_vm0, %v340_v0  ;;  %302 = vmatprep.subr.bf16.mxu0 %v340_v0  ;;  %333 = vmatprep.subr.bf16.mxu1 %v340_v0  ;;  %v66_v8 = vpack.c.bf16 %v57_v6, %v56_v5  ;;  %v50_v9 = vld [vmem:[%s528_s0 + $0x10] sm:$0xff]  ;;  %v51_v10 = vld [vmem:[%s528_s0 + $0x18] sm:$0xff] }
   0x5   :  { %28 = vst.msk [vmem:[#allocation2 + $0x40] sm:$0xff] %vm19_vm0, %v340_v0  ;;  %29 = vst.msk [vmem:[#allocation2 + $0x48] sm:$0xff] %vm19_vm0, %v340_v0  ;;  %v58_v11 = vld [vmem:[%s528_s0 + $0x50] sm:$0xff]  ;;  %v59_v12 = vld [vmem:[%s528_s0 + $0x58] sm:$0xff]  ;;  %v63_v13 = vpack.c.bf16 %v51_v10, %v50_v9 }
   0x6   :  { %30 = vst.msk [vmem:[#allocation2 + $0x50] sm:$0xff] %vm19_vm0, %v340_v0  ;;  %31 = vst.msk [vmem:[#allocation2 + $0x58] sm:$0xff] %vm19_vm0, %v340_v0  ;;  %v67_v14 = vpack.c.bf16 %v59_v12, %v58_v11  ;;  %v52_v15 = vld [vmem:[%s528_s0 + $0x20] sm:$0xff]  ;;  %v53_v16 = vld [vmem:[%s528_s0 + $0x28] sm:$0xff] }
   0x7   :  { %32 = vst.msk [vmem:[#allocation2 + $0x60] sm:$0xff] %vm19_vm0, %v340_v0  ;;  %33 = vst.msk [vmem:[#allocation2 + $0x68] sm:$0xff] %vm19_vm0, %v340_v0  ;;  %303 = vmatpush3.bf16.msra.mxu0 %v339_v2  ;;  %335 = vmatpush3.bf16.msra.mxu1 %v339_v2  ;;  %v60_v17 = vld [vmem:[%s528_s0 + $0x60] sm:$0xff]  ;;  %v61_v18 = vld [vmem:[%s528_s0 + $0x68] sm:$0xff]  ;;  %v64_v19 = vpack.c.bf16 %v53_v16, %v52_v15 }
   0x8   :  { %v68_v20 = vpack.c.bf16 %v61_v18, %v60_v17  ;;  %v54_v21 = vld [vmem:[%s528_s0 + $0x30] sm:$0xff]  ;;  %v55_v22 = vld [vmem:[%s528_s0 + $0x38] sm:$0xff]  ;;  %v34_v24 = vld [vmem:[#allocation2] sm:$0xff] }
   0x9   :  { %v65_v23 = vpack.c.bf16 %v55_v22, %v54_v21  ;;  %v35_v31 = vld [vmem:[#allocation2 + $0x8] sm:$0xff]  ;;  %v36_v39 = vld [vmem:[#allocation2 + $0x10] sm:$0xff]  ;;  %v445_v42 = vld [vmem:[%s529_s2] ss:$0 sm:$0xff] }
   0xa   :  { %305 = vmatmul.mubr.msk.bf16.vlgmr.msra.gmra.mxu0 %vm85_vm2, %v62_v7  ;;  %321 = vmatmul.mubr.msk.bf16.vlgmr.msra.gmra.mxu1 %vm85_vm2, %v66_v8  ;;  %v37_v47 = vld [vmem:[#allocation2 + $0x18] sm:$0xff]  ;;  %v38_v59 = vld [vmem:[#allocation2 + $0x20] sm:$0xff]  ;;  %v39_v7 = vld [vmem:[#allocation2 + $0x28] sm:$0xff] }
   0xb   :  { %308 = vmatprep.mubr.msk.bf16.mxu0 %vm341_vm1, %v340_v0  ;;  %324 = vmatprep.mubr.msk.bf16.mxu1 %vm341_vm1, %v340_v0  ;;  %v40_v22 = vld [vmem:[#allocation2 + $0x30] sm:$0xff] }
   0xc   :  { %v42_v25 = vld [vmem:[#allocation2 + $0x40] sm:$0xff]  ;;  %v43_v33 = vld [vmem:[#allocation2 + $0x48] sm:$0xff] }
   0xd   :  { %v44_v41 = vld [vmem:[#allocation2 + $0x50] sm:$0xff]  ;;  %v45_v52 = vld [vmem:[#allocation2 + $0x58] sm:$0xff] }
   0xe   :  { %v47_v12 = vld [vmem:[#allocation2 + $0x68] sm:$0xff] }
  0x12   :  { %309 = vmatmul.mubr.msk.bf16.gmra.mxu0 %vm85_vm2, %v63_v13  ;;  %325 = vmatmul.mubr.msk.bf16.gmra.mxu1 %vm85_vm2, %v67_v14 }
  0x13   :  { %312 = vmatprep.mubr.msk.bf16.mxu0 %vm341_vm1, %v340_v0  ;;  %328 = vmatprep.mubr.msk.bf16.mxu1 %vm341_vm1, %v340_v0 }
  0x1a   :  { %313 = vmatmul.mubr.msk.bf16.gmra.mxu0 %vm85_vm2, %v64_v19  ;;  %329 = vmatmul.mubr.msk.bf16.gmra.mxu1 %vm85_vm2, %v68_v20 }
  0x1b   :  { %316 = vmatprep.mubr.msk.bf16.mxu0 %vm341_vm1, %v340_v0  ;;  %v46_v0 = vld [vmem:[#allocation2 + $0x60] sm:$0xff] }
  0x22   :  { %317 = vmatmul.mubr.msk.bf16.gmra.mxu0 %vm85_vm2, %v65_v23 }
  0xca   :  { %v141_v26 = vpop.f32.mrf.mxu0  ;;  %v173_v27 = vpop.f32.mrf.mxu1 }
  0xcb   :  { %v196_v28 = vadd.f32 %v141_v26, %v34_v24  ;;  %v204_v29 = vadd.f32 %v173_v27, %v42_v25 }
  0xcc   :  { %v306_v30 = vpop.f32.mrf.mxu0  ;;  %v322_v32 = vpop.f32.mrf.mxu1 }
  0xcd   :  { %211 = vst.msk [vmem:[#allocation2] sm:$0xff] %vm19_vm0, %v196_v28  ;;  %219 = vst.msk [vmem:[#allocation2 + $0x40] sm:$0xff] %vm19_vm0, %v204_v29 }
  0xce   :  { %v144_v34 = vpop.f32.mrf.mxu0  ;;  %v176_v35 = vpop.f32.mrf.mxu1 }
  0xcf   :  { %v197_v36 = vadd.f32 %v144_v34, %v35_v31  ;;  %v205_v37 = vadd.f32 %v176_v35, %v43_v33  ;;  %v41_v31 = vld [vmem:[#allocation2 + $0x38] sm:$0xff] }
  0xd0   :  { %v307_v38 = vpop.f32.mrf.mxu0  ;;  %v323_v40 = vpop.f32.mrf.mxu1 }
  0xd1   :  { %212 = vst.msk [vmem:[#allocation2 + $0x8] sm:$0xff] %vm19_vm0, %v197_v36  ;;  %220 = vst.msk [vmem:[#allocation2 + $0x48] sm:$0xff] %vm19_vm0, %v205_v37 }
  0xd2   :  { %v149_v43 = vpop.f32.mrf.mxu0  ;;  %v181_v44 = vpop.f32.mrf.mxu1 }
  0xd3   :  { %v198_v45 = vadd.f32 %v149_v43, %v36_v39  ;;  %v206_v46 = vadd.f32 %v181_v44, %v44_v41 }
  0xd4   :  { %v228_v48 = vld [vmem:[#allocation2] sm:$0xff]  ;;  %v310_v50 = vpop.f32.mrf.mxu0  ;;  %v326_v51 = vpop.f32.mrf.mxu1 }
  0xd5   :  { %v236_v49 = vld [vmem:[#allocation2 + $0x40] sm:$0xff]  ;;  %v249_v53 = vadd.f32 %v445_v42, %v228_v48  ;;  %213 = vst.msk [vmem:[#allocation2 + $0x10] sm:$0xff] %vm19_vm0, %v198_v45  ;;  %221 = vst.msk [vmem:[#allocation2 + $0x50] sm:$0xff] %vm19_vm0, %v206_v46 }
  0xd6   :  { %v257_v54 = vadd.f32 %v445_v42, %v236_v49  ;;  %v152_v55 = vpop.f32.mrf.mxu0  ;;  %v184_v56 = vpop.f32.mrf.mxu1 }
  0xd7   :  { %263 = vst.msk [vmem:[%s530_s3] sm:$0xff] %vm19_vm0, %v249_v53  ;;  %v199_v57 = vadd.f32 %v152_v55, %v37_v47  ;;  %v207_v58 = vadd.f32 %v184_v56, %v45_v52 }
  0xd8   :  { %271 = vst.msk [vmem:[%s530_s3 + $0x40] sm:$0xff] %vm19_vm0, %v257_v54  ;;  %v229_v60 = vld [vmem:[#allocation2 + $0x8] sm:$0xff]  ;;  %v311_v62 = vpop.f32.mrf.mxu0  ;;  %v327_v63 = vpop.f32.mrf.mxu1 }
  0xd9   :  { %v237_v61 = vld [vmem:[#allocation2 + $0x48] sm:$0xff]  ;;  %v250_v1 = vadd.f32 %v445_v42, %v229_v60  ;;  %214 = vst.msk [vmem:[#allocation2 + $0x18] sm:$0xff] %vm19_vm0, %v199_v57  ;;  %222 = vst.msk [vmem:[#allocation2 + $0x58] sm:$0xff] %vm19_vm0, %v207_v58 }
  0xda   :  { %v258_v2 = vadd.f32 %v445_v42, %v237_v61  ;;  %v157_v3 = vpop.f32.mrf.mxu0  ;;  %v189_v4 = vpop.f32.mrf.mxu1 }
  0xdb   :  { %264 = vst.msk [vmem:[%s530_s3 + $0x8] sm:$0xff] %vm19_vm0, %v250_v1  ;;  %v200_v5 = vadd.f32 %v157_v3, %v38_v59  ;;  %v208_v6 = vadd.f32 %v189_v4, %v46_v0 }
  0xdc   :  { %272 = vst.msk [vmem:[%s530_s3 + $0x48] sm:$0xff] %vm19_vm0, %v258_v2  ;;  %v230_v8 = vld [vmem:[#allocation2 + $0x10] sm:$0xff]  ;;  %v314_v10 = vpop.f32.mrf.mxu0  ;;  %v330_v11 = vpop.f32.mrf.mxu1 }
  0xdd   :  { %v238_v9 = vld [vmem:[#allocation2 + $0x50] sm:$0xff]  ;;  %v251_v13 = vadd.f32 %v445_v42, %v230_v8  ;;  %215 = vst.msk [vmem:[#allocation2 + $0x20] sm:$0xff] %vm19_vm0, %v200_v5  ;;  %223 = vst.msk [vmem:[#allocation2 + $0x60] sm:$0xff] %vm19_vm0, %v208_v6 }
  0xde   :  { %v259_v14 = vadd.f32 %v445_v42, %v238_v9  ;;  %v160_v15 = vpop.f32.mrf.mxu0  ;;  %v192_v16 = vpop.f32.mrf.mxu1 }
  0xdf   :  { %265 = vst.msk [vmem:[%s530_s3 + $0x10] sm:$0xff] %vm19_vm0, %v251_v13  ;;  %v201_v17 = vadd.f32 %v160_v15, %v39_v7  ;;  %v209_v18 = vadd.f32 %v192_v16, %v47_v12 }
  0xe0   :  { %273 = vst.msk [vmem:[%s530_s3 + $0x50] sm:$0xff] %vm19_vm0, %v259_v14  ;;  %v231_v19 = vld [vmem:[#allocation2 + $0x18] sm:$0xff]  ;;  %v315_v21 = vpop.f32.mrf.mxu0  ;;  %v331_v23 = vpop.f32.mrf.mxu1 }
  0xe1   :  { %v239_v20 = vld [vmem:[#allocation2 + $0x58] sm:$0xff]  ;;  %v252_v24 = vadd.f32 %v445_v42, %v231_v19  ;;  %216 = vst.msk [vmem:[#allocation2 + $0x28] sm:$0xff] %vm19_vm0, %v201_v17  ;;  %224 = vst.msk [vmem:[#allocation2 + $0x68] sm:$0xff] %vm19_vm0, %v209_v18 }
  0xe2   :  { %v260_v25 = vadd.f32 %v445_v42, %v239_v20  ;;  %v165_v26 = vpop.f32.mrf.mxu0 }
  0xe3   :  { %266 = vst.msk [vmem:[%s530_s3 + $0x18] sm:$0xff] %vm19_vm0, %v252_v24  ;;  %v202_v27 = vadd.f32 %v165_v26, %v40_v22 }
  0xe4   :  { %274 = vst.msk [vmem:[%s530_s3 + $0x58] sm:$0xff] %vm19_vm0, %v260_v25  ;;  %v232_v28 = vld [vmem:[#allocation2 + $0x20] sm:$0xff]  ;;  %v318_v30 = vpop.f32.mrf.mxu0 }
  0xe5   :  { %v240_v29 = vld [vmem:[#allocation2 + $0x60] sm:$0xff]  ;;  %v253_v32 = vadd.f32 %v445_v42, %v232_v28  ;;  %217 = vst.msk [vmem:[#allocation2 + $0x30] sm:$0xff] %vm19_vm0, %v202_v27 }
  0xe6   :  { %v261_v33 = vadd.f32 %v445_v42, %v240_v29  ;;  %v168_v34 = vpop.f32.mrf.mxu0 }
  0xe7   :  { %267 = vst.msk [vmem:[%s530_s3 + $0x20] sm:$0xff] %vm19_vm0, %v253_v32  ;;  %v203_v35 = vadd.f32 %v168_v34, %v41_v31 }
  0xe8   :  { %275 = vst.msk [vmem:[%s530_s3 + $0x60] sm:$0xff] %vm19_vm0, %v261_v33  ;;  %v233_v36 = vld [vmem:[#allocation2 + $0x28] sm:$0xff]  ;;  %v319_v38 = vpop.f32.mrf.mxu0 }
  0xe9   :  { %v241_v37 = vld [vmem:[#allocation2 + $0x68] sm:$0xff]  ;;  %v254_v39 = vadd.f32 %v445_v42, %v233_v36  ;;  %218 = vst.msk [vmem:[#allocation2 + $0x38] sm:$0xff] %vm19_vm0, %v203_v35 }
  0xea   :  { %v262_v40 = vadd.f32 %v445_v42, %v241_v37 }
  0xeb   :  { %268 = vst.msk [vmem:[%s530_s3 + $0x28] sm:$0xff] %vm19_vm0, %v254_v39 }
  0xec   :  { %276 = vst.msk [vmem:[%s530_s3 + $0x68] sm:$0xff] %vm19_vm0, %v262_v40  ;;  %v234_v41 = vld [vmem:[#allocation2 + $0x30] sm:$0xff] }
  0xed   :  { %v255_v43 = vadd.f32 %v445_v42, %v234_v41 }
  0xef   :  { %269 = vst.msk [vmem:[%s530_s3 + $0x30] sm:$0xff] %vm19_vm0, %v255_v43 }
  0xf0   :  { %v235_v44 = vld [vmem:[#allocation2 + $0x38] sm:$0xff] }
  0xf1   :  { %v256_v45 = vadd.f32 %v445_v42, %v235_v44 }
  0xf3   :  { %270 = vst.msk [vmem:[%s530_s3 + $0x38] sm:$0xff] %vm19_vm0, %v256_v45 }

// kernel: spacetimeformer_forward.61
= control target key start
LH: loop header
LB: loop body
LE: loop exit
PB: predicated region body
PF: predicated region fallthrough
CT: control target
= control target key end

     0   :  { %vm19_vm0 = vcmask 261120   ;;  %v339_v0 = vmov 0.0   ;;  %vm340_vm1 = vmmov 0   ;;  %s526_s1 = inlined_call_operand.vmem [shape: bf16[32,32], index: 1, kind: input, shape index: {}]   ;;  %s527_s0 = inlined_call_operand.vmem [shape: f32[112,32], index: 0, kind: input, shape index: {}]   ;;  %s528_s2 = inlined_call_operand.vmem [shape: f32[1,32], index: 2, kind: input, shape index: {}]   ;;  %s529_s3 = inlined_call_operand.vmem [shape: f32[112,32], index: 3, kind: output, shape index: {}]  }
   0x1   :  { %299 = vmatprep.subr.bf16.mxu0 %v339_v0  ;;  %v337_v1 = vld [vmem:[%s526_s1 + $0x8] sm:$0xff]   ;;  %331 = vmatprep.subr.bf16.mxu1 %v339_v0  ;;  %20 = vst.msk [vmem:[#allocation2] sm:$0xff] %vm19_vm0, %v339_v0  ;;  %21 = vst.msk [vmem:[#allocation2 + $0x8] sm:$0xff] %vm19_vm0, %v339_v0  ;;  %v338_v2 = vld [vmem:[%s526_s1] sm:$0xff]  }
   0x2   :  { %22 = vst.msk [vmem:[#allocation2 + $0x10] sm:$0xff] %vm19_vm0, %v339_v0  ;;  %23 = vst.msk [vmem:[#allocation2 + $0x18] sm:$0xff] %vm19_vm0, %v339_v0  ;;  %303 = vmatprep.mubr.msk.bf16.mxu0 %vm340_vm1, %v339_v0  ;;  %319 = vmatprep.mubr.msk.bf16.mxu1 %vm340_vm1, %v339_v0  ;;  %v48_v3 = vld [vmem:[%s527_s0] sm:$0xff]  ;;  %v49_v4 = vld [vmem:[%s527_s0 + $0x8] sm:$0xff] }
   0x3   :  { %24 = vst.msk [vmem:[#allocation2 + $0x20] sm:$0xff] %vm19_vm0, %v339_v0  ;;  %25 = vst.msk [vmem:[#allocation2 + $0x28] sm:$0xff] %vm19_vm0, %v339_v0  ;;  %300 = vmatpush3.bf16.msra.mxu0 %v337_v1  ;;  %333 = vmatpush3.bf16.msra.mxu1 %v337_v1  ;;  %v56_v5 = vld [vmem:[%s527_s0 + $0x40] sm:$0xff]  ;;  %v57_v6 = vld [vmem:[%s527_s0 + $0x48] sm:$0xff]  ;;  %v62_v7 = vpack.c.bf16 %v49_v4, %v48_v3 }
   0x4   :  { %26 = vst.msk [vmem:[#allocation2 + $0x30] sm:$0xff] %vm19_vm0, %v339_v0  ;;  %27 = vst.msk [vmem:[#allocation2 + $0x38] sm:$0xff] %vm19_vm0, %v339_v0  ;;  %301 = vmatprep.subr.bf16.mxu0 %v339_v0  ;;  %332 = vmatprep.subr.bf16.mxu1 %v339_v0  ;;  %v66_v8 = vpack.c.bf16 %v57_v6, %v56_v5  ;;  %v50_v9 = vld [vmem:[%s527_s0 + $0x10] sm:$0xff]  ;;  %v51_v10 = vld [vmem:[%s527_s0 + $0x18] sm:$0xff] }
   0x5   :  { %28 = vst.msk [vmem:[#allocation2 + $0x40] sm:$0xff] %vm19_vm0, %v339_v0  ;;  %29 = vst.msk [vmem:[#allocation2 + $0x48] sm:$0xff] %vm19_vm0, %v339_v0  ;;  %v58_v11 = vld [vmem:[%s527_s0 + $0x50] sm:$0xff]  ;;  %v59_v12 = vld [vmem:[%s527_s0 + $0x58] sm:$0xff]  ;;  %v63_v13 = vpack.c.bf16 %v51_v10, %v50_v9 }
   0x6   :  { %30 = vst.msk [vmem:[#allocation2 + $0x50] sm:$0xff] %vm19_vm0, %v339_v0  ;;  %31 = vst.msk [vmem:[#allocation2 + $0x58] sm:$0xff] %vm19_vm0, %v339_v0  ;;  %v67_v14 = vpack.c.bf16 %v59_v12, %v58_v11  ;;  %v52_v15 = vld [vmem:[%s527_s0 + $0x20] sm:$0xff]  ;;  %v53_v16 = vld [vmem:[%s527_s0 + $0x28] sm:$0xff] }
   0x7   :  { %32 = vst.msk [vmem:[#allocation2 + $0x60] sm:$0xff] %vm19_vm0, %v339_v0  ;;  %33 = vst.msk [vmem:[#allocation2 + $0x68] sm:$0xff] %vm19_vm0, %v339_v0  ;;  %302 = vmatpush3.bf16.msra.mxu0 %v338_v2  ;;  %334 = vmatpush3.bf16.msra.mxu1 %v338_v2  ;;  %v60_v17 = vld [vmem:[%s527_s0 + $0x60] sm:$0xff]  ;;  %v61_v18 = vld [vmem:[%s527_s0 + $0x68] sm:$0xff]  ;;  %v64_v19 = vpack.c.bf16 %v53_v16, %v52_v15 }
   0x8   :  { %v68_v20 = vpack.c.bf16 %v61_v18, %v60_v17  ;;  %v54_v21 = vld [vmem:[%s527_s0 + $0x30] sm:$0xff]  ;;  %v55_v22 = vld [vmem:[%s527_s0 + $0x38] sm:$0xff]  ;;  %v34_v24 = vld [vmem:[#allocation2] sm:$0xff] }
   0x9   :  { %v65_v23 = vpack.c.bf16 %v55_v22, %v54_v21  ;;  %v35_v31 = vld [vmem:[#allocation2 + $0x8] sm:$0xff]  ;;  %v36_v39 = vld [vmem:[#allocation2 + $0x10] sm:$0xff]  ;;  %v444_v42 = vld [vmem:[%s528_s2] ss:$0 sm:$0xff] }
   0xa   :  { %304 = vmatmul.mubr.msk.bf16.vlgmr.msra.gmra.mxu0 %vm19_vm0, %v62_v7  ;;  %320 = vmatmul.mubr.msk.bf16.vlgmr.msra.gmra.mxu1 %vm19_vm0, %v66_v8  ;;  %v37_v47 = vld [vmem:[#allocation2 + $0x18] sm:$0xff]  ;;  %v38_v59 = vld [vmem:[#allocation2 + $0x20] sm:$0xff]  ;;  %v39_v7 = vld [vmem:[#allocation2 + $0x28] sm:$0xff] }
   0xb   :  { %307 = vmatprep.mubr.msk.bf16.mxu0 %vm340_vm1, %v339_v0  ;;  %323 = vmatprep.mubr.msk.bf16.mxu1 %vm340_vm1, %v339_v0  ;;  %v40_v22 = vld [vmem:[#allocation2 + $0x30] sm:$0xff] }
   0xc   :  { %v42_v25 = vld [vmem:[#allocation2 + $0x40] sm:$0xff]  ;;  %v43_v33 = vld [vmem:[#allocation2 + $0x48] sm:$0xff] }
   0xd   :  { %v44_v41 = vld [vmem:[#allocation2 + $0x50] sm:$0xff]  ;;  %v45_v52 = vld [vmem:[#allocation2 + $0x58] sm:$0xff] }
   0xe   :  { %v47_v12 = vld [vmem:[#allocation2 + $0x68] sm:$0xff] }
  0x12   :  { %308 = vmatmul.mubr.msk.bf16.gmra.mxu0 %vm19_vm0, %v63_v13  ;;  %324 = vmatmul.mubr.msk.bf16.gmra.mxu1 %vm19_vm0, %v67_v14 }
  0x13   :  { %311 = vmatprep.mubr.msk.bf16.mxu0 %vm340_vm1, %v339_v0  ;;  %327 = vmatprep.mubr.msk.bf16.mxu1 %vm340_vm1, %v339_v0 }
  0x1a   :  { %312 = vmatmul.mubr.msk.bf16.gmra.mxu0 %vm19_vm0, %v64_v19  ;;  %328 = vmatmul.mubr.msk.bf16.gmra.mxu1 %vm19_vm0, %v68_v20 }
  0x1b   :  { %315 = vmatprep.mubr.msk.bf16.mxu0 %vm340_vm1, %v339_v0  ;;  %v46_v0 = vld [vmem:[#allocation2 + $0x60] sm:$0xff] }
  0x22   :  { %316 = vmatmul.mubr.msk.bf16.gmra.mxu0 %vm19_vm0, %v65_v23 }
  0xca   :  { %v141_v26 = vpop.f32.mrf.mxu0  ;;  %v173_v27 = vpop.f32.mrf.mxu1 }
  0xcb   :  { %v196_v28 = vadd.f32 %v141_v26, %v34_v24  ;;  %v204_v29 = vadd.f32 %v173_v27, %v42_v25 }
  0xcc   :  { %v305_v30 = vpop.f32.mrf.mxu0  ;;  %v321_v32 = vpop.f32.mrf.mxu1 }
  0xcd   :  { %210 = vst.msk [vmem:[#allocation2] sm:$0xff] %vm19_vm0, %v196_v28  ;;  %218 = vst.msk [vmem:[#allocation2 + $0x40] sm:$0xff] %vm19_vm0, %v204_v29 }
  0xce   :  { %v144_v34 = vpop.f32.mrf.mxu0  ;;  %v176_v35 = vpop.f32.mrf.mxu1 }
  0xcf   :  { %v197_v36 = vadd.f32 %v144_v34, %v35_v31  ;;  %v205_v37 = vadd.f32 %v176_v35, %v43_v33  ;;  %v41_v31 = vld [vmem:[#allocation2 + $0x38] sm:$0xff] }
  0xd0   :  { %v306_v38 = vpop.f32.mrf.mxu0  ;;  %v322_v40 = vpop.f32.mrf.mxu1 }
  0xd1   :  { %211 = vst.msk [vmem:[#allocation2 + $0x8] sm:$0xff] %vm19_vm0, %v197_v36  ;;  %219 = vst.msk [vmem:[#allocation2 + $0x48] sm:$0xff] %vm19_vm0, %v205_v37 }
  0xd2   :  { %v149_v43 = vpop.f32.mrf.mxu0  ;;  %v181_v44 = vpop.f32.mrf.mxu1 }
  0xd3   :  { %v198_v45 = vadd.f32 %v149_v43, %v36_v39  ;;  %v206_v46 = vadd.f32 %v181_v44, %v44_v41 }
  0xd4   :  { %v227_v48 = vld [vmem:[#allocation2] sm:$0xff]  ;;  %v309_v50 = vpop.f32.mrf.mxu0  ;;  %v325_v51 = vpop.f32.mrf.mxu1 }
  0xd5   :  { %v235_v49 = vld [vmem:[#allocation2 + $0x40] sm:$0xff]  ;;  %v248_v53 = vadd.f32 %v444_v42, %v227_v48  ;;  %212 = vst.msk [vmem:[#allocation2 + $0x10] sm:$0xff] %vm19_vm0, %v198_v45  ;;  %220 = vst.msk [vmem:[#allocation2 + $0x50] sm:$0xff] %vm19_vm0, %v206_v46 }
  0xd6   :  { %v256_v54 = vadd.f32 %v444_v42, %v235_v49  ;;  %v152_v55 = vpop.f32.mrf.mxu0  ;;  %v184_v56 = vpop.f32.mrf.mxu1 }
  0xd7   :  { %262 = vst.msk [vmem:[%s529_s3] sm:$0xff] %vm19_vm0, %v248_v53  ;;  %v199_v57 = vadd.f32 %v152_v55, %v37_v47  ;;  %v207_v58 = vadd.f32 %v184_v56, %v45_v52 }
  0xd8   :  { %270 = vst.msk [vmem:[%s529_s3 + $0x40] sm:$0xff] %vm19_vm0, %v256_v54  ;;  %v228_v60 = vld [vmem:[#allocation2 + $0x8] sm:$0xff]  ;;  %v310_v62 = vpop.f32.mrf.mxu0  ;;  %v326_v63 = vpop.f32.mrf.mxu1 }
  0xd9   :  { %v236_v61 = vld [vmem:[#allocation2 + $0x48] sm:$0xff]  ;;  %v249_v1 = vadd.f32 %v444_v42, %v228_v60  ;;  %213 = vst.msk [vmem:[#allocation2 + $0x18] sm:$0xff] %vm19_vm0, %v199_v57  ;;  %221 = vst.msk [vmem:[#allocation2 + $0x58] sm:$0xff] %vm19_vm0, %v207_v58 }
  0xda   :  { %v257_v2 = vadd.f32 %v444_v42, %v236_v61  ;;  %v157_v3 = vpop.f32.mrf.mxu0  ;;  %v189_v4 = vpop.f32.mrf.mxu1 }
  0xdb   :  { %263 = vst.msk [vmem:[%s529_s3 + $0x8] sm:$0xff] %vm19_vm0, %v249_v1  ;;  %v200_v5 = vadd.f32 %v157_v3, %v38_v59  ;;  %v208_v6 = vadd.f32 %v189_v4, %v46_v0 }
  0xdc   :  { %271 = vst.msk [vmem:[%s529_s3 + $0x48] sm:$0xff] %vm19_vm0, %v257_v2  ;;  %v229_v8 = vld [vmem:[#allocation2 + $0x10] sm:$0xff]  ;;  %v313_v10 = vpop.f32.mrf.mxu0  ;;  %v329_v11 = vpop.f32.mrf.mxu1 }
  0xdd   :  { %v237_v9 = vld [vmem:[#allocation2 + $0x50] sm:$0xff]  ;;  %v250_v13 = vadd.f32 %v444_v42, %v229_v8  ;;  %214 = vst.msk [vmem:[#allocation2 + $0x20] sm:$0xff] %vm19_vm0, %v200_v5  ;;  %222 = vst.msk [vmem:[#allocation2 + $0x60] sm:$0xff] %vm19_vm0, %v208_v6 }
  0xde   :  { %v258_v14 = vadd.f32 %v444_v42, %v237_v9  ;;  %v160_v15 = vpop.f32.mrf.mxu0  ;;  %v192_v16 = vpop.f32.mrf.mxu1 }
  0xdf   :  { %264 = vst.msk [vmem:[%s529_s3 + $0x10] sm:$0xff] %vm19_vm0, %v250_v13  ;;  %v201_v17 = vadd.f32 %v160_v15, %v39_v7  ;;  %v209_v18 = vadd.f32 %v192_v16, %v47_v12 }
  0xe0   :  { %272 = vst.msk [vmem:[%s529_s3 + $0x50] sm:$0xff] %vm19_vm0, %v258_v14  ;;  %v230_v19 = vld [vmem:[#allocation2 + $0x18] sm:$0xff]  ;;  %v314_v21 = vpop.f32.mrf.mxu0  ;;  %v330_v23 = vpop.f32.mrf.mxu1 }
  0xe1   :  { %v238_v20 = vld [vmem:[#allocation2 + $0x58] sm:$0xff]  ;;  %v251_v24 = vadd.f32 %v444_v42, %v230_v19  ;;  %215 = vst.msk [vmem:[#allocation2 + $0x28] sm:$0xff] %vm19_vm0, %v201_v17  ;;  %223 = vst.msk [vmem:[#allocation2 + $0x68] sm:$0xff] %vm19_vm0, %v209_v18 }
  0xe2   :  { %v259_v25 = vadd.f32 %v444_v42, %v238_v20  ;;  %v165_v26 = vpop.f32.mrf.mxu0 }
  0xe3   :  { %265 = vst.msk [vmem:[%s529_s3 + $0x18] sm:$0xff] %vm19_vm0, %v251_v24  ;;  %v202_v27 = vadd.f32 %v165_v26, %v40_v22 }
  0xe4   :  { %273 = vst.msk [vmem:[%s529_s3 + $0x58] sm:$0xff] %vm19_vm0, %v259_v25  ;;  %v231_v28 = vld [vmem:[#allocation2 + $0x20] sm:$0xff]  ;;  %v317_v30 = vpop.f32.mrf.mxu0 }
  0xe5   :  { %v239_v29 = vld [vmem:[#allocation2 + $0x60] sm:$0xff]  ;;  %v252_v32 = vadd.f32 %v444_v42, %v231_v28  ;;  %216 = vst.msk [vmem:[#allocation2 + $0x30] sm:$0xff] %vm19_vm0, %v202_v27 }
  0xe6   :  { %v260_v33 = vadd.f32 %v444_v42, %v239_v29  ;;  %v168_v34 = vpop.f32.mrf.mxu0 }
  0xe7   :  { %266 = vst.msk [vmem:[%s529_s3 + $0x20] sm:$0xff] %vm19_vm0, %v252_v32  ;;  %v203_v35 = vadd.f32 %v168_v34, %v41_v31 }
  0xe8   :  { %274 = vst.msk [vmem:[%s529_s3 + $0x60] sm:$0xff] %vm19_vm0, %v260_v33  ;;  %v232_v36 = vld [vmem:[#allocation2 + $0x28] sm:$0xff]  ;;  %v318_v38 = vpop.f32.mrf.mxu0 }
  0xe9   :  { %v240_v37 = vld [vmem:[#allocation2 + $0x68] sm:$0xff]  ;;  %v253_v39 = vadd.f32 %v444_v42, %v232_v36  ;;  %217 = vst.msk [vmem:[#allocation2 + $0x38] sm:$0xff] %vm19_vm0, %v203_v35 }
  0xea   :  { %v261_v40 = vadd.f32 %v444_v42, %v240_v37 }
  0xeb   :  { %267 = vst.msk [vmem:[%s529_s3 + $0x28] sm:$0xff] %vm19_vm0, %v253_v39 }
  0xec   :  { %275 = vst.msk [vmem:[%s529_s3 + $0x68] sm:$0xff] %vm19_vm0, %v261_v40  ;;  %v233_v41 = vld [vmem:[#allocation2 + $0x30] sm:$0xff] }
  0xed   :  { %v254_v43 = vadd.f32 %v444_v42, %v233_v41 }
  0xef   :  { %268 = vst.msk [vmem:[%s529_s3 + $0x30] sm:$0xff] %vm19_vm0, %v254_v43 }
  0xf0   :  { %v234_v44 = vld [vmem:[#allocation2 + $0x38] sm:$0xff] }
  0xf1   :  { %v255_v45 = vadd.f32 %v444_v42, %v234_v44 }
  0xf3   :  { %269 = vst.msk [vmem:[%s529_s3 + $0x38] sm:$0xff] %vm19_vm0, %v255_v45 }

// kernel: spacetimeformer_forward.46
= control target key start
LH: loop header
LB: loop body
LE: loop exit
PB: predicated region body
PF: predicated region fallthrough
CT: control target
= control target key end

     0   :  { %vm19_vm0 = vcmask 261120   ;;  %v493_v0 = vmov 0.0   ;;  %vm494_vm1 = vmmov 0   ;;  %s778_s1 = inlined_call_operand.vmem [shape: bf16[32,32], index: 1, kind: input, shape index: {}]   ;;  %s779_s0 = inlined_call_operand.vmem [shape: f32[112,32], index: 0, kind: input, shape index: {}]   ;;  %s780_s2 = inlined_call_operand.vmem [shape: f32[1,32], index: 2, kind: input, shape index: {}]   ;;  %s781_s3 = inlined_call_operand.vmem [shape: f32[112,32], index: 3, kind: output, shape index: {}]  }
   0x1   :  { %425 = vmatprep.subr.bf16.mxu0 %v493_v0  ;;  %457 = vmatprep.subr.bf16.mxu1 %v493_v0  ;;  %v463_v1 = vld [vmem:[%s778_s1 + $0x8] sm:$0xff]   ;;  %20 = vst.msk [vmem:[#allocation2] sm:$0xff] %vm19_vm0, %v493_v0  ;;  %21 = vst.msk [vmem:[#allocation2 + $0x8] sm:$0xff] %vm19_vm0, %v493_v0  ;;  %v464_v2 = vld [vmem:[%s778_s1] sm:$0xff]  }
   0x2   :  { %22 = vst.msk [vmem:[#allocation2 + $0x10] sm:$0xff] %vm19_vm0, %v493_v0  ;;  %23 = vst.msk [vmem:[#allocation2 + $0x18] sm:$0xff] %vm19_vm0, %v493_v0  ;;  %429 = vmatprep.mubr.msk.bf16.mxu0 %vm494_vm1, %v493_v0  ;;  %445 = vmatprep.mubr.msk.bf16.mxu1 %vm494_vm1, %v493_v0  ;;  %v48_v3 = vld [vmem:[%s779_s0] sm:$0xff]  ;;  %v49_v4 = vld [vmem:[%s779_s0 + $0x8] sm:$0xff] }
   0x3   :  { %24 = vst.msk [vmem:[#allocation2 + $0x20] sm:$0xff] %vm19_vm0, %v493_v0  ;;  %25 = vst.msk [vmem:[#allocation2 + $0x28] sm:$0xff] %vm19_vm0, %v493_v0  ;;  %426 = vmatpush3.bf16.msra.mxu0 %v463_v1  ;;  %459 = vmatpush3.bf16.msra.mxu1 %v463_v1  ;;  %v56_v5 = vld [vmem:[%s779_s0 + $0x40] sm:$0xff]  ;;  %v57_v6 = vld [vmem:[%s779_s0 + $0x48] sm:$0xff]  ;;  %v62_v7 = vpack.c.bf16 %v49_v4, %v48_v3 }
   0x4   :  { %26 = vst.msk [vmem:[#allocation2 + $0x30] sm:$0xff] %vm19_vm0, %v493_v0  ;;  %27 = vst.msk [vmem:[#allocation2 + $0x38] sm:$0xff] %vm19_vm0, %v493_v0  ;;  %427 = vmatprep.subr.bf16.mxu0 %v493_v0  ;;  %458 = vmatprep.subr.bf16.mxu1 %v493_v0  ;;  %v66_v8 = vpack.c.bf16 %v57_v6, %v56_v5  ;;  %v50_v9 = vld [vmem:[%s779_s0 + $0x10] sm:$0xff]  ;;  %v51_v10 = vld [vmem:[%s779_s0 + $0x18] sm:$0xff] }
   0x5   :  { %28 = vst.msk [vmem:[#allocation2 + $0x40] sm:$0xff] %vm19_vm0, %v493_v0  ;;  %29 = vst.msk [vmem:[#allocation2 + $0x48] sm:$0xff] %vm19_vm0, %v493_v0  ;;  %v58_v11 = vld [vmem:[%s779_s0 + $0x50] sm:$0xff]  ;;  %v59_v12 = vld [vmem:[%s779_s0 + $0x58] sm:$0xff]  ;;  %v63_v13 = vpack.c.bf16 %v51_v10, %v50_v9 }
   0x6   :  { %30 = vst.msk [vmem:[#allocation2 + $0x50] sm:$0xff] %vm19_vm0, %v493_v0  ;;  %31 = vst.msk [vmem:[#allocation2 + $0x58] sm:$0xff] %vm19_vm0, %v493_v0  ;;  %v67_v14 = vpack.c.bf16 %v59_v12, %v58_v11  ;;  %v52_v15 = vld [vmem:[%s779_s0 + $0x20] sm:$0xff]  ;;  %v53_v16 = vld [vmem:[%s779_s0 + $0x28] sm:$0xff] }
   0x7   :  { %32 = vst.msk [vmem:[#allocation2 + $0x60] sm:$0xff] %vm19_vm0, %v493_v0  ;;  %33 = vst.msk [vmem:[#allocation2 + $0x68] sm:$0xff] %vm19_vm0, %v493_v0  ;;  %428 = vmatpush3.bf16.msra.mxu0 %v464_v2  ;;  %460 = vmatpush3.bf16.msra.mxu1 %v464_v2  ;;  %v60_v17 = vld [vmem:[%s779_s0 + $0x60] sm:$0xff]  ;;  %v61_v18 = vld [vmem:[%s779_s0 + $0x68] sm:$0xff]  ;;  %v64_v19 = vpack.c.bf16 %v53_v16, %v52_v15 }
   0x8   :  { %v68_v20 = vpack.c.bf16 %v61_v18, %v60_v17  ;;  %v54_v21 = vld [vmem:[%s779_s0 + $0x30] sm:$0xff]  ;;  %v55_v22 = vld [vmem:[%s779_s0 + $0x38] sm:$0xff]  ;;  %v34_v24 = vld [vmem:[#allocation2] sm:$0xff] }
   0x9   :  { %v65_v23 = vpack.c.bf16 %v55_v22, %v54_v21  ;;  %v35_v32 = vld [vmem:[#allocation2 + $0x8] sm:$0xff]  ;;  %v36_v40 = vld [vmem:[#allocation2 + $0x10] sm:$0xff]  ;;  %v598_v42 = vld [vmem:[%s780_s2] ss:$0 sm:$0xff] }
   0xa   :  { %430 = vmatmul.mubr.msk.bf16.vlgmr.msra.gmra.mxu0 %vm19_vm0, %v62_v7  ;;  %446 = vmatmul.mubr.msk.bf16.vlgmr.msra.gmra.mxu1 %vm19_vm0, %v66_v8  ;;  %v37_v47 = vld [vmem:[#allocation2 + $0x18] sm:$0xff]  ;;  %v38_v5 = vld [vmem:[#allocation2 + $0x20] sm:$0xff] }
   0xb   :  { %433 = vmatprep.mubr.msk.bf16.mxu0 %vm494_vm1, %v493_v0  ;;  %449 = vmatprep.mubr.msk.bf16.mxu1 %vm494_vm1, %v493_v0 }
   0xc   :  { %v42_v25 = vld [vmem:[#allocation2 + $0x40] sm:$0xff]  ;;  %v43_v33 = vld [vmem:[#allocation2 + $0x48] sm:$0xff] }
   0xd   :  { %v44_v41 = vld [vmem:[#allocation2 + $0x50] sm:$0xff]  ;;  %v45_v52 = vld [vmem:[#allocation2 + $0x58] sm:$0xff] }
   0xe   :  { %v46_v6 = vld [vmem:[#allocation2 + $0x60] sm:$0xff] }
  0x12   :  { %434 = vmatmul.mubr.msk.bf16.gmra.mxu0 %vm19_vm0, %v63_v13  ;;  %450 = vmatmul.mubr.msk.bf16.gmra.mxu1 %vm19_vm0, %v67_v14 }
  0x13   :  { %437 = vmatprep.mubr.msk.bf16.mxu0 %vm494_vm1, %v493_v0  ;;  %453 = vmatprep.mubr.msk.bf16.mxu1 %vm494_vm1, %v493_v0 }
  0x1a   :  { %438 = vmatmul.mubr.msk.bf16.gmra.mxu0 %vm19_vm0, %v64_v19  ;;  %454 = vmatmul.mubr.msk.bf16.gmra.mxu1 %vm19_vm0, %v68_v20  ;;  %v39_v19 = vld [vmem:[#allocation2 + $0x28] sm:$0xff] }
  0x1b   :  { %441 = vmatprep.mubr.msk.bf16.mxu0 %vm494_vm1, %v493_v0 }
  0x22   :  { %442 = vmatmul.mubr.msk.bf16.gmra.mxu0 %vm19_vm0, %v65_v23 }
  0xca   :  { %v141_v26 = vpop.f32.mrf.mxu0  ;;  %v173_v27 = vpop.f32.mrf.mxu1 }
  0xcb   :  { %v196_v28 = vadd.f32 %v141_v26, %v34_v24  ;;  %v204_v29 = vadd.f32 %v173_v27, %v42_v25  ;;  %v47_v24 = vld [vmem:[#allocation2 + $0x68] sm:$0xff] }
  0xcc   :  { %v431_v30 = vpop.f32.mrf.mxu0  ;;  %v447_v31 = vpop.f32.mrf.mxu1 }
  0xcd   :  { %210 = vst.msk [vmem:[#allocation2] sm:$0xff] %vm19_vm0, %v196_v28  ;;  %218 = vst.msk [vmem:[#allocation2 + $0x40] sm:$0xff] %vm19_vm0, %v204_v29 }
  0xce   :  { %v144_v34 = vpop.f32.mrf.mxu0  ;;  %v176_v35 = vpop.f32.mrf.mxu1 }
  0xcf   :  { %v197_v36 = vadd.f32 %v144_v34, %v35_v32  ;;  %v205_v37 = vadd.f32 %v176_v35, %v43_v33 }
  0xd0   :  { %v432_v38 = vpop.f32.mrf.mxu0  ;;  %v448_v39 = vpop.f32.mrf.mxu1 }
  0xd1   :  { %211 = vst.msk [vmem:[#allocation2 + $0x8] sm:$0xff] %vm19_vm0, %v197_v36  ;;  %219 = vst.msk [vmem:[#allocation2 + $0x48] sm:$0xff] %vm19_vm0, %v205_v37 }
  0xd2   :  { %v149_v43 = vpop.f32.mrf.mxu0  ;;  %v181_v44 = vpop.f32.mrf.mxu1 }
  0xd3   :  { %v198_v45 = vadd.f32 %v149_v43, %v36_v40  ;;  %v206_v46 = vadd.f32 %v181_v44, %v44_v41  ;;  %v40_v40 = vld [vmem:[#allocation2 + $0x30] sm:$0xff] }
  0xd4   :  { %v227_v48 = vld [vmem:[#allocation2] sm:$0xff]  ;;  %v435_v50 = vpop.f32.mrf.mxu0  ;;  %v451_v51 = vpop.f32.mrf.mxu1 }
  0xd5   :  { %v235_v49 = vld [vmem:[#allocation2 + $0x40] sm:$0xff]  ;;  %v601_v53 = vadd.f32 %v598_v42, %v227_v48  ;;  %212 = vst.msk [vmem:[#allocation2 + $0x10] sm:$0xff] %vm19_vm0, %v198_v45  ;;  %220 = vst.msk [vmem:[#allocation2 + $0x50] sm:$0xff] %vm19_vm0, %v206_v46 }
  0xd6   :  { %v604_v54 = vadd.f32 %v598_v42, %v235_v49  ;;  %v152_v55 = vpop.f32.mrf.mxu0  ;;  %v184_v56 = vpop.f32.mrf.mxu1 }
  0xd7   :  { %v262_v57 = vmul.f32 %v601_v53, %v601_v53  ;;  %v199_v59 = vadd.f32 %v152_v55, %v37_v47  ;;  %v207_v60 = vadd.f32 %v184_v56, %v45_v52  ;;  %v41_v56 = vld [vmem:[#allocation2 + $0x38] sm:$0xff] }
  0xd8   :  { %v270_v58 = vmul.f32 %v604_v54, %v604_v54  ;;  %v228_v61 = vld [vmem:[#allocation2 + $0x8] sm:$0xff]  ;;  %v436_v63 = vpop.f32.mrf.mxu0  ;;  %v452_v0 = vpop.f32.mrf.mxu1 }
  0xd9   :  { %v236_v62 = vld [vmem:[#allocation2 + $0x48] sm:$0xff]  ;;  %v276_v1 = vmul.f32 %v262_v57, %v601_v53  ;;  %v615_v3 = vadd.f32 %v598_v42, %v228_v61  ;;  %213 = vst.msk [vmem:[#allocation2 + $0x18] sm:$0xff] %vm19_vm0, %v199_v59  ;;  %221 = vst.msk [vmem:[#allocation2 + $0x58] sm:$0xff] %vm19_vm0, %v207_v60 }
  0xda   :  { %v284_v2 = vmul.f32 %v270_v58, %v604_v54  ;;  %v618_v4 = vadd.f32 %v598_v42, %v236_v62  ;;  %v157_v7 = vpop.f32.mrf.mxu0  ;;  %v189_v8 = vpop.f32.mrf.mxu1 }
  0xdb   :  { %v290_v9 = vmul.f32 0.044715, %v276_v1  ;;  %v263_v11 = vmul.f32 %v615_v3, %v615_v3  ;;  %v200_v15 = vadd.f32 %v157_v7, %v38_v5  ;;  %v208_v16 = vadd.f32 %v189_v8, %v46_v6 }
  0xdc   :  { %v298_v10 = vmul.f32 0.044715, %v284_v2  ;;  %v271_v12 = vmul.f32 %v618_v4, %v618_v4  ;;  %v229_v13 = vld [vmem:[#allocation2 + $0x10] sm:$0xff]  ;;  %v439_v17 = vpop.f32.mrf.mxu0  ;;  %v455_v18 = vpop.f32.mrf.mxu1 }
  0xdd   :  { %v237_v14 = vld [vmem:[#allocation2 + $0x50] sm:$0xff]  ;;  %v304_v20 = vadd.f32 %v290_v9, %v601_v53  ;;  %v277_v22 = vmul.f32 %v263_v11, %v615_v3  ;;  %v631_v25 = vadd.f32 %v598_v42, %v229_v13  ;;  %214 = vst.msk [vmem:[#allocation2 + $0x20] sm:$0xff] %vm19_vm0, %v200_v15  ;;  %222 = vst.msk [vmem:[#allocation2 + $0x60] sm:$0xff] %vm19_vm0, %v208_v16 }
  0xde   :  { %v312_v21 = vadd.f32 %v298_v10, %v604_v54  ;;  %v285_v23 = vmul.f32 %v271_v12, %v618_v4  ;;  %v634_v26 = vadd.f32 %v598_v42, %v237_v14  ;;  %v160_v27 = vpop.f32.mrf.mxu0  ;;  %v192_v28 = vpop.f32.mrf.mxu1 }
  0xdf   :  { %v318_v29 = vmul.f32 0.7978846, %v304_v20  ;;  %v291_v31 = vmul.f32 0.044715, %v277_v22  ;;  %v201_v32 = vadd.f32 %v160_v27, %v39_v19  ;;  %v264_v34 = vmul.f32 %v631_v25, %v631_v25 }
  0xe0   :  { %v326_v30 = vmul.f32 0.7978846, %v312_v21  ;;  %v299_v33 = vmul.f32 0.044715, %v285_v23  ;;  %v272_v35 = vmul.f32 %v634_v26, %v634_v26  ;;  %v230_v36 = vld [vmem:[#allocation2 + $0x18] sm:$0xff]  ;;  %v209_v38 = vadd.f32 %v192_v28, %v47_v24  ;;  %v440_v39 = vpop.f32.mrf.mxu0  ;;  %v456_v41 = vpop.f32.mrf.mxu1 }
  0xe1   :  { %v238_v37 = vld [vmem:[#allocation2 + $0x58] sm:$0xff]  ;;  %465 = vtanh.f32 %v318_v29  ;;  %v305_v43 = vadd.f32 %v291_v31, %v615_v3  ;;  %v644_v44 = vadd.f32 %v598_v42, %v230_v36  ;;  %215 = vst.msk [vmem:[#allocation2 + $0x28] sm:$0xff] %vm19_vm0, %v201_v32  ;;  %v278_v47 = vmul.f32 %v264_v34, %v631_v25 }
  0xe2   :  { %v647_v45 = vadd.f32 %v598_v42, %v238_v37  ;;  %467 = vtanh.f32 %v326_v30  ;;  %v313_v46 = vadd.f32 %v299_v33, %v618_v4  ;;  %v286_v48 = vmul.f32 %v272_v35, %v634_v26  ;;  %223 = vst.msk [vmem:[#allocation2 + $0x68] sm:$0xff] %vm19_vm0, %v209_v38  ;;  %v165_v49 = vpop.f32.mrf.mxu0 }
  0xe3   :  { %v319_v50 = vmul.f32 0.7978846, %v305_v43  ;;  %v265_v51 = vmul.f32 %v644_v44, %v644_v44  ;;  %v202_v55 = vadd.f32 %v165_v49, %v40_v40  ;;  %v292_v58 = vmul.f32 0.044715, %v278_v47 }
  0xe4   :  { %v273_v52 = vmul.f32 %v647_v45, %v647_v45  ;;  %v327_v57 = vmul.f32 0.7978846, %v313_v46  ;;  %v300_v59 = vmul.f32 0.044715, %v286_v48  ;;  %v443_v60 = vpop.f32.mrf.mxu0  ;;  %v231_v63 = vld [vmem:[#allocation2 + $0x20] sm:$0xff] }
  0xe5   :  { %469 = vtanh.f32 %v319_v50  ;;  %v279_v61 = vmul.f32 %v265_v51, %v644_v44  ;;  %v239_v0 = vld [vmem:[#allocation2 + $0x60] sm:$0xff]  ;;  %216 = vst.msk [vmem:[#allocation2 + $0x30] sm:$0xff] %vm19_vm0, %v202_v55  ;;  %v306_v1 = vadd.f32 %v292_v58, %v631_v25  ;;  %v664_v5 = vadd.f32 %v598_v42, %v231_v63 }
  0xe6   :  { %v287_v62 = vmul.f32 %v273_v52, %v647_v45  ;;  %471 = vtanh.f32 %v327_v57  ;;  %v314_v2 = vadd.f32 %v300_v59, %v634_v26  ;;  %v168_v6 = vpop.f32.mrf.mxu0  ;;  %v667_v9 = vadd.f32 %v598_v42, %v239_v0 }
  0xe7   :  { %v293_v7 = vmul.f32 0.044715, %v279_v61  ;;  %v203_v10 = vadd.f32 %v168_v6, %v41_v56  ;;  %v320_v11 = vmul.f32 0.7978846, %v306_v1  ;;  %v266_v13 = vmul.f32 %v664_v5, %v664_v5 }
  0xe8   :  { %v301_v8 = vmul.f32 0.044715, %v287_v62  ;;  %v328_v12 = vmul.f32 0.7978846, %v314_v2  ;;  %v232_v14 = vld [vmem:[#allocation2 + $0x28] sm:$0xff]  ;;  %v444_v15 = vpop.f32.mrf.mxu0  ;;  %v274_v18 = vmul.f32 %v667_v9, %v667_v9 }
  0xe9   :  { %v307_v16 = vadd.f32 %v293_v7, %v644_v44  ;;  %v676_v19 = vadd.f32 %v598_v42, %v232_v14  ;;  %v240_v20 = vld [vmem:[#allocation2 + $0x68] sm:$0xff]  ;;  %217 = vst.msk [vmem:[#allocation2 + $0x38] sm:$0xff] %vm19_vm0, %v203_v10  ;;  %473 = vtanh.f32 %v320_v11  ;;  %v280_v21 = vmul.f32 %v266_v13, %v664_v5 }
  0xea   :  { %v315_v17 = vadd.f32 %v301_v8, %v647_v45  ;;  %v681_v22 = vadd.f32 %v598_v42, %v240_v20  ;;  %475 = vtanh.f32 %v328_v12  ;;  %v288_v27 = vmul.f32 %v274_v18, %v667_v9 }
  0xeb   :  { %v321_v23 = vmul.f32 0.7978846, %v307_v16  ;;  %v294_v28 = vmul.f32 0.044715, %v280_v21  ;;  %v267_v29 = vmul.f32 %v676_v19, %v676_v19 }
  0xec   :  { %v329_v24 = vmul.f32 0.7978846, %v315_v17  ;;  %v275_v30 = vmul.f32 %v681_v22, %v681_v22  ;;  %v233_v31 = vld [vmem:[#allocation2 + $0x30] sm:$0xff]  ;;  %v302_v32 = vmul.f32 0.044715, %v288_v27 }
  0xed   :  { %477 = vtanh.f32 %v321_v23  ;;  %v689_v33 = vadd.f32 %v598_v42, %v233_v31  ;;  %v308_v35 = vadd.f32 %v294_v28, %v664_v5  ;;  %v281_v36 = vmul.f32 %v267_v29, %v676_v19 }
  0xee   :  { %v466_v34 = vpop.eup %465  ;;  %479 = vtanh.f32 %v329_v24  ;;  %v289_v37 = vmul.f32 %v275_v30, %v681_v22  ;;  %v316_v40 = vadd.f32 %v302_v32, %v667_v9 }
  0xef   :  { %v468_v38 = vpop.eup %467  ;;  %v346_v39 = vadd.f32 1.0, %v466_v34  ;;  %v268_v41 = vmul.f32 %v689_v33, %v689_v33  ;;  %v322_v46 = vmul.f32 0.7978846, %v308_v35  ;;  %v295_v47 = vmul.f32 0.044715, %v281_v36 }
  0xf0   :  { %v354_v43 = vadd.f32 1.0, %v468_v38  ;;  %v234_v48 = vld [vmem:[#allocation2 + $0x38] sm:$0xff]  ;;  %v330_v50 = vmul.f32 0.7978846, %v316_v40  ;;  %v303_v51 = vmul.f32 0.044715, %v289_v37 }
  0xf1   :  { %v360_v49 = vmul.f32 0.5, %v346_v39  ;;  %v282_v52 = vmul.f32 %v268_v41, %v689_v33  ;;  %481 = vtanh.f32 %v322_v46  ;;  %v309_v57 = vadd.f32 %v295_v47, %v676_v19 }
  0xf2   :  { %v470_v55 = vpop.eup %469  ;;  %v368_v56 = vmul.f32 0.5, %v354_v43  ;;  %v700_v58 = vadd.f32 %v598_v42, %v234_v48  ;;  %483 = vtanh.f32 %v330_v50  ;;  %v317_v62 = vadd.f32 %v303_v51, %v681_v22 }
  0xf3   :  { %v472_v59 = vpop.eup %471  ;;  %v374_v60 = vmul.f32 %v360_v49, %v601_v53  ;;  %v347_v61 = vadd.f32 1.0, %v470_v55  ;;  %v323_v1 = vmul.f32 0.7978846, %v309_v57  ;;  %v296_v2 = vmul.f32 0.044715, %v282_v52 }
  0xf4   :  { %v382_v63 = vmul.f32 %v368_v56, %v604_v54  ;;  %v355_v0 = vadd.f32 1.0, %v472_v59  ;;  %v331_v42 = vmul.f32 0.7978846, %v317_v62  ;;  %v269_v7 = vmul.f32 %v700_v58, %v700_v58 }
  0xf5   :  { %388 = vst.msk [vmem:[%s781_s3] sm:$0xff] %vm19_vm0, %v374_v60  ;;  %v361_v6 = vmul.f32 0.5, %v347_v61  ;;  %485 = vtanh.f32 %v323_v1  ;;  %v310_v54 = vadd.f32 %v296_v2, %v689_v33 }
  0xf6   :  { %396 = vst.msk [vmem:[%s781_s3 + $0x40] sm:$0xff] %vm19_vm0, %v382_v63  ;;  %v369_v53 = vmul.f32 0.5, %v355_v0  ;;  %v474_v8 = vpop.eup %473  ;;  %487 = vtanh.f32 %v331_v42  ;;  %v283_v11 = vmul.f32 %v269_v7, %v700_v58 }
  0xf7   :  { %v375_v10 = vmul.f32 %v361_v6, %v615_v3  ;;  %v476_v12 = vpop.eup %475  ;;  %v348_v14 = vadd.f32 1.0, %v474_v8  ;;  %v324_v15 = vmul.f32 0.7978846, %v310_v54 }
  0xf8   :  { %v383_v13 = vmul.f32 %v369_v53, %v618_v4  ;;  %v356_v16 = vadd.f32 1.0, %v476_v12  ;;  %v297_v17 = vmul.f32 0.044715, %v283_v11 }
  0xf9   :  { %389 = vst.msk [vmem:[%s781_s3 + $0x8] sm:$0xff] %vm19_vm0, %v375_v10  ;;  %v362_v3 = vmul.f32 0.5, %v348_v14  ;;  %489 = vtanh.f32 %v324_v15 }
  0xfa   :  { %v478_v18 = vpop.eup %477  ;;  %397 = vst.msk [vmem:[%s781_s3 + $0x48] sm:$0xff] %vm19_vm0, %v383_v13  ;;  %v370_v21 = vmul.f32 0.5, %v356_v16  ;;  %v311_v23 = vadd.f32 %v297_v17, %v700_v58 }
  0xfb   :  { %v480_v20 = vpop.eup %479  ;;  %v349_v4 = vadd.f32 1.0, %v478_v18  ;;  %v376_v24 = vmul.f32 %v362_v3, %v631_v25 }
  0xfc   :  { %v357_v27 = vadd.f32 1.0, %v480_v20  ;;  %v384_v28 = vmul.f32 %v370_v21, %v634_v26  ;;  %v325_v30 = vmul.f32 0.7978846, %v311_v23 }
  0xfd   :  { %v363_v29 = vmul.f32 0.5, %v349_v4  ;;  %390 = vst.msk [vmem:[%s781_s3 + $0x10] sm:$0xff] %vm19_vm0, %v376_v24 }
  0xfe   :  { %v371_v31 = vmul.f32 0.5, %v357_v27  ;;  %v482_v32 = vpop.eup %481  ;;  %398 = vst.msk [vmem:[%s781_s3 + $0x50] sm:$0xff] %vm19_vm0, %v384_v28  ;;  %491 = vtanh.f32 %v325_v30 }
  0xff   :  { %v377_v34 = vmul.f32 %v363_v29, %v644_v44  ;;  %v484_v25 = vpop.eup %483  ;;  %v350_v35 = vadd.f32 1.0, %v482_v32 }
 0x100   :  { %v385_v26 = vmul.f32 %v371_v31, %v647_v45  ;;  %v358_v36 = vadd.f32 1.0, %v484_v25 }
 0x101   :  { %391 = vst.msk [vmem:[%s781_s3 + $0x18] sm:$0xff] %vm19_vm0, %v377_v34  ;;  %v364_v37 = vmul.f32 0.5, %v350_v35 }
 0x102   :  { %399 = vst.msk [vmem:[%s781_s3 + $0x58] sm:$0xff] %vm19_vm0, %v385_v26  ;;  %v486_v38 = vpop.eup %485  ;;  %v372_v39 = vmul.f32 0.5, %v358_v36 }
 0x103   :  { %v488_v44 = vpop.eup %487  ;;  %v378_v40 = vmul.f32 %v364_v37, %v664_v5  ;;  %v351_v41 = vadd.f32 1.0, %v486_v38 }
 0x104   :  { %v386_v45 = vmul.f32 %v372_v39, %v667_v9  ;;  %v359_v43 = vadd.f32 1.0, %v488_v44 }
 0x105   :  { %392 = vst.msk [vmem:[%s781_s3 + $0x20] sm:$0xff] %vm19_vm0, %v378_v40  ;;  %v365_v46 = vmul.f32 0.5, %v351_v41 }
 0x106   :  { %v490_v47 = vpop.eup %489  ;;  %400 = vst.msk [vmem:[%s781_s3 + $0x60] sm:$0xff] %vm19_vm0, %v386_v45  ;;  %v373_v48 = vmul.f32 0.5, %v359_v43 }
 0x107   :  { %v379_v49 = vmul.f32 %v365_v46, %v676_v19  ;;  %v352_v5 = vadd.f32 1.0, %v490_v47 }
 0x108   :  { %v387_v50 = vmul.f32 %v373_v48, %v681_v22 }
 0x109   :  { %393 = vst.msk [vmem:[%s781_s3 + $0x28] sm:$0xff] %vm19_vm0, %v379_v49  ;;  %v366_v9 = vmul.f32 0.5, %v352_v5 }
 0x10a   :  { %401 = vst.msk [vmem:[%s781_s3 + $0x68] sm:$0xff] %vm19_vm0, %v387_v50 }
 0x10b   :  { %v492_v51 = vpop.eup %491  ;;  %v380_v52 = vmul.f32 %v366_v9, %v689_v33 }
 0x10c   :  { %v353_v55 = vadd.f32 1.0, %v492_v51 }
 0x10d   :  { %394 = vst.msk [vmem:[%s781_s3 + $0x30] sm:$0xff] %vm19_vm0, %v380_v52 }
 0x10e   :  { %v367_v19 = vmul.f32 0.5, %v353_v55 }
 0x110   :  { %v381_v22 = vmul.f32 %v367_v19, %v700_v58 }
 0x112   :  { %395 = vst.msk [vmem:[%s781_s3 + $0x38] sm:$0xff] %vm19_vm0, %v381_v22 }

// kernel: spacetimeformer_forward.63
= control target key start
LH: loop header
LB: loop body
LE: loop exit
PB: predicated region body
PF: predicated region fallthrough
CT: control target
= control target key end

     0   :  { %s976_s9 = smov 0   ;;  %s1189_s0 = inlined_call_operand.vmem [shape: f32[2,56,32], index: 0, kind: input, shape index: {}]   ;;  %s1190_s1 = inlined_call_operand.vmem [shape: f32[2,56,64], index: 1, kind: input, shape index: {}]   ;;  %s1191_s2 = inlined_call_operand.vmem [shape: f32[2,56,32], index: 2, kind: output, shape index: {}]  }
   0x1 LB: > { %s817_s10 = sadd.s32 4294967295, %s953_s9   ;;  %p821_p0 = scmp.ge.s32.totalorder %s953_s9, 1  ;;  %s953_s9 = sphi %s976_s9, %s12_s9  }
   0x2   : > { %p122_p1 = scmp.lt.s32.totalorder %s953_s9, 3 }
   0x4   : > { %p123_p2 = pnand %p821_p0, %p122_p1 }
   0x5   : > { %p149_p3 = scmp.lt.s32.totalorder (!%p123_p2), %s817_s10, 1  ;;  %s956_s15 = smov (!%p123_p2), 96  }
   0x6   : > { %126 = sbr.rel (%p123_p2) target bundleno = 897 (0x381), region = 28  ;;  %s958_s19 = smov (!%p123_p2), 112  }
   0x7   : > { %s959_s20 = smov (!%p123_p2), 80   ;;  %s960_s21 = smov (!%p123_p2), 16  }
   0xb   : > { %v955_v0 = vmov 0.0   ;;  %s1193_s10 = smov (!%p149_p3, %s817_s10), 1  ;;  %vm286_vm0 = vcmask 130048   ;;  %vm957_vm1 = vmmov 0   ;;  %vm610_vm2 = vcmask 261248  }
   0xc   : > { %857 = vmatprep.subr.bf16.mxu0 %v955_v0  ;;  %s985_s11 = smul.u32 56, %s1193_s10  ;;  %865 = vmatprep.mubr.msk.bf16.mxu0 %vm957_vm1, %v955_v0  ;;  %vm236_vm3 = vcmask 1043456   ;;  %vm232_vm4 = vcmask 457728   ;;  %vm742_vm5 = vcmask 261120  }
   0xe   : > { %s158_s14 = scalar_lea.vmem %s1190_s1, %s985_s11  ;;  %s1003_s18 = scalar_lea.vmem %s1189_s0, %s985_s11 }
   0xf   : > { %v178_v1 = vld [vmem:[%s158_s14 + $0x30] sm:$0xff]  ;;  %v176_v2 = vld [vmem:[%s158_s14 + $0x20] sm:$0xff]  ;;  %v177_v3 = vld [vmem:[%s158_s14 + $0x28] sm:$0xff]  ;;  %s1157_s24 = scalar_lea.vmem %s1191_s2, %s985_s11 }
  0x10   : > { %v200_v4 = vpack.c.bf16 %v178_v1, %v178_v1  ;;  %v174_v5 = vld [vmem:[%s158_s14 + $0x10] sm:$0xff]  ;;  %v175_v6 = vld [vmem:[%s158_s14 + $0x18] sm:$0xff]  ;;  %v172_v8 = vld [vmem:[%s158_s14] sm:$0xff]  ;;  %v199_v10 = vpack.c.bf16 %v177_v3, %v176_v2  ;;  %v190_v19 = vmax.f32 %v176_v2, 0.0  ;;  %v191_v28 = vmax.f32 %v177_v3, 0.0 }
  0x11   : > { %v991_v7 = vpack.c.bf16 %v175_v6, %v174_v5  ;;  %v173_v9 = vld [vmem:[%s158_s14 + $0x8] sm:$0xff]  ;;  %v186_v12 = vmax.f32 %v172_v8, 0.0  ;;  %v188_v13 = vmax.f32 %v174_v5, 0.0  ;;  %v189_v16 = vmax.f32 %v175_v6, 0.0  ;;  %v165_v21 = vld [vmem:[%s1003_s18] sm:$0xff]  ;;  %v167_v61 = vld [vmem:[%s1003_s18 + $0x10] sm:$0xff] }
  0x12   : > { %227 = vrot.lane.b32.xlu0 %v200_v4, %s956_s15  ;;  %v197_v11 = vpack.c.bf16 %v173_v9, %v172_v8  ;;  %v187_v14 = vmax.f32 %v173_v9, 0.0  ;;  %v166_v22 = vld [vmem:[%s1003_s18 + $0x8] sm:$0xff]  ;;  %v1008_v25 = vmax.f32 %v165_v21, 0.0  ;;  %v370_v29 = vsel %vm286_vm0, %v190_v19, 0.0  ;;  %v169_v56 = vld [vmem:[%s1003_s18 + $0x20] sm:$0xff]  ;;  %v168_v62 = vld [vmem:[%s1003_s18 + $0x18] sm:$0xff] }
  0x13   : > { %223 = vrot.lane.b32.xlu1 %v991_v7, %s956_s15  ;;  %v363_v15 = vsel %vm286_vm0, %v186_v12, 0.0  ;;  %v366_v17 = vsel %vm286_vm0, %v188_v13, 0.0  ;;  %v368_v23 = vsel %vm286_vm0, %v189_v16, 0.0  ;;  %v1010_v26 = vmax.f32 %v166_v22, 0.0  ;;  %v170_v57 = vld [vmem:[%s1003_s18 + $0x28] sm:$0xff] }
  0x14   : > { %v364_v18 = vsel %vm286_vm0, %v187_v14, 0.0  ;;  %v193_v24 = vpack.c.bf16 %v187_v14, %v186_v12  ;;  %v192_v32 = vmax.f32 %v178_v1, 0.0  ;;  %v372_v33 = vsel %vm286_vm0, %v191_v28, 0.0 }
  0x15   : > { %v365_v20 = vadd.f32 %v364_v18, %v363_v15  ;;  %v281_v30 = vpack.c.bf16 %v1010_v26, %v1008_v25  ;;  %v194_v34 = vpack.c.bf16 %v189_v16, %v188_v13  ;;  %v195_v38 = vpack.c.bf16 %v191_v28, %v190_v19 }
  0x16   : > { %225 = vrot.lane.b32.xlu0 %v199_v10, %s956_s15  ;;  %v374_v36 = vsel %vm286_vm0, %v192_v32, 0.0  ;;  %v611_v40 = vsel %vm610_vm2, %v186_v12, 0.0  ;;  %v612_v41 = vsel %vm610_vm2, %v187_v14, 0.0  ;;  %v196_v43 = vpack.c.bf16 %v192_v32, %v192_v32 }
  0x17   : > { %221 = vrot.lane.b32.xlu1 %v197_v11, %s956_s15  ;;  %v367_v27 = vadd.f32 %v366_v17, %v365_v20  ;;  %871 = vmatprep.mubr.msk.bf16.mxu1 %vm286_vm0, %v281_v30  ;;  %v613_v42 = vadd.f32 %v612_v41, %v611_v40  ;;  %v614_v44 = vsel %vm610_vm2, %v188_v13, 0.0  ;;  %v616_v46 = vsel %vm610_vm2, %v189_v16, 0.0 }
  0x18   : > { %v618_v48 = vsel %vm610_vm2, %v190_v19, 0.0  ;;  %v620_v50 = vsel %vm610_vm2, %v191_v28, 0.0  ;;  %v622_v52 = vsel %vm610_vm2, %v192_v32, 0.0  ;;  %v1034_v59 = vmax.f32 %v169_v56, 0.0 }
  0x19   : > { %v369_v31 = vadd.f32 %v368_v23, %v367_v27  ;;  %v615_v45 = vadd.f32 %v614_v44, %v613_v42  ;;  %v1036_v60 = vmax.f32 %v170_v57, 0.0  ;;  %v1045_v2 = vmax.f32 %v167_v61, 0.0 }
  0x1a   : > { %v1047_v3 = vmax.f32 %v168_v62, 0.0 }
  0x1b   : > { %435 = vrot.lane.b32.xlu1 %v193_v24, %s958_s19  ;;  %v371_v35 = vadd.f32 %v370_v29, %v369_v31  ;;  %v617_v47 = vadd.f32 %v616_v46, %v615_v45  ;;  %v1043_v1 = vpack.c.bf16 %v1036_v60, %v1034_v59 }
  0x1c   : > { %v1054_v6 = vpack.c.bf16 %v1047_v3, %v1045_v2 }
  0x1d   : > { %v373_v37 = vadd.f32 %v372_v33, %v371_v35  ;;  %v619_v49 = vadd.f32 %v618_v48, %v617_v47 }
  0x1f   : > { %437 = vrot.lane.b32.xlu1 %v194_v34, %s958_s19  ;;  %v1020_v39 = vadd.f32 %v374_v36, %v373_v37  ;;  %v621_v51 = vadd.f32 %v620_v50, %v619_v49 }
  0x21   : > { %v623_v53 = vadd.f32 %v622_v52, %v621_v51  ;;  %v376_v35 = vrot.slane %v1020_v39, 4 }
  0x23   : > { %439 = vrot.lane.b32.xlu1 %v195_v38, %s958_s19  ;;  %v624_v54 = vrot.slane %v623_v53, 4  ;;  %v377_v37 = vadd.f32 %v376_v35, %v1020_v39 }
  0x25   : > { %v625_v55 = vadd.f32 %v624_v54, %v623_v53  ;;  %v378_v41 = vrot.slane %v377_v37, 2 }
  0x27   : > { %441 = vrot.lane.b32.xlu1 %v196_v43, %s958_s19  ;;  %v626_v58 = vrot.slane %v625_v55, 2  ;;  %v379_v44 = vadd.f32 %v378_v41, %v377_v37 }
  0x29   : > { %v627_v63 = vadd.f32 %v626_v58, %v625_v55  ;;  %v380_v47 = vrot.slane %v379_v44, 1 }
  0x2b   : > { %469 = vrot.lane.b32.xlu1 %v200_v4, %s959_s20  ;;  %v171_v4 = vld [vmem:[%s1003_s18 + $0x30] sm:$0xff]  ;;  %v628_v5 = vrot.slane %v627_v63, 1  ;;  %v381_v51 = vadd.f32 %v380_v47, %v379_v44 }
  0x2d   : > { %v629_v8 = vadd.f32 %v628_v5, %v627_v63  ;;  %v383_v53 = vmul.f32 %v381_v51, %v1010_v26  ;;  %v385_v57 = vmul.f32 %v381_v51, %v1047_v3  ;;  %v387_v62 = vmul.f32 %v381_v51, %v1036_v60 }
  0x2f   : > { %467 = vrot.lane.b32.xlu1 %v199_v10, %s959_s20  ;;  %v630_v10 = vmul.f32 %v629_v8, %v1008_v25  ;;  %v632_v12 = vmul.f32 %v629_v8, %v1045_v2  ;;  %v633_v13 = vmul.f32 %v629_v8, %v1047_v3  ;;  %v634_v14 = vmul.f32 %v629_v8, %v1034_v59 }
  0x30   : > { %v635_v28 = vmul.f32 %v629_v8, %v1036_v60  ;;  %v392_v56 = vsel %vm286_vm0, %v383_v53, 0.0  ;;  %v398_v61 = vsel %vm286_vm0, %v385_v57, 0.0  ;;  %v384_v3 = vmul.f32 %v381_v51, %v1045_v2 }
  0x31   : > { %v386_v60 = vmul.f32 %v381_v51, %v1034_v59 }
  0x33   : > { %465 = vrot.lane.b32.xlu1 %v991_v7, %s959_s20  ;;  %v1056_v7 = vmax.f32 %v171_v4, 0.0  ;;  %v404_v4 = vsel %vm286_vm0, %v387_v62, 0.0 }
  0x34   : > { %201 = vxpose.xlu0.c.b16.start [1/4] (short) (narrow) %v193_v24, 16 }
  0x35   : > { %v1062_v9 = vpack.c.bf16 %v1056_v7, %v1056_v7  ;;  %v636_v15 = vmul.f32 %v629_v8, %v1056_v7 }
  0x37   : > { %463 = vrot.lane.b32.xlu1 %v197_v11, %s959_s20  ;;  %v631_v11 = vmul.f32 %v629_v8, %v1010_v26  ;;  %v382_v26 = vmul.f32 %v381_v51, %v1008_v25 }
  0x38   : > { %202 = vxpose.xlu0.c.b16.cont [2/4] (short) (narrow) %v194_v34, 16 }
  0x3c   : > { %203 = vxpose.xlu0.c.b16.cont [3/4] (short) (narrow) %v195_v38, 16 }
  0x40   : > { %204 = vxpose.xlu0.c.b16.end [4/4] (short) (narrow) %v196_v43, 16 }
  0x49   : > { %526 = vrot.lane.b32.xlu0 %v281_v30, %s958_s19 }
  0x4d   : > { %530 = vrot.lane.b32.xlu0 %v1043_v1, %s958_s19 }
  0x51   : > { %528 = vrot.lane.b32.xlu0 %v1054_v6, %s958_s19 }
  0x55   : > { %532 = vrot.lane.b32.xlu0 %v1062_v9, %s958_s19 }
  0x59   : > { %644 = vrot.lane.b32.xlu0 %v630_v10, %s958_s19  ;;  %v389_v10 = vsel %vm286_vm0, %v382_v26, 0.0 }
  0x5d   : > { %646 = vrot.lane.b32.xlu0 %v631_v11, %s958_s19  ;;  %v395_v11 = vsel %vm286_vm0, %v384_v3, 0.0 }
  0x61   : > { %648 = vrot.lane.b32.xlu0 %v632_v12, %s958_s19  ;;  %v401_v12 = vsel %vm286_vm0, %v386_v60, 0.0 }
  0x65   : > { %650 = vrot.lane.b32.xlu0 %v633_v13, %s958_s19  ;;  %v388_v13 = vmul.f32 %v381_v51, %v1056_v7 }
  0x67   : > { %v407_v25 = vsel %vm286_vm0, %v388_v13, 0.0 }
  0x69   : > { %652 = vrot.lane.b32.xlu0 %v634_v14, %s958_s19 }
  0x6d   : > { %656 = vrot.lane.b32.xlu0 %v636_v15, %s958_s19 }
  0x84   : > { %v228_v16 = vpop.permute.xlu0 %227 }
  0x85   : > { %v238_v17 = vsel %vm236_vm3, %v228_v16, 0  ;;  %v224_v18 = vpop.permute.xlu1 %223 }
  0x86   : > { %858 = vmatpush3.bf16.msra.mxu0 %v238_v17 }
  0x87   : > { %859 = vmatprep.subr.bf16.mxu0 %v955_v0 }
  0x88   : > { %v226_v19 = vpop.permute.xlu0 %225 }
  0x89   : > { %v222_v20 = vpop.permute.xlu1 %221 }
  0x8a   : > { %860 = vmatpush3.bf16.msra.mxu0 %v226_v19 }
  0x8b   : > { %861 = vmatprep.subr.bf16.mxu0 %v955_v0 }
  0x8d   : > { %v436_v21 = vpop.permute.xlu1 %435 }
  0x8e   : > { %862 = vmatpush3.bf16.msra.mxu0 %v224_v18  ;;  %447 = vxpose.xlu1.c.b16.start [1/4] (short) (narrow) %v436_v21, 16 }
  0x8f   : > { %863 = vmatprep.subr.bf16.mxu0 %v955_v0 }
  0x91   : > { %v438_v22 = vpop.permute.xlu1 %437 }
  0x92   : > { %864 = vmatpush3.bf16.msra.mxu0 %v222_v20  ;;  %448 = vxpose.xlu1.c.b16.cont [2/4] (short) (narrow) %v438_v22, 16 }
  0x95   : > { %v440_v23 = vpop.permute.xlu1 %439 }
  0x96   : > { %v209_v24 = vpop.trf.xlu0  ;;  %449 = vxpose.xlu1.c.b16.cont [3/4] (short) (narrow) %v440_v23, 16 }
  0x97   : > { %866 = vmatmul.mubr.msk.bf16.vlgmr.msra.gmra.mxu0 %vm232_vm4, %v209_v24 }
  0x99   : > { %v442_v27 = vpop.permute.xlu1 %441 }
  0x9a   : > { %450 = vxpose.xlu1.c.b16.end [4/4] (short) (narrow) %v442_v27, 16 }
  0x9d   : > { %v470_v29 = vpop.permute.xlu1 %469 }
  0x9e   : > { %654 = vrot.lane.b32.xlu1 %v635_v28, %s958_s19  ;;  %v1086_v30 = vsel %vm236_vm3, %v470_v29, 0 }
  0xa1   : > { %v468_v48 = vpop.permute.xlu1 %467 }
  0xa5   : > { %v466_v52 = vpop.permute.xlu1 %465 }
  0xa9   : > { %v464_v58 = vpop.permute.xlu1 %463 }
  0xbb   : > { %v527_v31 = vpop.permute.xlu0 %526 }
  0xbc   : > { %893 = vmatprep.mubr.msk.bf16.mxu0 %vm286_vm0, %v527_v31 }
  0xbf   : > { %v1089_v32 = vpop.permute.xlu0 %530 }
  0xc3   : > { %v1091_v33 = vpop.permute.xlu0 %528 }
  0xc7   : > { %v1093_v34 = vpop.permute.xlu0 %532 }
  0xcb   : > { %v645_v36 = vpop.permute.xlu0 %644 }
  0xcc   : > { %v665_v38 = vsel %vm286_vm0, %v645_v36, 0.0 }
  0xcd   : > { %666 = vadd.xlane.f32.xlu1 %v665_v38 }
  0xcf   : > { %v647_v40 = vpop.permute.xlu0 %646 }
  0xd0   : > { %v668_v42 = vsel %vm286_vm0, %v647_v40, 0.0 }
  0xd1   : > { %669 = vadd.xlane.f32.xlu0 %v668_v42 }
  0xd3   : > { %v649_v43 = vpop.permute.xlu0 %648 }
  0xd4   : > { %v671_v45 = vsel %vm286_vm0, %v649_v43, 0.0 }
  0xd5   : > { %672 = vadd.xlane.f32.xlu0 %v671_v45 }
  0xd7   : > { %v651_v46 = vpop.permute.xlu0 %650 }
  0xd8   : > { %v674_v49 = vsel %vm286_vm0, %v651_v46, 0.0 }
  0xd9   : > { %675 = vadd.xlane.f32.xlu1 %v674_v49 }
  0xdb   : > { %v653_v39 = vpop.permute.xlu0 %652 }
  0xdc   : > { %v677_v50 = vsel %vm286_vm0, %v653_v39, 0.0 }
  0xdd   : > { %678 = vadd.xlane.f32.xlu0 %v677_v50 }
  0xdf   : > { %v657_v54 = vpop.permute.xlu0 %656 }
  0xe0   : > { %v683_v55 = vsel %vm286_vm0, %v657_v54, 0.0 }
  0xe1   : > { %684 = vadd.xlane.f32.xlu0 %v683_v55 }
  0xe5   : > { %393 = vadd.xlane.f32.xlu0 %v392_v56 }
  0xe9   : > { %399 = vadd.xlane.f32.xlu0 %v398_v61 }
  0xed   : > { %405 = vadd.xlane.f32.xlu0 %v404_v4 }
  0xf0   : > { %v455_v63 = vpop.trf.xlu1 }
 0x110   : > { %v655_v5 = vpop.permute.xlu1 %654 }
 0x111   : > { %v680_v8 = vsel %vm286_vm0, %v655_v5, 0.0 }
 0x112   : > { %681 = vadd.xlane.f32.xlu1 %v680_v8 }
 0x116   : > { %390 = vadd.xlane.f32.xlu1 %v389_v10 }
 0x11a   : > { %396 = vadd.xlane.f32.xlu1 %v395_v11 }
 0x11e   : > { %402 = vadd.xlane.f32.xlu1 %v401_v12 }
 0x122   : > { %408 = vadd.xlane.f32.xlu1 %v407_v25 }
 0x156   : > { %v667_v28 = vpop.xlane.xlu1 %666 }
 0x157   : > { %v274_v14 = vpop.f32.mrf.mxu0  ;;  %v686_v31 = vadd.f32 1e-06, %v667_v28 }
 0x159   : > { %v867_v15 = vpop.f32.mrf.mxu0 }
 0x15a   : > { %v670_v27 = vpop.xlane.xlu0 %669 }
 0x15b   : > { %v277_v16 = vpop.f32.mrf.mxu0  ;;  %v687_v38 = vadd.f32 1e-06, %v670_v27 }
 0x15c   : > { %v285_v17 = vpack.c.bf16 %v277_v16, %v274_v14 }
 0x15d   : > { %v868_v18 = vpop.f32.mrf.mxu0 }
 0x15e   : > { %869 = vmatprep.subr.bf16.mxu1 %v285_v17  ;;  %v673_v29 = vpop.xlane.xlu0 %672 }
 0x15f   : > { %870 = vmatpush3.bf16.msra.mxu1 %v285_v17 }
 0x160   : > { %879 = vmatprep.subr.bf16.mxu1 %v955_v0 }
 0x162   : > { %872 = vmatmul.mubr.msk.bf16.vlgmr.msra.gmra.mxu1 %vm286_vm0, %v1054_v6 }
 0x163   : > { %880 = vmatpush3.bf16.msra.mxu1 %v1086_v30  ;;  %875 = vmatprep.mubr.msk.bf16.mxu1 %vm286_vm0, %v1043_v1  ;;  %v688_v30 = vadd.f32 1e-06, %v673_v29 }
 0x164   : > { %881 = vmatprep.subr.bf16.mxu1 %v955_v0 }
 0x165   : > { %919 = vrcp.f32 %v688_v30 }
 0x166   : > { %v679_v35 = vpop.xlane.xlu0 %678  ;;  %921 = vrcp.f32 %v686_v31 }
 0x167   : > { %882 = vmatpush3.bf16.msra.mxu1 %v468_v48  ;;  %v690_v36 = vadd.f32 1e-06, %v679_v35 }
 0x168   : > { %883 = vmatprep.subr.bf16.mxu1 %v955_v0 }
 0x169   : > { %923 = vrcp.f32 %v690_v36 }
 0x16a   : > { %876 = vmatmul.mubr.msk.bf16.gmra.mxu1 %vm286_vm0, %v1062_v9  ;;  %v685_v42 = vpop.xlane.xlu0 %684 }
 0x16b   : > { %884 = vmatpush3.bf16.msra.mxu1 %v466_v52  ;;  %887 = vmatprep.mubr.msk.bf16.mxu1 %vm957_vm1, %v955_v0 }
 0x16c   : > { %885 = vmatprep.subr.bf16.mxu1 %v955_v0 }
 0x16e   : > { %v394_v8 = vpop.xlane.xlu0 %393 }
 0x16f   : > { %886 = vmatpush3.bf16.msra.mxu1 %v464_v58  ;;  %v411_v14 = vadd.f32 1e-06, %v394_v8 }
 0x172   : > { %888 = vmatmul.mubr.msk.bf16.vlgmr.msra.gmra.mxu1 %vm232_vm4, %v455_v63  ;;  %v400_v60 = vpop.xlane.xlu0 %399 }
 0x173   : > { %897 = vmatprep.mubr.msk.bf16.mxu1 %vm286_vm0, %v1089_v32  ;;  %v676_v32 = vpop.xlane.xlu1 %675  ;;  %v413_v13 = vadd.f32 1e-06, %v400_v60 }
 0x174   : > { %v689_v37 = vadd.f32 1e-06, %v676_v32 }
 0x176   : > { %925 = vrcp.f32 %v689_v37  ;;  %v406_v25 = vpop.xlane.xlu0 %405 }
 0x177   : > { %927 = vrcp.f32 %v687_v38  ;;  %v415_v16 = vadd.f32 1e-06, %v406_v25 }
 0x19b   : > { %v682_v40 = vpop.xlane.xlu1 %681 }
 0x19c   : > { %v691_v41 = vadd.f32 1e-06, %v682_v40 }
 0x19e   : > { %929 = vrcp.f32 %v691_v41 }
 0x19f   : > { %v391_v26 = vpop.xlane.xlu1 %390 }
 0x1a0   : > { %v410_v3 = vadd.f32 1e-06, %v391_v26 }
 0x1a3   : > { %v397_v5 = vpop.xlane.xlu1 %396 }
 0x1a4   : > { %v412_v10 = vadd.f32 1e-06, %v397_v5 }
 0x1a7   : > { %v403_v11 = vpop.xlane.xlu1 %402 }
 0x1a8   : > { %v414_v12 = vadd.f32 1e-06, %v403_v11 }
 0x1ab   : > { %v409_v15 = vpop.xlane.xlu1 %408 }
 0x1ac   : > { %v416_v17 = vadd.f32 1e-06, %v409_v15 }
 0x222   : > { %v1134_v59 = vpop.f32.mrf.mxu1 }
 0x224   : > { %v1136_v1 = vpop.f32.mrf.mxu1 }
 0x226   : > { %v1138_v2 = vpop.f32.mrf.mxu1 }
 0x228   : > { %v1140_v6 = vpop.f32.mrf.mxu1 }
 0x22a   : > { %v1142_v7 = vpop.f32.mrf.mxu1 }
 0x22c   : > { %v1144_v9 = vpop.f32.mrf.mxu1 }
 0x22e   : > { %v878_v19 = vpop.f32.mrf.mxu1 }
 0x230   : > { %v1146_v0 = vpop.f32.mrf.mxu1 }
 0x232   : > { %v514_v20 = vpop.f32.mrf.mxu1 }
 0x234   : > { %v889_v21 = vpop.f32.mrf.mxu1 }
 0x236   : > { %v517_v22 = vpop.f32.mrf.mxu1 }
 0x237   : > { %v521_v23 = vpack.c.bf16 %v517_v22, %v514_v20 }
 0x238   : > { %v890_v24 = vpop.f32.mrf.mxu1 }
 0x239   : > { %891 = vmatprep.subr.bf16.mxu0 %v521_v23  ;;  %901 = vmatprep.subr.bf16.mxu1 %v521_v23 }
 0x23a   : > { %892 = vmatpush3.bf16.msra.mxu0 %v521_v23  ;;  %902 = vmatpush3.bf16.msra.mxu1 %v521_v23 }
 0x23d   : > { %894 = vmatmul.mubr.msk.bf16.vlgmr.msra.gmra.mxu0 %vm286_vm0, %v1091_v33  ;;  %898 = vmatmul.mubr.msk.bf16.vlgmr.msra.gmra.mxu1 %vm286_vm0, %v1093_v34  ;;  %v692_v33 = vadd.f32 1e-06, %v685_v42  ;;  %v920_v34 = vpop.eup %919 }
 0x23e   : > { %v922_v45 = vpop.eup %921 }
 0x23f   : > { %931 = vrcp.f32 %v692_v33  ;;  %v924_v47 = vpop.eup %923 }
 0x240   : > { %v926_v53 = vpop.eup %925  ;;  %933 = vrcp.f32 %v412_v10 }
 0x241   : > { %v928_v55 = vpop.eup %927  ;;  %935 = vrcp.f32 %v410_v3 }
 0x242   : > { %v930_v57 = vpop.eup %929  ;;  %937 = vrcp.f32 %v414_v12 }
 0x243   : > { %939 = vrcp.f32 %v413_v13 }
 0x244   : > { %941 = vrcp.f32 %v411_v14 }
 0x245   : > { %943 = vrcp.f32 %v415_v16 }
 0x246   : > { %945 = vrcp.f32 %v416_v17 }
 0x24c   : > { %v932_v62 = vpop.eup %931 }
 0x24d   : > { %v934_v18 = vpop.eup %933 }
 0x24e   : > { %v936_v19 = vpop.eup %935  ;;  %v422_v20 = vmul.f32 %v934_v18, %v1134_v59 }
 0x24f   : > { %v938_v21 = vpop.eup %937  ;;  %v418_v23 = vmul.f32 %v936_v19, %v1136_v1 }
 0x250   : > { %v940_v27 = vpop.eup %939  ;;  %v426_v28 = vmul.f32 %v938_v21, %v1144_v9 }
 0x251   : > { %v942_v30 = vpop.eup %941  ;;  %v424_v32 = vmul.f32 %v940_v27, %v1138_v2 }
 0x252   : > { %v944_v35 = vpop.eup %943  ;;  %v420_v37 = vmul.f32 %v942_v30, %v1140_v6 }
 0x253   : > { %v946_v38 = vpop.eup %945  ;;  %v428_v41 = vmul.f32 %v944_v35, %v1146_v0 }
 0x254   : > { %v430_v33 = vmul.f32 %v946_v38, %v1142_v7 }
 0x2fd   : > { %v895_v43 = vpop.f32.mrf.mxu0  ;;  %v899_v44 = vpop.f32.mrf.mxu1 }
 0x2fe   : > { %v698_v46 = vmul.f32 %v920_v34, %v895_v43  ;;  %v706_v4 = vmul.f32 %v932_v62, %v899_v44 }
 0x2ff   : > { %v580_v48 = vpop.f32.mrf.mxu0  ;;  %v596_v49 = vpop.f32.mrf.mxu1 }
 0x300   : > { %v694_v39 = vmul.f32 %v922_v45, %v580_v48  ;;  %718 = vrot.lane.b32.xlu1 %v698_v46, %s960_s21  ;;  %v702_v52 = vmul.f32 %v924_v47, %v596_v49 }
 0x301   : > { %v896_v50 = vpop.f32.mrf.mxu0  ;;  %v900_v51 = vpop.f32.mrf.mxu1 }
 0x302   : > { %714 = vrot.lane.b32.xlu0 %v694_v39, %s960_s21  ;;  %v700_v56 = vmul.f32 %v926_v53, %v896_v50 }
 0x303   : > { %v583_v54 = vpop.f32.mrf.mxu0  ;;  %v599_v58 = vpop.f32.mrf.mxu1 }
 0x304   : > { %722 = vrot.lane.b32.xlu1 %v702_v52, %s960_s21  ;;  %v696_v61 = vmul.f32 %v928_v55, %v583_v54  ;;  %v704_v63 = vmul.f32 %v930_v57, %v599_v58 }
 0x306   : > { %720 = vrot.lane.b32.xlu0 %v700_v56, %s960_s21 }
 0x308   : > { %716 = vrot.lane.b32.xlu1 %v696_v61, %s960_s21 }
 0x30a   : > { %724 = vrot.lane.b32.xlu0 %v704_v63, %s960_s21 }
 0x30c   : > { %726 = vrot.lane.b32.xlu1 %v706_v4, %s960_s21 }
 0x372   : > { %v719_v22 = vpop.permute.xlu1 %718 }
 0x373   : > { %v737_v24 = vsel %vm286_vm0, %v422_v20, %v719_v22 }
 0x374   : > { %745 = vst.msk [vmem:[%s1157_s24 + $0x10] sm:$0xff] %vm742_vm5, %v737_v24  ;;  %v715_v59 = vpop.permute.xlu0 %714 }
 0x375   : > { %v735_v29 = vsel %vm286_vm0, %v418_v23, %v715_v59 }
 0x376   : > { %743 = vst.msk [vmem:[%s1157_s24] sm:$0xff] %vm742_vm5, %v735_v29  ;;  %v723_v31 = vpop.permute.xlu1 %722 }
 0x377   : > { %v739_v1 = vsel %vm286_vm0, %v426_v28, %v723_v31 }
 0x378   : > { %747 = vst.msk [vmem:[%s1157_s24 + $0x20] sm:$0xff] %vm742_vm5, %v739_v1  ;;  %v721_v36 = vpop.permute.xlu0 %720 }
 0x379   : > { %v738_v9 = vsel %vm286_vm0, %v424_v32, %v721_v36 }
 0x37a   : > { %746 = vst.msk [vmem:[%s1157_s24 + $0x18] sm:$0xff] %vm742_vm5, %v738_v9  ;;  %v717_v40 = vpop.permute.xlu1 %716 }
 0x37b   : > { %v736_v2 = vsel %vm286_vm0, %v420_v37, %v717_v40 }
 0x37c   : > { %744 = vst.msk [vmem:[%s1157_s24 + $0x8] sm:$0xff] %vm742_vm5, %v736_v2  ;;  %v725_v42 = vpop.permute.xlu0 %724 }
 0x37d   : > { %v740_v34 = vsel %vm286_vm0, %v428_v41, %v725_v42 }
 0x37e   : > { %748 = vst.msk [vmem:[%s1157_s24 + $0x28] sm:$0xff] %vm742_vm5, %v740_v34  ;;  %v727_v6 = vpop.permute.xlu1 %726 }
 0x37f   : > { %v741_v43 = vsel %vm286_vm0, %v430_v33, %v727_v6 }
 0x380   : > { %749 = vst.msk [vmem:[%s1157_s24 + $0x30] sm:$0xff] %vm742_vm5, %v741_v43 }
 0x381 PF: > { %s12_s9 = sadd.s32 1, %s953_s9  }
 0x382   : > { %p9_p4 = scmp.ge.s32.totalorder %s12_s9, 4  }
 0x384   :  { %11 = sbr.rel (!%p9_p4) target bundleno = 1 (0x1), region = 61 }

// kernel: spacetimeformer_forward.81
= control target key start
LH: loop header
LB: loop body
LE: loop exit
PB: predicated region body
PF: predicated region fallthrough
CT: control target
= control target key end

     0   :  { %vm19_vm0 = vcmask 56320   ;;  %v340_v0 = vmov 0.0   ;;  %vm341_vm1 = vmmov 0   ;;  %vm85_vm2 = vcmask 261120   ;;  %s527_s1 = inlined_call_operand.vmem [shape: bf16[32,7], index: 1, kind: input, shape index: {}]   ;;  %s528_s0 = inlined_call_operand.vmem [shape: f32[112,32], index: 0, kind: input, shape index: {}]   ;;  %s529_s2 = inlined_call_operand.vmem [shape: f32[1,7], index: 2, kind: input, shape index: {}]   ;;  %s530_s3 = inlined_call_operand.vmem [shape: f32[112,7], index: 3, kind: output, shape index: {}]  }
   0x1   :  { %300 = vmatprep.subr.bf16.mxu0 %v340_v0  ;;  %v338_v1 = vld [vmem:[%s527_s1 + $0x8] sm:$0xff]   ;;  %332 = vmatprep.subr.bf16.mxu1 %v340_v0  ;;  %20 = vst.msk [vmem:[#allocation2] sm:$0xff] %vm19_vm0, %v340_v0  ;;  %21 = vst.msk [vmem:[#allocation2 + $0x8] sm:$0xff] %vm19_vm0, %v340_v0  ;;  %v339_v2 = vld [vmem:[%s527_s1] sm:$0xff]  }
   0x2   :  { %22 = vst.msk [vmem:[#allocation2 + $0x10] sm:$0xff] %vm19_vm0, %v340_v0  ;;  %23 = vst.msk [vmem:[#allocation2 + $0x18] sm:$0xff] %vm19_vm0, %v340_v0  ;;  %304 = vmatprep.mubr.msk.bf16.mxu0 %vm341_vm1, %v340_v0  ;;  %320 = vmatprep.mubr.msk.bf16.mxu1 %vm341_vm1, %v340_v0  ;;  %v48_v3 = vld [vmem:[%s528_s0] sm:$0xff]  ;;  %v49_v4 = vld [vmem:[%s528_s0 + $0x8] sm:$0xff] }
   0x3   :  { %24 = vst.msk [vmem:[#allocation2 + $0x20] sm:$0xff] %vm19_vm0, %v340_v0  ;;  %25 = vst.msk [vmem:[#allocation2 + $0x28] sm:$0xff] %vm19_vm0, %v340_v0  ;;  %301 = vmatpush3.bf16.msra.mxu0 %v338_v1  ;;  %334 = vmatpush3.bf16.msra.mxu1 %v338_v1  ;;  %v56_v5 = vld [vmem:[%s528_s0 + $0x40] sm:$0xff]  ;;  %v57_v6 = vld [vmem:[%s528_s0 + $0x48] sm:$0xff]  ;;  %v62_v7 = vpack.c.bf16 %v49_v4, %v48_v3 }
   0x4   :  { %26 = vst.msk [vmem:[#allocation2 + $0x30] sm:$0xff] %vm19_vm0, %v340_v0  ;;  %27 = vst.msk [vmem:[#allocation2 + $0x38] sm:$0xff] %vm19_vm0, %v340_v0  ;;  %302 = vmatprep.subr.bf16.mxu0 %v340_v0  ;;  %333 = vmatprep.subr.bf16.mxu1 %v340_v0  ;;  %v66_v8 = vpack.c.bf16 %v57_v6, %v56_v5  ;;  %v50_v9 = vld [vmem:[%s528_s0 + $0x10] sm:$0xff]  ;;  %v51_v10 = vld [vmem:[%s528_s0 + $0x18] sm:$0xff] }
   0x5   :  { %28 = vst.msk [vmem:[#allocation2 + $0x40] sm:$0xff] %vm19_vm0, %v340_v0  ;;  %29 = vst.msk [vmem:[#allocation2 + $0x48] sm:$0xff] %vm19_vm0, %v340_v0  ;;  %v58_v11 = vld [vmem:[%s528_s0 + $0x50] sm:$0xff]  ;;  %v59_v12 = vld [vmem:[%s528_s0 + $0x58] sm:$0xff]  ;;  %v63_v13 = vpack.c.bf16 %v51_v10, %v50_v9 }
   0x6   :  { %30 = vst.msk [vmem:[#allocation2 + $0x50] sm:$0xff] %vm19_vm0, %v340_v0  ;;  %31 = vst.msk [vmem:[#allocation2 + $0x58] sm:$0xff] %vm19_vm0, %v340_v0  ;;  %v67_v14 = vpack.c.bf16 %v59_v12, %v58_v11  ;;  %v52_v15 = vld [vmem:[%s528_s0 + $0x20] sm:$0xff]  ;;  %v53_v16 = vld [vmem:[%s528_s0 + $0x28] sm:$0xff] }
   0x7   :  { %32 = vst.msk [vmem:[#allocation2 + $0x60] sm:$0xff] %vm19_vm0, %v340_v0  ;;  %33 = vst.msk [vmem:[#allocation2 + $0x68] sm:$0xff] %vm19_vm0, %v340_v0  ;;  %303 = vmatpush3.bf16.msra.mxu0 %v339_v2  ;;  %335 = vmatpush3.bf16.msra.mxu1 %v339_v2  ;;  %v60_v17 = vld [vmem:[%s528_s0 + $0x60] sm:$0xff]  ;;  %v61_v18 = vld [vmem:[%s528_s0 + $0x68] sm:$0xff]  ;;  %v64_v19 = vpack.c.bf16 %v53_v16, %v52_v15 }
   0x8   :  { %v68_v20 = vpack.c.bf16 %v61_v18, %v60_v17  ;;  %v54_v21 = vld [vmem:[%s528_s0 + $0x30] sm:$0xff]  ;;  %v55_v22 = vld [vmem:[%s528_s0 + $0x38] sm:$0xff]  ;;  %v34_v24 = vld [vmem:[#allocation2] sm:$0xff] }
   0x9   :  { %v65_v23 = vpack.c.bf16 %v55_v22, %v54_v21  ;;  %v35_v31 = vld [vmem:[#allocation2 + $0x8] sm:$0xff]  ;;  %v36_v39 = vld [vmem:[#allocation2 + $0x10] sm:$0xff]  ;;  %v445_v42 = vld [vmem:[%s529_s2] ss:$0 sm:$0xff] }
   0xa   :  { %305 = vmatmul.mubr.msk.bf16.vlgmr.msra.gmra.mxu0 %vm85_vm2, %v62_v7  ;;  %321 = vmatmul.mubr.msk.bf16.vlgmr.msra.gmra.mxu1 %vm85_vm2, %v66_v8  ;;  %v37_v47 = vld [vmem:[#allocation2 + $0x18] sm:$0xff]  ;;  %v38_v59 = vld [vmem:[#allocation2 + $0x20] sm:$0xff]  ;;  %v39_v7 = vld [vmem:[#allocation2 + $0x28] sm:$0xff] }
   0xb   :  { %308 = vmatprep.mubr.msk.bf16.mxu0 %vm341_vm1, %v340_v0  ;;  %324 = vmatprep.mubr.msk.bf16.mxu1 %vm341_vm1, %v340_v0  ;;  %v40_v22 = vld [vmem:[#allocation2 + $0x30] sm:$0xff] }
   0xc   :  { %v42_v25 = vld [vmem:[#allocation2 + $0x40] sm:$0xff]  ;;  %v43_v33 = vld [vmem:[#allocation2 + $0x48] sm:$0xff] }
   0xd   :  { %v44_v41 = vld [vmem:[#allocation2 + $0x50] sm:$0xff]  ;;  %v45_v52 = vld [vmem:[#allocation2 + $0x58] sm:$0xff] }
   0xe   :  { %v47_v12 = vld [vmem:[#allocation2 + $0x68] sm:$0xff] }
  0x12   :  { %309 = vmatmul.mubr.msk.bf16.gmra.mxu0 %vm85_vm2, %v63_v13  ;;  %325 = vmatmul.mubr.msk.bf16.gmra.mxu1 %vm85_vm2, %v67_v14 }
  0x13   :  { %312 = vmatprep.mubr.msk.bf16.mxu0 %vm341_vm1, %v340_v0  ;;  %328 = vmatprep.mubr.msk.bf16.mxu1 %vm341_vm1, %v340_v0 }
  0x1a   :  { %313 = vmatmul.mubr.msk.bf16.gmra.mxu0 %vm85_vm2, %v64_v19  ;;  %329 = vmatmul.mubr.msk.bf16.gmra.mxu1 %vm85_vm2, %v68_v20 }
  0x1b   :  { %316 = vmatprep.mubr.msk.bf16.mxu0 %vm341_vm1, %v340_v0  ;;  %v46_v0 = vld [vmem:[#allocation2 + $0x60] sm:$0xff] }
  0x22   :  { %317 = vmatmul.mubr.msk.bf16.gmra.mxu0 %vm85_vm2, %v65_v23 }
  0xca   :  { %v141_v26 = vpop.f32.mrf.mxu0  ;;  %v173_v27 = vpop.f32.mrf.mxu1 }
  0xcb   :  { %v196_v28 = vadd.f32 %v141_v26, %v34_v24  ;;  %v204_v29 = vadd.f32 %v173_v27, %v42_v25 }
  0xcc   :  { %v306_v30 = vpop.f32.mrf.mxu0  ;;  %v322_v32 = vpop.f32.mrf.mxu1 }
  0xcd   :  { %211 = vst.msk [vmem:[#allocation2] sm:$0xff] %vm19_vm0, %v196_v28  ;;  %219 = vst.msk [vmem:[#allocation2 + $0x40] sm:$0xff] %vm19_vm0, %v204_v29 }
  0xce   :  { %v144_v34 = vpop.f32.mrf.mxu0  ;;  %v176_v35 = vpop.f32.mrf.mxu1 }
  0xcf   :  { %v197_v36 = vadd.f32 %v144_v34, %v35_v31  ;;  %v205_v37 = vadd.f32 %v176_v35, %v43_v33  ;;  %v41_v31 = vld [vmem:[#allocation2 + $0x38] sm:$0xff] }
  0xd0   :  { %v307_v38 = vpop.f32.mrf.mxu0  ;;  %v323_v40 = vpop.f32.mrf.mxu1 }
  0xd1   :  { %212 = vst.msk [vmem:[#allocation2 + $0x8] sm:$0xff] %vm19_vm0, %v197_v36  ;;  %220 = vst.msk [vmem:[#allocation2 + $0x48] sm:$0xff] %vm19_vm0, %v205_v37 }
  0xd2   :  { %v149_v43 = vpop.f32.mrf.mxu0  ;;  %v181_v44 = vpop.f32.mrf.mxu1 }
  0xd3   :  { %v198_v45 = vadd.f32 %v149_v43, %v36_v39  ;;  %v206_v46 = vadd.f32 %v181_v44, %v44_v41 }
  0xd4   :  { %v228_v48 = vld [vmem:[#allocation2] sm:$0xff]  ;;  %v310_v50 = vpop.f32.mrf.mxu0  ;;  %v326_v51 = vpop.f32.mrf.mxu1 }
  0xd5   :  { %v236_v49 = vld [vmem:[#allocation2 + $0x40] sm:$0xff]  ;;  %v249_v53 = vadd.f32 %v445_v42, %v228_v48  ;;  %213 = vst.msk [vmem:[#allocation2 + $0x10] sm:$0xff] %vm19_vm0, %v198_v45  ;;  %221 = vst.msk [vmem:[#allocation2 + $0x50] sm:$0xff] %vm19_vm0, %v206_v46 }
  0xd6   :  { %v257_v54 = vadd.f32 %v445_v42, %v236_v49  ;;  %v152_v55 = vpop.f32.mrf.mxu0  ;;  %v184_v56 = vpop.f32.mrf.mxu1 }
  0xd7   :  { %263 = vst.msk [vmem:[%s530_s3] sm:$0xff] %vm19_vm0, %v249_v53  ;;  %v199_v57 = vadd.f32 %v152_v55, %v37_v47  ;;  %v207_v58 = vadd.f32 %v184_v56, %v45_v52 }
  0xd8   :  { %271 = vst.msk [vmem:[%s530_s3 + $0x40] sm:$0xff] %vm19_vm0, %v257_v54  ;;  %v229_v60 = vld [vmem:[#allocation2 + $0x8] sm:$0xff]  ;;  %v311_v62 = vpop.f32.mrf.mxu0  ;;  %v327_v63 = vpop.f32.mrf.mxu1 }
  0xd9   :  { %v237_v61 = vld [vmem:[#allocation2 + $0x48] sm:$0xff]  ;;  %v250_v1 = vadd.f32 %v445_v42, %v229_v60  ;;  %214 = vst.msk [vmem:[#allocation2 + $0x18] sm:$0xff] %vm19_vm0, %v199_v57  ;;  %222 = vst.msk [vmem:[#allocation2 + $0x58] sm:$0xff] %vm19_vm0, %v207_v58 }
  0xda   :  { %v258_v2 = vadd.f32 %v445_v42, %v237_v61  ;;  %v157_v3 = vpop.f32.mrf.mxu0  ;;  %v189_v4 = vpop.f32.mrf.mxu1 }
  0xdb   :  { %264 = vst.msk [vmem:[%s530_s3 + $0x8] sm:$0xff] %vm19_vm0, %v250_v1  ;;  %v200_v5 = vadd.f32 %v157_v3, %v38_v59  ;;  %v208_v6 = vadd.f32 %v189_v4, %v46_v0 }
  0xdc   :  { %272 = vst.msk [vmem:[%s530_s3 + $0x48] sm:$0xff] %vm19_vm0, %v258_v2  ;;  %v230_v8 = vld [vmem:[#allocation2 + $0x10] sm:$0xff]  ;;  %v314_v10 = vpop.f32.mrf.mxu0  ;;  %v330_v11 = vpop.f32.mrf.mxu1 }
  0xdd   :  { %v238_v9 = vld [vmem:[#allocation2 + $0x50] sm:$0xff]  ;;  %v251_v13 = vadd.f32 %v445_v42, %v230_v8  ;;  %215 = vst.msk [vmem:[#allocation2 + $0x20] sm:$0xff] %vm19_vm0, %v200_v5  ;;  %223 = vst.msk [vmem:[#allocation2 + $0x60] sm:$0xff] %vm19_vm0, %v208_v6 }
  0xde   :  { %v259_v14 = vadd.f32 %v445_v42, %v238_v9  ;;  %v160_v15 = vpop.f32.mrf.mxu0  ;;  %v192_v16 = vpop.f32.mrf.mxu1 }
  0xdf   :  { %265 = vst.msk [vmem:[%s530_s3 + $0x10] sm:$0xff] %vm19_vm0, %v251_v13  ;;  %v201_v17 = vadd.f32 %v160_v15, %v39_v7  ;;  %v209_v18 = vadd.f32 %v192_v16, %v47_v12 }
  0xe0   :  { %273 = vst.msk [vmem:[%s530_s3 + $0x50] sm:$0xff] %vm19_vm0, %v259_v14  ;;  %v231_v19 = vld [vmem:[#allocation2 + $0x18] sm:$0xff]  ;;  %v315_v21 = vpop.f32.mrf.mxu0  ;;  %v331_v23 = vpop.f32.mrf.mxu1 }
  0xe1   :  { %v239_v20 = vld [vmem:[#allocation2 + $0x58] sm:$0xff]  ;;  %v252_v24 = vadd.f32 %v445_v42, %v231_v19  ;;  %216 = vst.msk [vmem:[#allocation2 + $0x28] sm:$0xff] %vm19_vm0, %v201_v17  ;;  %224 = vst.msk [vmem:[#allocation2 + $0x68] sm:$0xff] %vm19_vm0, %v209_v18 }
  0xe2   :  { %v260_v25 = vadd.f32 %v445_v42, %v239_v20  ;;  %v165_v26 = vpop.f32.mrf.mxu0 }
  0xe3   :  { %266 = vst.msk [vmem:[%s530_s3 + $0x18] sm:$0xff] %vm19_vm0, %v252_v24  ;;  %v202_v27 = vadd.f32 %v165_v26, %v40_v22 }
  0xe4   :  { %274 = vst.msk [vmem:[%s530_s3 + $0x58] sm:$0xff] %vm19_vm0, %v260_v25  ;;  %v232_v28 = vld [vmem:[#allocation2 + $0x20] sm:$0xff]  ;;  %v318_v30 = vpop.f32.mrf.mxu0 }
  0xe5   :  { %v240_v29 = vld [vmem:[#allocation2 + $0x60] sm:$0xff]  ;;  %v253_v32 = vadd.f32 %v445_v42, %v232_v28  ;;  %217 = vst.msk [vmem:[#allocation2 + $0x30] sm:$0xff] %vm19_vm0, %v202_v27 }
  0xe6   :  { %v261_v33 = vadd.f32 %v445_v42, %v240_v29  ;;  %v168_v34 = vpop.f32.mrf.mxu0 }
  0xe7   :  { %267 = vst.msk [vmem:[%s530_s3 + $0x20] sm:$0xff] %vm19_vm0, %v253_v32  ;;  %v203_v35 = vadd.f32 %v168_v34, %v41_v31 }
  0xe8   :  { %275 = vst.msk [vmem:[%s530_s3 + $0x60] sm:$0xff] %vm19_vm0, %v261_v33  ;;  %v233_v36 = vld [vmem:[#allocation2 + $0x28] sm:$0xff]  ;;  %v319_v38 = vpop.f32.mrf.mxu0 }
  0xe9   :  { %v241_v37 = vld [vmem:[#allocation2 + $0x68] sm:$0xff]  ;;  %v254_v39 = vadd.f32 %v445_v42, %v233_v36  ;;  %218 = vst.msk [vmem:[#allocation2 + $0x38] sm:$0xff] %vm19_vm0, %v203_v35 }
  0xea   :  { %v262_v40 = vadd.f32 %v445_v42, %v241_v37 }
  0xeb   :  { %268 = vst.msk [vmem:[%s530_s3 + $0x28] sm:$0xff] %vm19_vm0, %v254_v39 }
  0xec   :  { %276 = vst.msk [vmem:[%s530_s3 + $0x68] sm:$0xff] %vm19_vm0, %v262_v40  ;;  %v234_v41 = vld [vmem:[#allocation2 + $0x30] sm:$0xff] }
  0xed   :  { %v255_v43 = vadd.f32 %v445_v42, %v234_v41 }
  0xef   :  { %269 = vst.msk [vmem:[%s530_s3 + $0x30] sm:$0xff] %vm19_vm0, %v255_v43 }
  0xf0   :  { %v235_v44 = vld [vmem:[#allocation2 + $0x38] sm:$0xff] }
  0xf1   :  { %v256_v45 = vadd.f32 %v445_v42, %v235_v44 }
  0xf3   :  { %270 = vst.msk [vmem:[%s530_s3 + $0x38] sm:$0xff] %vm19_vm0, %v256_v45 }

</bundles_post_ra>
